<compile_context>
chip_gen: v7x
topology: tpu7x:2x2x1
jax: 0.10.0
libtpu: 0.0.40
codegen_flags: <defaults>
</compile_context>

<pallas_src>
import jax
import jax.numpy as jnp
from jax.experimental import pallas as pl
from jax.experimental.pallas import tpu as pltpu

# ---- model hyper-parameters (TransModel defaults) ---------------------------
ACC_FRAMES = 128          # L  -> transformer d_model
ACC_COORDS = 4            # C_in of acc data
EMBED_DIM = 32            # conv embed dim -> transformer sequence length
NUM_HEADS = 2
HEAD_DIM = ACC_FRAMES // NUM_HEADS     # 64
NUM_LAYERS = 2
FF_DIM = 32
NUM_CLASSES = 2
LN_EPS = 1e-5

LANE = 128
_QKV_BLOCKS = 3 * NUM_HEADS            # (q|k|v) x heads, each padded to 128 cols


def _round8(n):
    return -(-n // 8) * 8


# ---- static slab layouts (shared by the wrapper-side packer and the kernel) --
def _build_main_layout():
    """Row layout of the main (R, 128) f32 parameter slab (8-row-aligned)."""
    layout = {}
    off = 0

    def add(name, rows, cols):
        nonlocal off
        layout[name] = (off, rows, cols)
        off += _round8(rows)

    for l in range(NUM_LAYERS):
        add(f"qkv_w_{l}", _QKV_BLOCKS * LANE, LANE)   # head-padded  (768, 128)
        add(f"qkv_b_{l}", _QKV_BLOCKS, LANE)          # one 128-wide row per block
        add(f"op_w_{l}", NUM_HEADS * LANE, LANE)      # transposed, head-padded (256, 128)
        add(f"op_b_{l}", 1, LANE)
        add(f"n1g_{l}", 1, LANE)
        add(f"n1b_{l}", 1, LANE)
        add(f"n2g_{l}", 1, LANE)
        add(f"n2b_{l}", 1, LANE)
        add(f"ff1_w_{l}", FF_DIM, LANE)               # (32, 128), used as x @ W.T
        add(f"ff1_b_{l}", 1, FF_DIM)
        add(f"ff2_w_{l}", FF_DIM, LANE)               # transposed (32, 128), used as x @ W
        add(f"ff2_b_{l}", 1, LANE)
    add("ln1_w", 32, LANE)
    add("ln1_b", 1, 32)
    add("ln2_w", 16, 32)
    add("ln2_b", 1, 16)
    add("out_w", NUM_CLASSES, 16)
    add("out_b", 1, NUM_CLASSES)
    return layout, _round8(off)


MAIN_LAYOUT, MAIN_ROWS = _build_main_layout()
assert MAIN_ROWS % 8 == 0

# Conv slab: one (Cout, 3*Cin + 1) augmented weight per conv layer (bias folded
# into the last column, taps fused along the contraction dim), 256 lanes wide.
CONV_COLS = 256


def _build_conv_layout():
    layout = {}
    off = 0
    for name, cout, cin in (("c1", EMBED_DIM, ACC_COORDS),
                            ("c2", 2 * EMBED_DIM, EMBED_DIM),
                            ("c3", EMBED_DIM, 2 * EMBED_DIM)):
        layout[name] = (off, cout, 3 * cin + 1)
        off += _round8(cout)
    return layout, _round8(off)


CONV_LAYOUT, CONV_ROWS = _build_conv_layout()
assert all(cols <= CONV_COLS for (_, _, cols) in CONV_LAYOUT.values())


# ---- shared math ------------------------------------------------------------
def _linear(x, w, b):
    """PyTorch Linear: x @ w.T + b.  x:(M,K) w:(N,K) b:(1,N) -> (M,N)."""
    y = jax.lax.dot_general(x, w, (((1,), (1,)), ((), ())),
                            preferred_element_type=jnp.float32)
    return y + b


def _layernorm(x, g, b):
    mu = jnp.mean(x, axis=-1, keepdims=True)
    xc = x - mu
    var = jnp.mean(xc * xc, axis=-1, keepdims=True)
    return xc * jax.lax.rsqrt(var + LN_EPS) * g + b


# ---- Pallas kernel (one batch tile of TB elements per grid step) ------------
def _make_kernel(tb):
    seq, d, nh = EMBED_DIM, ACC_FRAMES, NUM_HEADS
    tbl = tb * ACC_FRAMES
    scale = 1.0 / float(HEAD_DIM) ** 0.5

    def kernel(x_ref, pm_ref, pc_ref, out_ref):
        def prow(name):
            off, rows, cols = MAIN_LAYOUT[name]
            return pm_ref[off:off + rows, :cols]

        # Boundary masks for the rolled conv taps (built once, reused 3x):
        # zero the wrapped / cross-batch-element column so padding='same' is exact.
        lane = jax.lax.broadcasted_iota(jnp.int32, (1, tbl), 1)
        if ACC_FRAMES & (ACC_FRAMES - 1) == 0:                 # power-of-two fast path
            t = jnp.bitwise_and(lane, ACC_FRAMES - 1)          # lane % ACC_FRAMES
        else:
            t = jax.lax.rem(lane, ACC_FRAMES)
        mask_prev = (t != 0).astype(jnp.float32)
        mask_next = (t != ACC_FRAMES - 1).astype(jnp.float32)
        ones_row = jnp.ones((1, tbl), jnp.float32)

        def conv_same(x, name):
            # Conv1d k=3, stride=1, 'same' zero padding.  All 3 taps + the bias
            # are fused into ONE MXU matmul: [w0|w1|w2|b] @ [x[t-1]; x[t]; x[t+1]; 1].
            off, rows, cols = CONV_LAYOUT[name]
            w_aug = pc_ref[off:off + rows, :cols]                        # (Cout, 3*Cin+1)
            x_prev = pltpu.roll(x, shift=1, axis=1) * mask_prev          # col t <- x[:, t-1]
            x_next = pltpu.roll(x, shift=tbl - 1, axis=1) * mask_next    # col t <- x[:, t+1]
            xs = jnp.concatenate([x_prev, x, x_next, ones_row], axis=0)  # (3*Cin+1, tb*L)
            return jnp.dot(w_aug, xs, preferred_element_type=jnp.float32)

        # input_proj: three Conv1d (no activations in between), batch on lanes.
        x = x_ref[...]                                         # (4,  tb*L)
        x = conv_same(x, "c1")                                 # (32, tb*L)
        x = conv_same(x, "c2")                                 # (64, tb*L)
        x = conv_same(x, "c3")                                 # (32, tb*L)

        # (seq, tb*L) -> (tb*seq, d_model).  With tb == 1 this is already the
        # transformer input; no re-layout at all.
        if tb > 1:
            x = jnp.transpose(x.reshape(seq, tb, d), (1, 0, 2)).reshape(tb * seq, d)

        # transformer encoder (2 pre-norm layers).  The encoder's final
        # LayerNorm is constructed but never applied by the PyTorch forward.
        for l in range(NUM_LAYERS):
            h = _layernorm(x, prow(f"n1g_{l}"), prow(f"n1b_{l}"))
            # one head-padded QKV matmul: (tb*seq, 128) x (6*128, 128)^T
            qkv = jax.lax.dot_general(h, prow(f"qkv_w_{l}"),
                                      (((1,), (1,)), ((), ())),
                                      preferred_element_type=jnp.float32)
            boff = MAIN_LAYOUT[f"qkv_b_{l}"][0]
            head_blocks = []
            for hh in range(nh):
                def qkv_slice(typ, hh=hh):
                    blk = typ * nh + hh                       # 128-aligned column block
                    return (qkv[:, blk * LANE:(blk + 1) * LANE]
                            + pm_ref[boff + blk:boff + blk + 1, :])
                q, k, v = qkv_slice(0), qkv_slice(1), qkv_slice(2)
                av = []
                for b in range(tb):                            # tiny static loop
                    r0 = b * seq
                    qb, kb, vb = q[r0:r0 + seq], k[r0:r0 + seq], v[r0:r0 + seq]
                    s = jax.lax.dot_general(qb, kb, (((1,), (1,)), ((), ())),
                                            preferred_element_type=jnp.float32) * scale
                    s = s - jnp.max(s, axis=-1, keepdims=True)
                    p = jnp.exp(s)
                    inv = pl.reciprocal(jnp.sum(p, axis=-1, keepdims=True), approx=True)
                    av.append(jnp.dot(p * inv, vb, preferred_element_type=jnp.float32))
                head_blocks.append(av[0] if tb == 1 else jnp.concatenate(av, axis=0))
            attn = jnp.concatenate(head_blocks, axis=1)        # (tb*seq, nh*128), padded
            x = x + jnp.dot(attn, prow(f"op_w_{l}"),
                            preferred_element_type=jnp.float32) + prow(f"op_b_{l}")

            h = _layernorm(x, prow(f"n2g_{l}"), prow(f"n2b_{l}"))
            f = jax.lax.dot_general(h, prow(f"ff1_w_{l}"), (((1,), (1,)), ((), ())),
                                    preferred_element_type=jnp.float32) + prow(f"ff1_b_{l}")
            f = jnp.maximum(f, 0.0)
            x = x + jnp.dot(f, prow(f"ff2_w_{l}"),
                            preferred_element_type=jnp.float32) + prow(f"ff2_b_{l}")

        # rearrange + avg_pool1d(kernel=C) == per-batch mean over the seq rows,
        # then a batched MLP head and one store of the (tb, NUM_CLASSES) block.
        if tb == 1:
            pooled = jnp.mean(x, axis=0, keepdims=True)                 # (1, 128)
        else:
            pooled = jnp.mean(x.reshape(tb, seq, d), axis=1)            # (tb, 128)
        h = jnp.maximum(_linear(pooled, prow("ln1_w"), prow("ln1_b")), 0.0)   # (tb, 32)
        h = jnp.maximum(_linear(h, prow("ln2_w"), prow("ln2_b")), 0.0)        # (tb, 16)
        out_ref[0] = _linear(h, prow("out_w"), prow("out_b"))                 # (tb, 2)

    return kernel


# ---- wrapper ----------------------------------------------------------------
def trans_model_forward(acc_data, packed_params, *, batch_tile=None):
    """acc_data: (B, L, C) like the PyTorch module.  skl_data is unused."""
    pm, pc = packed_params
    B, L, C = acc_data.shape
    assert (L, C) == (ACC_FRAMES, ACC_COORDS)
    if batch_tile is None:
        # >=2 grid steps when possible (v7x: one per TensorCore), capped so
        # per-step activations stay tiny for large batches (v5e scoped VMEM).
        batch_tile = 1 if B <= 2 else max(1, min(8, (B + 1) // 2))
    tb = int(batch_tile)
    g = pl.cdiv(B, tb)
    bp = g * tb

    # glue: (B, L, C) -> (C, B, L) -> (C, Bp*L); batch folded onto the lane axis.
    x = jnp.transpose(acc_data.astype(jnp.float32), (2, 0, 1))
    if bp != B:
        x = jnp.pad(x, ((0, 0), (0, bp - B), (0, 0)))
    x = x.reshape(ACC_COORDS, bp * ACC_FRAMES)

    out = pl.pallas_call(
        _make_kernel(tb),
        grid=(g,),
        out_shape=jax.ShapeDtypeStruct((g, tb, NUM_CLASSES), jnp.float32),
        in_specs=[
            # per-step batch tile of the input
            pl.BlockSpec((ACC_COORDS, tb * ACC_FRAMES), lambda i: (0, i)),
            # parameter slabs: constant index map -> fetched once, resident.
            pl.BlockSpec((MAIN_ROWS, LANE), lambda i: (0, 0)),
            pl.BlockSpec((CONV_ROWS, CONV_COLS), lambda i: (0, 0)),
        ],
        out_specs=pl.BlockSpec((1, tb, NUM_CLASSES), lambda i: (i, 0, 0)),
        compiler_params=pltpu.CompilerParams(dimension_semantics=("parallel",)),
    )(x, pm, pc)
    return out.reshape(bp, NUM_CLASSES)[:B]


# ---- wrapper-side, one-time parameter packing into the two slabs ------------
def pack_params(params):
    (c1w, c1b, c2w, c2b, c3w, c3b, qkv_w, qkv_b, op_w, op_b,
     n1g, n1b, n2g, n2b, ff1_w, ff1_b, ff2_w, ff2_b,
     ln1w, ln1b, ln2w, ln2b, ow, ob) = params
    D, HD = ACC_FRAMES, HEAD_DIM

    pm = jnp.zeros((MAIN_ROWS, LANE), jnp.float32)

    def put(name, val):
        nonlocal pm
        off, rows, cols = MAIN_LAYOUT[name]
        assert val.shape == (rows, cols), (name, val.shape, (rows, cols))
        pm = pm.at[off:off + rows, :cols].set(val.astype(jnp.float32))

    for l in range(NUM_LAYERS):
        # QKV weight/bias, re-laid out into 6 blocks of 128 output columns
        # (64 real rows + 64 zero rows each) so in-kernel slices are 128-aligned.
        wq = jnp.zeros((_QKV_BLOCKS * LANE, D), jnp.float32)
        bq = jnp.zeros((_QKV_BLOCKS, LANE), jnp.float32)
        for t in range(3):                 # q, k, v
            for h in range(NUM_HEADS):
                blk = t * NUM_HEADS + h
                wq = wq.at[blk * LANE:blk * LANE + HD, :].set(
                    qkv_w[l][t * D + h * HD:t * D + (h + 1) * HD, :])
                bq = bq.at[blk, :HD].set(
                    qkv_b[l][0, t * D + h * HD:t * D + (h + 1) * HD])
        put(f"qkv_w_{l}", wq)
        put(f"qkv_b_{l}", bq)
        # out projection, transposed + head-padded: attn_pad (M, 2*128) @ (2*128, 128)
        wo = jnp.zeros((NUM_HEADS * LANE, D), jnp.float32)
        for h in range(NUM_HEADS):
            wo = wo.at[h * LANE:h * LANE + HD, :].set(
                op_w[l][:, h * HD:(h + 1) * HD].T)
        put(f"op_w_{l}", wo)
        put(f"op_b_{l}", op_b[l])
        put(f"n1g_{l}", n1g[l]); put(f"n1b_{l}", n1b[l])
        put(f"n2g_{l}", n2g[l]); put(f"n2b_{l}", n2b[l])
        put(f"ff1_w_{l}", ff1_w[l])
        put(f"ff1_b_{l}", ff1_b[l])
        put(f"ff2_w_{l}", ff2_w[l].T)      # (128, 32) -> (32, 128)
        put(f"ff2_b_{l}", ff2_b[l])
    put("ln1_w", ln1w); put("ln1_b", ln1b)
    put("ln2_w", ln2w); put("ln2_b", ln2b)
    put("out_w", ow);   put("out_b", ob)

    pc = jnp.zeros((CONV_ROWS, CONV_COLS), jnp.float32)

    def put_conv(name, w, b):
        nonlocal pc
        off, rows, cols = CONV_LAYOUT[name]
        waug = jnp.concatenate([w[0], w[1], w[2], b], axis=1)   # (Cout, 3*Cin+1)
        assert waug.shape == (rows, cols)
        pc = pc.at[off:off + rows, :cols].set(waug.astype(jnp.float32))

    put_conv("c1", c1w, c1b)
    put_conv("c2", c2w, c2b)
    put_conv("c3", c3w, c3b)
    return pm, pc


# ---- deterministic synthetic parameters ------------------------------------
def init_params(key):
    def nrm(k, shape, scale):
        return (scale * jax.random.normal(k, shape)).astype(jnp.float32)

    ks = iter(jax.random.split(key, 32))
    D = ACC_FRAMES
    c1w = nrm(next(ks), (3, EMBED_DIM, ACC_COORDS), 0.2)
    c1b = nrm(next(ks), (EMBED_DIM, 1), 0.02)
    c2w = nrm(next(ks), (3, 2 * EMBED_DIM, EMBED_DIM), 0.1)
    c2b = nrm(next(ks), (2 * EMBED_DIM, 1), 0.02)
    c3w = nrm(next(ks), (3, EMBED_DIM, 2 * EMBED_DIM), 0.1)
    c3b = nrm(next(ks), (EMBED_DIM, 1), 0.02)
    qkv_w = nrm(next(ks), (NUM_LAYERS, 3 * D, D), 0.05)
    qkv_b = nrm(next(ks), (NUM_LAYERS, 1, 3 * D), 0.02)
    op_w = nrm(next(ks), (NUM_LAYERS, D, D), 0.05)
    op_b = nrm(next(ks), (NUM_LAYERS, 1, D), 0.02)
    n1g = jnp.ones((NUM_LAYERS, 1, D), jnp.float32)
    n1b = jnp.zeros((NUM_LAYERS, 1, D), jnp.float32)
    n2g = jnp.ones((NUM_LAYERS, 1, D), jnp.float32)
    n2b = jnp.zeros((NUM_LAYERS, 1, D), jnp.float32)
    ff1_w = nrm(next(ks), (NUM_LAYERS, FF_DIM, D), 0.05)
    ff1_b = nrm(next(ks), (NUM_LAYERS, 1, FF_DIM), 0.02)
    ff2_w = nrm(next(ks), (NUM_LAYERS, D, FF_DIM), 0.05)
    ff2_b = nrm(next(ks), (NUM_LAYERS, 1, D), 0.02)
    ln1w = nrm(next(ks), (32, D), 0.05)
    ln1b = nrm(next(ks), (1, 32), 0.02)
    ln2w = nrm(next(ks), (16, 32), 0.05)
    ln2b = nrm(next(ks), (1, 16), 0.02)
    ow = nrm(next(ks), (NUM_CLASSES, 16), (2.0 / NUM_CLASSES) ** 0.5)  # nn.init.normal_
    ob = nrm(next(ks), (1, NUM_CLASSES), 0.02)
    return (c1w, c1b, c2w, c2b, c3w, c3b, qkv_w, qkv_b, op_w, op_b,
            n1g, n1b, n2g, n2b, ff1_w, ff1_b, ff2_w, ff2_b,
            ln1w, ln1b, ln2w, ln2b, ow, ob)


# ---- pure-JAX reference (independent formulation: per-batch, shift-matrix
#      conv, exact softmax division) -----------------------------------------
def _conv1d_same_ref(x, w, b):
    _, L = x.shape
    s = jax.lax.broadcasted_iota(jnp.int32, (L, L), 0)
    t = jax.lax.broadcasted_iota(jnp.int32, (L, L), 1)
    m_prev = (s == t - 1).astype(x.dtype)
    m_next = (s == t + 1).astype(x.dtype)
    x_prev = jnp.dot(x, m_prev, preferred_element_type=jnp.float32)
    x_next = jnp.dot(x, m_next, preferred_element_type=jnp.float32)
    y = (jnp.dot(w[0], x_prev, preferred_element_type=jnp.float32)
         + jnp.dot(w[1], x, preferred_element_type=jnp.float32)
         + jnp.dot(w[2], x_next, preferred_element_type=jnp.float32))
    return y + b


def _mha_ref(x, wqkv, bqkv, wo, bo):
    S, D = x.shape
    q = _linear(x, wqkv[0 * D:1 * D], bqkv[:, 0 * D:1 * D])
    k = _linear(x, wqkv[1 * D:2 * D], bqkv[:, 1 * D:2 * D])
    v = _linear(x, wqkv[2 * D:3 * D], bqkv[:, 2 * D:3 * D])
    scale = 1.0 / float(HEAD_DIM) ** 0.5
    heads = []
    for h in range(NUM_HEADS):
        sl = slice(h * HEAD_DIM, (h + 1) * HEAD_DIM)
        qh, kh, vh = q[:, sl], k[:, sl], v[:, sl]
        sc = jax.lax.dot_general(qh, kh, (((1,), (1,)), ((), ())),
                                 preferred_element_type=jnp.float32) * scale
        sc = sc - jnp.max(sc, axis=-1, keepdims=True)
        p = jnp.exp(sc)
        p = p / jnp.sum(p, axis=-1, keepdims=True)
        heads.append(jnp.dot(p, vh, preferred_element_type=jnp.float32))
    attn = jnp.concatenate(heads, axis=1)
    return _linear(attn, wo, bo)


def _encoder_layer_ref(x, wqkv, bqkv, wo, bo, g1, b1, g2, b2, w1, bb1, w2, bb2):
    h = _layernorm(x, g1, b1)
    x = x + _mha_ref(h, wqkv, bqkv, wo, bo)
    h = _layernorm(x, g2, b2)
    f = jnp.maximum(_linear(h, w1, bb1), 0.0)
    f = _linear(f, w2, bb2)
    return x + f


def _forward_one_ref(x, ws):
    (c1w, c1b, c2w, c2b, c3w, c3b, qkv_w, qkv_b, op_w, op_b,
     n1g, n1b, n2g, n2b, ff1_w, ff1_b, ff2_w, ff2_b,
     ln1w, ln1b, ln2w, ln2b, ow, ob) = ws
    x = _conv1d_same_ref(x, c1w, c1b)
    x = _conv1d_same_ref(x, c2w, c2b)
    x = _conv1d_same_ref(x, c3w, c3b)
    for l in range(NUM_LAYERS):
        x = _encoder_layer_ref(x, qkv_w[l], qkv_b[l], op_w[l], op_b[l],
                               n1g[l], n1b[l], n2g[l], n2b[l],
                               ff1_w[l], ff1_b[l], ff2_w[l], ff2_b[l])
    pooled = jnp.mean(x, axis=0, keepdims=True)
    h = jnp.maximum(_linear(pooled, ln1w, ln1b), 0.0)
    h = jnp.maximum(_linear(h, ln2w, ln2b), 0.0)
    return _linear(h, ow, ob)


@jax.jit
def reference_forward(acc_data, params):
    x = jnp.transpose(acc_data, (0, 2, 1)).astype(jnp.float32)
    rows = [_forward_one_ref(x[b], params) for b in range(x.shape[0])]
    return jnp.concatenate(rows, axis=0)


if __name__ == "__main__":
    key = jax.random.PRNGKey(0)
    kp, kx, ks = jax.random.split(key, 3)
    params = init_params(kp)
    packed = pack_params(params)      # one-time, wrapper-side packing into 2 slabs

    B = 2
    acc_data = jax.random.normal(kx, (B, ACC_FRAMES, ACC_COORDS), jnp.float32)
    # skl_data is accepted by the PyTorch forward but never used; built for parity.
    skl_data = jax.random.normal(ks, (B, 128, 32, 3), jnp.float32)

    fwd = jax.jit(trans_model_forward, static_argnames=("batch_tile",))
    out = jax.block_until_ready(fwd(acc_data, packed, batch_tile=1))

    ref = jax.block_until_ready(reference_forward(acc_data, params))
    assert out.shape == (B, NUM_CLASSES)
    assert bool(jnp.all(jnp.isfinite(out)))
    assert jnp.allclose(out, ref, rtol=1e-2, atol=1e-2), (out, ref)

    print("KERNEL_OK")
</pallas_src>

<mosaic_0001>
module attributes {stable_mosaic.version = 11 : i64} {
  func.func @kernel(%arg0: i32, %arg1: memref<4x128xf32, #tpu.memory_space<vmem>>, %arg2: memref<2384x128xf32, #tpu.memory_space<vmem>>, %arg3: memref<128x256xf32, #tpu.memory_space<vmem>>, %arg4: memref<1x1x2xf32, #tpu.memory_space<vmem>>) attributes {dimension_semantics = [#tpu.dimension_semantics<parallel>], iteration_bounds = array<i64: 2>, scalar_prefetch = 0 : i64, scratch_operands = 0 : i64, tpu.core_type = #tpu.core_type<tc>, window_params = [{transform_indices = @transform_0, window_bounds = array<i64: 4, 128>}, {pipeline_mode = #tpu.pipeline_mode<synchronous>, transform_indices = @transform_1, window_bounds = array<i64: 2384, 128>}, {pipeline_mode = #tpu.pipeline_mode<synchronous>, transform_indices = @transform_2, window_bounds = array<i64: 128, 256>}, {transform_indices = @transform_3, window_bounds = array<i64: 1, 1, 2>}]} {
    %0 = tpu.iota {dimensions = array<i32: 1>} : vector<1x128xi32>
    %c127_i32 = arith.constant 127 : i32
    %1 = vector.broadcast %c127_i32 : i32 to vector<1x128xi32>
    %2 = arith.andi %0, %1 : vector<1x128xi32>
    %c0_i32 = arith.constant 0 : i32
    %3 = vector.broadcast %c0_i32 : i32 to vector<1x128xi32>
    %4 = arith.cmpi ne, %2, %3 : vector<1x128xi32>
    %5 = arith.extui %4 : vector<1x128xi1> to vector<1x128xi32>
    %6 = arith.sitofp %5 : vector<1x128xi32> to vector<1x128xf32>
    %c127_i32_0 = arith.constant 127 : i32
    %7 = vector.broadcast %c127_i32_0 : i32 to vector<1x128xi32>
    %8 = arith.cmpi ne, %2, %7 : vector<1x128xi32>
    %9 = arith.extui %8 : vector<1x128xi1> to vector<1x128xi32>
    %10 = arith.sitofp %9 : vector<1x128xi32> to vector<1x128xf32>
    %cst = arith.constant 1.000000e+00 : f32
    %11 = vector.broadcast %cst : f32 to vector<1x128xf32>
    %c0 = arith.constant 0 : index
    %c0_1 = arith.constant 0 : index
    %12 = vector.load %arg1[%c0, %c0_1] : memref<4x128xf32, #tpu.memory_space<vmem>>, vector<4x128xf32>
    %c0_2 = arith.constant 0 : index
    %c0_3 = arith.constant 0 : index
    %13 = vector.load %arg3[%c0_2, %c0_3] : memref<128x256xf32, #tpu.memory_space<vmem>>, vector<32x13xf32>
    %c1_i32 = arith.constant 1 : i32
    %14 = tpu.dynamic_rotate %12 by %c1_i32 dim 1 : vector<4x128xf32>, i32 -> vector<4x128xf32>
    %15 = vector.broadcast %6 : vector<1x128xf32> to vector<4x128xf32>
    %16 = arith.mulf %14, %15 : vector<4x128xf32>
    %c127_i32_4 = arith.constant 127 : i32
    %17 = tpu.dynamic_rotate %12 by %c127_i32_4 dim 1 : vector<4x128xf32>, i32 -> vector<4x128xf32>
    %18 = vector.broadcast %10 : vector<1x128xf32> to vector<4x128xf32>
    %19 = arith.mulf %17, %18 : vector<4x128xf32>
    %20 = tpu.concatenate %16, %12, %19, %11 in 0 : vector<4x128xf32>, vector<4x128xf32>, vector<4x128xf32>, vector<1x128xf32> -> vector<13x128xf32>
    %cst_5 = arith.constant dense<0.000000e+00> : vector<32x128xf32>
    %21 = tpu.matmul %13, %20, %cst_5 {dimension_numbers = #tpu.dot_dimension_numbers<[1], [0], [0], [1], [0, 0, 1, 1], [], []>} : vector<32x13xf32>, vector<13x128xf32>, vector<32x128xf32> -> vector<32x128xf32>
    %c32 = arith.constant 32 : index
    %c0_6 = arith.constant 0 : index
    %22 = vector.load %arg3[%c32, %c0_6] : memref<128x256xf32, #tpu.memory_space<vmem>>, vector<64x97xf32>
    %c1_i32_7 = arith.constant 1 : i32
    %23 = tpu.dynamic_rotate %21 by %c1_i32_7 dim 1 : vector<32x128xf32>, i32 -> vector<32x128xf32>
    %24 = vector.broadcast %6 : vector<1x128xf32> to vector<32x128xf32>
    %25 = arith.mulf %23, %24 : vector<32x128xf32>
    %c127_i32_8 = arith.constant 127 : i32
    %26 = tpu.dynamic_rotate %21 by %c127_i32_8 dim 1 : vector<32x128xf32>, i32 -> vector<32x128xf32>
    %27 = vector.broadcast %10 : vector<1x128xf32> to vector<32x128xf32>
    %28 = arith.mulf %26, %27 : vector<32x128xf32>
    %29 = tpu.concatenate %25, %21, %28, %11 in 0 : vector<32x128xf32>, vector<32x128xf32>, vector<32x128xf32>, vector<1x128xf32> -> vector<97x128xf32>
    %cst_9 = arith.constant dense<0.000000e+00> : vector<64x128xf32>
    %30 = tpu.matmul %22, %29, %cst_9 {dimension_numbers = #tpu.dot_dimension_numbers<[1], [0], [0], [1], [0, 0, 1, 1], [], []>} : vector<64x97xf32>, vector<97x128xf32>, vector<64x128xf32> -> vector<64x128xf32>
    %c96 = arith.constant 96 : index
    %c0_10 = arith.constant 0 : index
    %31 = vector.load %arg3[%c96, %c0_10] : memref<128x256xf32, #tpu.memory_space<vmem>>, vector<32x193xf32>
    %c1_i32_11 = arith.constant 1 : i32
    %32 = tpu.dynamic_rotate %30 by %c1_i32_11 dim 1 : vector<64x128xf32>, i32 -> vector<64x128xf32>
    %33 = vector.broadcast %6 : vector<1x128xf32> to vector<64x128xf32>
    %34 = arith.mulf %32, %33 : vector<64x128xf32>
    %c127_i32_12 = arith.constant 127 : i32
    %35 = tpu.dynamic_rotate %30 by %c127_i32_12 dim 1 : vector<64x128xf32>, i32 -> vector<64x128xf32>
    %36 = vector.broadcast %10 : vector<1x128xf32> to vector<64x128xf32>
    %37 = arith.mulf %35, %36 : vector<64x128xf32>
    %38 = tpu.concatenate %34, %30, %37, %11 in 0 : vector<64x128xf32>, vector<64x128xf32>, vector<64x128xf32>, vector<1x128xf32> -> vector<193x128xf32>
    %cst_13 = arith.constant dense<0.000000e+00> : vector<32x128xf32>
    %39 = tpu.matmul %31, %38, %cst_13 {dimension_numbers = #tpu.dot_dimension_numbers<[1], [0], [0], [1], [0, 0, 1, 1], [], []>} : vector<32x193xf32>, vector<193x128xf32>, vector<32x128xf32> -> vector<32x128xf32>
    %c1040 = arith.constant 1040 : index
    %c0_14 = arith.constant 0 : index
    %40 = vector.load %arg2[%c1040, %c0_14] : memref<2384x128xf32, #tpu.memory_space<vmem>>, vector<1x128xf32>
    %c1048 = arith.constant 1048 : index
    %c0_15 = arith.constant 0 : index
    %41 = vector.load %arg2[%c1048, %c0_15] : memref<2384x128xf32, #tpu.memory_space<vmem>>, vector<1x128xf32>
    %cst_16 = arith.constant dense<0.000000e+00> : vector<32xf32>
    %42 = vector.multi_reduction <add>, %39, %cst_16 [1] : vector<32x128xf32> to vector<32xf32>
    %43 = vector.shape_cast %42 : vector<32xf32> to vector<32x1xf32>
    %cst_17 = arith.constant 1.280000e+02 : f32
    %44 = vector.broadcast %cst_17 : f32 to vector<32x1xf32>
    %45 = arith.divf %43, %44 : vector<32x1xf32>
    %46 = vector.broadcast %45 : vector<32x1xf32> to vector<32x128xf32>
    %47 = arith.subf %39, %46 : vector<32x128xf32>
    %48 = arith.mulf %47, %47 : vector<32x128xf32>
    %cst_18 = arith.constant dense<0.000000e+00> : vector<32xf32>
    %49 = vector.multi_reduction <add>, %48, %cst_18 [1] : vector<32x128xf32> to vector<32xf32>
    %50 = vector.shape_cast %49 : vector<32xf32> to vector<32x1xf32>
    %cst_19 = arith.constant 1.280000e+02 : f32
    %51 = vector.broadcast %cst_19 : f32 to vector<32x1xf32>
    %52 = arith.divf %50, %51 : vector<32x1xf32>
    %cst_20 = arith.constant 9.99999974E-6 : f32
    %53 = vector.broadcast %cst_20 : f32 to vector<32x1xf32>
    %54 = arith.addf %52, %53 : vector<32x1xf32>
    %55 = math.rsqrt %54 : vector<32x1xf32>
    %56 = vector.broadcast %55 : vector<32x1xf32> to vector<32x128xf32>
    %57 = arith.mulf %47, %56 : vector<32x128xf32>
    %58 = vector.broadcast %40 : vector<1x128xf32> to vector<32x128xf32>
    %59 = arith.mulf %57, %58 : vector<32x128xf32>
    %60 = vector.broadcast %41 : vector<1x128xf32> to vector<32x128xf32>
    %61 = arith.addf %59, %60 : vector<32x128xf32>
    %c0_21 = arith.constant 0 : index
    %c0_22 = arith.constant 0 : index
    %62 = vector.load %arg2[%c0_21, %c0_22] : memref<2384x128xf32, #tpu.memory_space<vmem>>, vector<768x128xf32>
    %cst_23 = arith.constant dense<0.000000e+00> : vector<32x768xf32>
    %63 = tpu.matmul %61, %62, %cst_23 {dimension_numbers = #tpu.dot_dimension_numbers<[1], [1], [0], [0], [0, 0, 1, 0], [], []>} : vector<32x128xf32>, vector<768x128xf32>, vector<32x768xf32> -> vector<32x768xf32>
    %64 = vector.extract_strided_slice %63 {offsets = [0, 0], sizes = [32, 128], strides = [1, 1]} : vector<32x768xf32> to vector<32x128xf32>
    %c768 = arith.constant 768 : index
    %c0_24 = arith.constant 0 : index
    %65 = vector.load %arg2[%c768, %c0_24] : memref<2384x128xf32, #tpu.memory_space<vmem>>, vector<1x128xf32>
    %66 = vector.broadcast %65 : vector<1x128xf32> to vector<32x128xf32>
    %67 = arith.addf %64, %66 : vector<32x128xf32>
    %68 = vector.extract_strided_slice %63 {offsets = [0, 256], sizes = [32, 128], strides = [1, 1]} : vector<32x768xf32> to vector<32x128xf32>
    %c770 = arith.constant 770 : index
    %c0_25 = arith.constant 0 : index
    %69 = vector.load %arg2[%c770, %c0_25] : memref<2384x128xf32, #tpu.memory_space<vmem>>, vector<1x128xf32>
    %70 = vector.broadcast %69 : vector<1x128xf32> to vector<32x128xf32>
    %71 = arith.addf %68, %70 : vector<32x128xf32>
    %72 = vector.extract_strided_slice %63 {offsets = [0, 512], sizes = [32, 128], strides = [1, 1]} : vector<32x768xf32> to vector<32x128xf32>
    %c772 = arith.constant 772 : index
    %c0_26 = arith.constant 0 : index
    %73 = vector.load %arg2[%c772, %c0_26] : memref<2384x128xf32, #tpu.memory_space<vmem>>, vector<1x128xf32>
    %74 = vector.broadcast %73 : vector<1x128xf32> to vector<32x128xf32>
    %75 = arith.addf %72, %74 : vector<32x128xf32>
    %cst_27 = arith.constant dense<0.000000e+00> : vector<32x32xf32>
    %76 = tpu.matmul %67, %71, %cst_27 {dimension_numbers = #tpu.dot_dimension_numbers<[1], [1], [0], [0], [0, 0, 1, 0], [], []>} : vector<32x128xf32>, vector<32x128xf32>, vector<32x32xf32> -> vector<32x32xf32>
    %cst_28 = arith.constant 1.250000e-01 : f32
    %77 = vector.broadcast %cst_28 : f32 to vector<32x32xf32>
    %78 = arith.mulf %76, %77 : vector<32x32xf32>
    %cst_29 = arith.constant dense<0xFF800000> : vector<32xf32>
    %79 = vector.multi_reduction <maximumf>, %78, %cst_29 [1] : vector<32x32xf32> to vector<32xf32>
    %80 = vector.shape_cast %79 : vector<32xf32> to vector<32x1xf32>
    %81 = vector.broadcast %80 : vector<32x1xf32> to vector<32x32xf32>
    %82 = arith.subf %78, %81 : vector<32x32xf32>
    %83 = math.exp %82 : vector<32x32xf32>
    %cst_30 = arith.constant dense<0.000000e+00> : vector<32xf32>
    %84 = vector.multi_reduction <add>, %83, %cst_30 [1] : vector<32x32xf32> to vector<32xf32>
    %85 = vector.shape_cast %84 : vector<32xf32> to vector<32x1xf32>
    %86 = tpu.reciprocal %85 {approx = true} : vector<32x1xf32> -> vector<32x1xf32>
    %87 = vector.broadcast %86 : vector<32x1xf32> to vector<32x32xf32>
    %88 = arith.mulf %83, %87 : vector<32x32xf32>
    %cst_31 = arith.constant dense<0.000000e+00> : vector<32x128xf32>
    %89 = tpu.matmul %88, %75, %cst_31 {dimension_numbers = #tpu.dot_dimension_numbers<[1], [0], [0], [1], [0, 0, 1, 1], [], []>} : vector<32x32xf32>, vector<32x128xf32>, vector<32x128xf32> -> vector<32x128xf32>
    %90 = vector.extract_strided_slice %63 {offsets = [0, 128], sizes = [32, 128], strides = [1, 1]} : vector<32x768xf32> to vector<32x128xf32>
    %c769 = arith.constant 769 : index
    %c0_32 = arith.constant 0 : index
    %91 = vector.load %arg2[%c769, %c0_32] : memref<2384x128xf32, #tpu.memory_space<vmem>>, vector<1x128xf32>
    %92 = vector.broadcast %91 : vector<1x128xf32> to vector<32x128xf32>
    %93 = arith.addf %90, %92 : vector<32x128xf32>
    %94 = vector.extract_strided_slice %63 {offsets = [0, 384], sizes = [32, 128], strides = [1, 1]} : vector<32x768xf32> to vector<32x128xf32>
    %c771 = arith.constant 771 : index
    %c0_33 = arith.constant 0 : index
    %95 = vector.load %arg2[%c771, %c0_33] : memref<2384x128xf32, #tpu.memory_space<vmem>>, vector<1x128xf32>
    %96 = vector.broadcast %95 : vector<1x128xf32> to vector<32x128xf32>
    %97 = arith.addf %94, %96 : vector<32x128xf32>
    %98 = vector.extract_strided_slice %63 {offsets = [0, 640], sizes = [32, 128], strides = [1, 1]} : vector<32x768xf32> to vector<32x128xf32>
    %c773 = arith.constant 773 : index
    %c0_34 = arith.constant 0 : index
    %99 = vector.load %arg2[%c773, %c0_34] : memref<2384x128xf32, #tpu.memory_space<vmem>>, vector<1x128xf32>
    %100 = vector.broadcast %99 : vector<1x128xf32> to vector<32x128xf32>
    %101 = arith.addf %98, %100 : vector<32x128xf32>
    %cst_35 = arith.constant dense<0.000000e+00> : vector<32x32xf32>
    %102 = tpu.matmul %93, %97, %cst_35 {dimension_numbers = #tpu.dot_dimension_numbers<[1], [1], [0], [0], [0, 0, 1, 0], [], []>} : vector<32x128xf32>, vector<32x128xf32>, vector<32x32xf32> -> vector<32x32xf32>
    %cst_36 = arith.constant 1.250000e-01 : f32
    %103 = vector.broadcast %cst_36 : f32 to vector<32x32xf32>
    %104 = arith.mulf %102, %103 : vector<32x32xf32>
    %cst_37 = arith.constant dense<0xFF800000> : vector<32xf32>
    %105 = vector.multi_reduction <maximumf>, %104, %cst_37 [1] : vector<32x32xf32> to vector<32xf32>
    %106 = vector.shape_cast %105 : vector<32xf32> to vector<32x1xf32>
    %107 = vector.broadcast %106 : vector<32x1xf32> to vector<32x32xf32>
    %108 = arith.subf %104, %107 : vector<32x32xf32>
    %109 = math.exp %108 : vector<32x32xf32>
    %cst_38 = arith.constant dense<0.000000e+00> : vector<32xf32>
    %110 = vector.multi_reduction <add>, %109, %cst_38 [1] : vector<32x32xf32> to vector<32xf32>
    %111 = vector.shape_cast %110 : vector<32xf32> to vector<32x1xf32>
    %112 = tpu.reciprocal %111 {approx = true} : vector<32x1xf32> -> vector<32x1xf32>
    %113 = vector.broadcast %112 : vector<32x1xf32> to vector<32x32xf32>
    %114 = arith.mulf %109, %113 : vector<32x32xf32>
    %cst_39 = arith.constant dense<0.000000e+00> : vector<32x128xf32>
    %115 = tpu.matmul %114, %101, %cst_39 {dimension_numbers = #tpu.dot_dimension_numbers<[1], [0], [0], [1], [0, 0, 1, 1], [], []>} : vector<32x32xf32>, vector<32x128xf32>, vector<32x128xf32> -> vector<32x128xf32>
    %116 = tpu.concatenate %89, %115 in 1 : vector<32x128xf32>, vector<32x128xf32> -> vector<32x256xf32>
    %c776 = arith.constant 776 : index
    %c0_40 = arith.constant 0 : index
    %117 = vector.load %arg2[%c776, %c0_40] : memref<2384x128xf32, #tpu.memory_space<vmem>>, vector<256x128xf32>
    %cst_41 = arith.constant dense<0.000000e+00> : vector<32x128xf32>
    %118 = tpu.matmul %116, %117, %cst_41 {dimension_numbers = #tpu.dot_dimension_numbers<[1], [0], [0], [1], [0, 0, 1, 1], [], []>} : vector<32x256xf32>, vector<256x128xf32>, vector<32x128xf32> -> vector<32x128xf32>
    %119 = arith.addf %39, %118 : vector<32x128xf32>
    %c1032 = arith.constant 1032 : index
    %c0_42 = arith.constant 0 : index
    %120 = vector.load %arg2[%c1032, %c0_42] : memref<2384x128xf32, #tpu.memory_space<vmem>>, vector<1x128xf32>
    %121 = vector.broadcast %120 : vector<1x128xf32> to vector<32x128xf32>
    %122 = arith.addf %119, %121 : vector<32x128xf32>
    %c1056 = arith.constant 1056 : index
    %c0_43 = arith.constant 0 : index
    %123 = vector.load %arg2[%c1056, %c0_43] : memref<2384x128xf32, #tpu.memory_space<vmem>>, vector<1x128xf32>
    %c1064 = arith.constant 1064 : index
    %c0_44 = arith.constant 0 : index
    %124 = vector.load %arg2[%c1064, %c0_44] : memref<2384x128xf32, #tpu.memory_space<vmem>>, vector<1x128xf32>
    %cst_45 = arith.constant dense<0.000000e+00> : vector<32xf32>
    %125 = vector.multi_reduction <add>, %122, %cst_45 [1] : vector<32x128xf32> to vector<32xf32>
    %126 = vector.shape_cast %125 : vector<32xf32> to vector<32x1xf32>
    %cst_46 = arith.constant 1.280000e+02 : f32
    %127 = vector.broadcast %cst_46 : f32 to vector<32x1xf32>
    %128 = arith.divf %126, %127 : vector<32x1xf32>
    %129 = vector.broadcast %128 : vector<32x1xf32> to vector<32x128xf32>
    %130 = arith.subf %122, %129 : vector<32x128xf32>
    %131 = arith.mulf %130, %130 : vector<32x128xf32>
    %cst_47 = arith.constant dense<0.000000e+00> : vector<32xf32>
    %132 = vector.multi_reduction <add>, %131, %cst_47 [1] : vector<32x128xf32> to vector<32xf32>
    %133 = vector.shape_cast %132 : vector<32xf32> to vector<32x1xf32>
    %cst_48 = arith.constant 1.280000e+02 : f32
    %134 = vector.broadcast %cst_48 : f32 to vector<32x1xf32>
    %135 = arith.divf %133, %134 : vector<32x1xf32>
    %cst_49 = arith.constant 9.99999974E-6 : f32
    %136 = vector.broadcast %cst_49 : f32 to vector<32x1xf32>
    %137 = arith.addf %135, %136 : vector<32x1xf32>
    %138 = math.rsqrt %137 : vector<32x1xf32>
    %139 = vector.broadcast %138 : vector<32x1xf32> to vector<32x128xf32>
    %140 = arith.mulf %130, %139 : vector<32x128xf32>
    %141 = vector.broadcast %123 : vector<1x128xf32> to vector<32x128xf32>
    %142 = arith.mulf %140, %141 : vector<32x128xf32>
    %143 = vector.broadcast %124 : vector<1x128xf32> to vector<32x128xf32>
    %144 = arith.addf %142, %143 : vector<32x128xf32>
    %c1072 = arith.constant 1072 : index
    %c0_50 = arith.constant 0 : index
    %145 = vector.load %arg2[%c1072, %c0_50] : memref<2384x128xf32, #tpu.memory_space<vmem>>, vector<32x128xf32>
    %cst_51 = arith.constant dense<0.000000e+00> : vector<32x32xf32>
    %146 = tpu.matmul %144, %145, %cst_51 {dimension_numbers = #tpu.dot_dimension_numbers<[1], [1], [0], [0], [0, 0, 1, 0], [], []>} : vector<32x128xf32>, vector<32x128xf32>, vector<32x32xf32> -> vector<32x32xf32>
    %c1104 = arith.constant 1104 : index
    %c0_52 = arith.constant 0 : index
    %147 = vector.load %arg2[%c1104, %c0_52] : memref<2384x128xf32, #tpu.memory_space<vmem>>, vector<1x32xf32>
    %148 = vector.broadcast %147 : vector<1x32xf32> to vector<32x32xf32>
    %149 = arith.addf %146, %148 : vector<32x32xf32>
    %cst_53 = arith.constant 0.000000e+00 : f32
    %150 = vector.broadcast %cst_53 : f32 to vector<32x32xf32>
    %151 = arith.maximumf %149, %150 : vector<32x32xf32>
    %c1112 = arith.constant 1112 : index
    %c0_54 = arith.constant 0 : index
    %152 = vector.load %arg2[%c1112, %c0_54] : memref<2384x128xf32, #tpu.memory_space<vmem>>, vector<32x128xf32>
    %cst_55 = arith.constant dense<0.000000e+00> : vector<32x128xf32>
    %153 = tpu.matmul %151, %152, %cst_55 {dimension_numbers = #tpu.dot_dimension_numbers<[1], [0], [0], [1], [0, 0, 1, 1], [], []>} : vector<32x32xf32>, vector<32x128xf32>, vector<32x128xf32> -> vector<32x128xf32>
    %154 = arith.addf %122, %153 : vector<32x128xf32>
    %c1144 = arith.constant 1144 : index
    %c0_56 = arith.constant 0 : index
    %155 = vector.load %arg2[%c1144, %c0_56] : memref<2384x128xf32, #tpu.memory_space<vmem>>, vector<1x128xf32>
    %156 = vector.broadcast %155 : vector<1x128xf32> to vector<32x128xf32>
    %157 = arith.addf %154, %156 : vector<32x128xf32>
    %c2192 = arith.constant 2192 : index
    %c0_57 = arith.constant 0 : index
    %158 = vector.load %arg2[%c2192, %c0_57] : memref<2384x128xf32, #tpu.memory_space<vmem>>, vector<1x128xf32>
    %c2200 = arith.constant 2200 : index
    %c0_58 = arith.constant 0 : index
    %159 = vector.load %arg2[%c2200, %c0_58] : memref<2384x128xf32, #tpu.memory_space<vmem>>, vector<1x128xf32>
    %cst_59 = arith.constant dense<0.000000e+00> : vector<32xf32>
    %160 = vector.multi_reduction <add>, %157, %cst_59 [1] : vector<32x128xf32> to vector<32xf32>
    %161 = vector.shape_cast %160 : vector<32xf32> to vector<32x1xf32>
    %cst_60 = arith.constant 1.280000e+02 : f32
    %162 = vector.broadcast %cst_60 : f32 to vector<32x1xf32>
    %163 = arith.divf %161, %162 : vector<32x1xf32>
    %164 = vector.broadcast %163 : vector<32x1xf32> to vector<32x128xf32>
    %165 = arith.subf %157, %164 : vector<32x128xf32>
    %166 = arith.mulf %165, %165 : vector<32x128xf32>
    %cst_61 = arith.constant dense<0.000000e+00> : vector<32xf32>
    %167 = vector.multi_reduction <add>, %166, %cst_61 [1] : vector<32x128xf32> to vector<32xf32>
    %168 = vector.shape_cast %167 : vector<32xf32> to vector<32x1xf32>
    %cst_62 = arith.constant 1.280000e+02 : f32
    %169 = vector.broadcast %cst_62 : f32 to vector<32x1xf32>
    %170 = arith.divf %168, %169 : vector<32x1xf32>
    %cst_63 = arith.constant 9.99999974E-6 : f32
    %171 = vector.broadcast %cst_63 : f32 to vector<32x1xf32>
    %172 = arith.addf %170, %171 : vector<32x1xf32>
    %173 = math.rsqrt %172 : vector<32x1xf32>
    %174 = vector.broadcast %173 : vector<32x1xf32> to vector<32x128xf32>
    %175 = arith.mulf %165, %174 : vector<32x128xf32>
    %176 = vector.broadcast %158 : vector<1x128xf32> to vector<32x128xf32>
    %177 = arith.mulf %175, %176 : vector<32x128xf32>
    %178 = vector.broadcast %159 : vector<1x128xf32> to vector<32x128xf32>
    %179 = arith.addf %177, %178 : vector<32x128xf32>
    %c1152 = arith.constant 1152 : index
    %c0_64 = arith.constant 0 : index
    %180 = vector.load %arg2[%c1152, %c0_64] : memref<2384x128xf32, #tpu.memory_space<vmem>>, vector<768x128xf32>
    %cst_65 = arith.constant dense<0.000000e+00> : vector<32x768xf32>
    %181 = tpu.matmul %179, %180, %cst_65 {dimension_numbers = #tpu.dot_dimension_numbers<[1], [1], [0], [0], [0, 0, 1, 0], [], []>} : vector<32x128xf32>, vector<768x128xf32>, vector<32x768xf32> -> vector<32x768xf32>
    %182 = vector.extract_strided_slice %181 {offsets = [0, 0], sizes = [32, 128], strides = [1, 1]} : vector<32x768xf32> to vector<32x128xf32>
    %c1920 = arith.constant 1920 : index
    %c0_66 = arith.constant 0 : index
    %183 = vector.load %arg2[%c1920, %c0_66] : memref<2384x128xf32, #tpu.memory_space<vmem>>, vector<1x128xf32>
    %184 = vector.broadcast %183 : vector<1x128xf32> to vector<32x128xf32>
    %185 = arith.addf %182, %184 : vector<32x128xf32>
    %186 = vector.extract_strided_slice %181 {offsets = [0, 256], sizes = [32, 128], strides = [1, 1]} : vector<32x768xf32> to vector<32x128xf32>
    %c1922 = arith.constant 1922 : index
    %c0_67 = arith.constant 0 : index
    %187 = vector.load %arg2[%c1922, %c0_67] : memref<2384x128xf32, #tpu.memory_space<vmem>>, vector<1x128xf32>
    %188 = vector.broadcast %187 : vector<1x128xf32> to vector<32x128xf32>
    %189 = arith.addf %186, %188 : vector<32x128xf32>
    %190 = vector.extract_strided_slice %181 {offsets = [0, 512], sizes = [32, 128], strides = [1, 1]} : vector<32x768xf32> to vector<32x128xf32>
    %c1924 = arith.constant 1924 : index
    %c0_68 = arith.constant 0 : index
    %191 = vector.load %arg2[%c1924, %c0_68] : memref<2384x128xf32, #tpu.memory_space<vmem>>, vector<1x128xf32>
    %192 = vector.broadcast %191 : vector<1x128xf32> to vector<32x128xf32>
    %193 = arith.addf %190, %192 : vector<32x128xf32>
    %cst_69 = arith.constant dense<0.000000e+00> : vector<32x32xf32>
    %194 = tpu.matmul %185, %189, %cst_69 {dimension_numbers = #tpu.dot_dimension_numbers<[1], [1], [0], [0], [0, 0, 1, 0], [], []>} : vector<32x128xf32>, vector<32x128xf32>, vector<32x32xf32> -> vector<32x32xf32>
    %cst_70 = arith.constant 1.250000e-01 : f32
    %195 = vector.broadcast %cst_70 : f32 to vector<32x32xf32>
    %196 = arith.mulf %194, %195 : vector<32x32xf32>
    %cst_71 = arith.constant dense<0xFF800000> : vector<32xf32>
    %197 = vector.multi_reduction <maximumf>, %196, %cst_71 [1] : vector<32x32xf32> to vector<32xf32>
    %198 = vector.shape_cast %197 : vector<32xf32> to vector<32x1xf32>
    %199 = vector.broadcast %198 : vector<32x1xf32> to vector<32x32xf32>
    %200 = arith.subf %196, %199 : vector<32x32xf32>
    %201 = math.exp %200 : vector<32x32xf32>
    %cst_72 = arith.constant dense<0.000000e+00> : vector<32xf32>
    %202 = vector.multi_reduction <add>, %201, %cst_72 [1] : vector<32x32xf32> to vector<32xf32>
    %203 = vector.shape_cast %202 : vector<32xf32> to vector<32x1xf32>
    %204 = tpu.reciprocal %203 {approx = true} : vector<32x1xf32> -> vector<32x1xf32>
    %205 = vector.broadcast %204 : vector<32x1xf32> to vector<32x32xf32>
    %206 = arith.mulf %201, %205 : vector<32x32xf32>
    %cst_73 = arith.constant dense<0.000000e+00> : vector<32x128xf32>
    %207 = tpu.matmul %206, %193, %cst_73 {dimension_numbers = #tpu.dot_dimension_numbers<[1], [0], [0], [1], [0, 0, 1, 1], [], []>} : vector<32x32xf32>, vector<32x128xf32>, vector<32x128xf32> -> vector<32x128xf32>
    %208 = vector.extract_strided_slice %181 {offsets = [0, 128], sizes = [32, 128], strides = [1, 1]} : vector<32x768xf32> to vector<32x128xf32>
    %c1921 = arith.constant 1921 : index
    %c0_74 = arith.constant 0 : index
    %209 = vector.load %arg2[%c1921, %c0_74] : memref<2384x128xf32, #tpu.memory_space<vmem>>, vector<1x128xf32>
    %210 = vector.broadcast %209 : vector<1x128xf32> to vector<32x128xf32>
    %211 = arith.addf %208, %210 : vector<32x128xf32>
    %212 = vector.extract_strided_slice %181 {offsets = [0, 384], sizes = [32, 128], strides = [1, 1]} : vector<32x768xf32> to vector<32x128xf32>
    %c1923 = arith.constant 1923 : index
    %c0_75 = arith.constant 0 : index
    %213 = vector.load %arg2[%c1923, %c0_75] : memref<2384x128xf32, #tpu.memory_space<vmem>>, vector<1x128xf32>
    %214 = vector.broadcast %213 : vector<1x128xf32> to vector<32x128xf32>
    %215 = arith.addf %212, %214 : vector<32x128xf32>
    %216 = vector.extract_strided_slice %181 {offsets = [0, 640], sizes = [32, 128], strides = [1, 1]} : vector<32x768xf32> to vector<32x128xf32>
    %c1925 = arith.constant 1925 : index
    %c0_76 = arith.constant 0 : index
    %217 = vector.load %arg2[%c1925, %c0_76] : memref<2384x128xf32, #tpu.memory_space<vmem>>, vector<1x128xf32>
    %218 = vector.broadcast %217 : vector<1x128xf32> to vector<32x128xf32>
    %219 = arith.addf %216, %218 : vector<32x128xf32>
    %cst_77 = arith.constant dense<0.000000e+00> : vector<32x32xf32>
    %220 = tpu.matmul %211, %215, %cst_77 {dimension_numbers = #tpu.dot_dimension_numbers<[1], [1], [0], [0], [0, 0, 1, 0], [], []>} : vector<32x128xf32>, vector<32x128xf32>, vector<32x32xf32> -> vector<32x32xf32>
    %cst_78 = arith.constant 1.250000e-01 : f32
    %221 = vector.broadcast %cst_78 : f32 to vector<32x32xf32>
    %222 = arith.mulf %220, %221 : vector<32x32xf32>
    %cst_79 = arith.constant dense<0xFF800000> : vector<32xf32>
    %223 = vector.multi_reduction <maximumf>, %222, %cst_79 [1] : vector<32x32xf32> to vector<32xf32>
    %224 = vector.shape_cast %223 : vector<32xf32> to vector<32x1xf32>
    %225 = vector.broadcast %224 : vector<32x1xf32> to vector<32x32xf32>
    %226 = arith.subf %222, %225 : vector<32x32xf32>
    %227 = math.exp %226 : vector<32x32xf32>
    %cst_80 = arith.constant dense<0.000000e+00> : vector<32xf32>
    %228 = vector.multi_reduction <add>, %227, %cst_80 [1] : vector<32x32xf32> to vector<32xf32>
    %229 = vector.shape_cast %228 : vector<32xf32> to vector<32x1xf32>
    %230 = tpu.reciprocal %229 {approx = true} : vector<32x1xf32> -> vector<32x1xf32>
    %231 = vector.broadcast %230 : vector<32x1xf32> to vector<32x32xf32>
    %232 = arith.mulf %227, %231 : vector<32x32xf32>
    %cst_81 = arith.constant dense<0.000000e+00> : vector<32x128xf32>
    %233 = tpu.matmul %232, %219, %cst_81 {dimension_numbers = #tpu.dot_dimension_numbers<[1], [0], [0], [1], [0, 0, 1, 1], [], []>} : vector<32x32xf32>, vector<32x128xf32>, vector<32x128xf32> -> vector<32x128xf32>
    %234 = tpu.concatenate %207, %233 in 1 : vector<32x128xf32>, vector<32x128xf32> -> vector<32x256xf32>
    %c1928 = arith.constant 1928 : index
    %c0_82 = arith.constant 0 : index
    %235 = vector.load %arg2[%c1928, %c0_82] : memref<2384x128xf32, #tpu.memory_space<vmem>>, vector<256x128xf32>
    %cst_83 = arith.constant dense<0.000000e+00> : vector<32x128xf32>
    %236 = tpu.matmul %234, %235, %cst_83 {dimension_numbers = #tpu.dot_dimension_numbers<[1], [0], [0], [1], [0, 0, 1, 1], [], []>} : vector<32x256xf32>, vector<256x128xf32>, vector<32x128xf32> -> vector<32x128xf32>
    %237 = arith.addf %157, %236 : vector<32x128xf32>
    %c2184 = arith.constant 2184 : index
    %c0_84 = arith.constant 0 : index
    %238 = vector.load %arg2[%c2184, %c0_84] : memref<2384x128xf32, #tpu.memory_space<vmem>>, vector<1x128xf32>
    %239 = vector.broadcast %238 : vector<1x128xf32> to vector<32x128xf32>
    %240 = arith.addf %237, %239 : vector<32x128xf32>
    %c2208 = arith.constant 2208 : index
    %c0_85 = arith.constant 0 : index
    %241 = vector.load %arg2[%c2208, %c0_85] : memref<2384x128xf32, #tpu.memory_space<vmem>>, vector<1x128xf32>
    %c2216 = arith.constant 2216 : index
    %c0_86 = arith.constant 0 : index
    %242 = vector.load %arg2[%c2216, %c0_86] : memref<2384x128xf32, #tpu.memory_space<vmem>>, vector<1x128xf32>
    %cst_87 = arith.constant dense<0.000000e+00> : vector<32xf32>
    %243 = vector.multi_reduction <add>, %240, %cst_87 [1] : vector<32x128xf32> to vector<32xf32>
    %244 = vector.shape_cast %243 : vector<32xf32> to vector<32x1xf32>
    %cst_88 = arith.constant 1.280000e+02 : f32
    %245 = vector.broadcast %cst_88 : f32 to vector<32x1xf32>
    %246 = arith.divf %244, %245 : vector<32x1xf32>
    %247 = vector.broadcast %246 : vector<32x1xf32> to vector<32x128xf32>
    %248 = arith.subf %240, %247 : vector<32x128xf32>
    %249 = arith.mulf %248, %248 : vector<32x128xf32>
    %cst_89 = arith.constant dense<0.000000e+00> : vector<32xf32>
    %250 = vector.multi_reduction <add>, %249, %cst_89 [1] : vector<32x128xf32> to vector<32xf32>
    %251 = vector.shape_cast %250 : vector<32xf32> to vector<32x1xf32>
    %cst_90 = arith.constant 1.280000e+02 : f32
    %252 = vector.broadcast %cst_90 : f32 to vector<32x1xf32>
    %253 = arith.divf %251, %252 : vector<32x1xf32>
    %cst_91 = arith.constant 9.99999974E-6 : f32
    %254 = vector.broadcast %cst_91 : f32 to vector<32x1xf32>
    %255 = arith.addf %253, %254 : vector<32x1xf32>
    %256 = math.rsqrt %255 : vector<32x1xf32>
    %257 = vector.broadcast %256 : vector<32x1xf32> to vector<32x128xf32>
    %258 = arith.mulf %248, %257 : vector<32x128xf32>
    %259 = vector.broadcast %241 : vector<1x128xf32> to vector<32x128xf32>
    %260 = arith.mulf %258, %259 : vector<32x128xf32>
    %261 = vector.broadcast %242 : vector<1x128xf32> to vector<32x128xf32>
    %262 = arith.addf %260, %261 : vector<32x128xf32>
    %c2224 = arith.constant 2224 : index
    %c0_92 = arith.constant 0 : index
    %263 = vector.load %arg2[%c2224, %c0_92] : memref<2384x128xf32, #tpu.memory_space<vmem>>, vector<32x128xf32>
    %cst_93 = arith.constant dense<0.000000e+00> : vector<32x32xf32>
    %264 = tpu.matmul %262, %263, %cst_93 {dimension_numbers = #tpu.dot_dimension_numbers<[1], [1], [0], [0], [0, 0, 1, 0], [], []>} : vector<32x128xf32>, vector<32x128xf32>, vector<32x32xf32> -> vector<32x32xf32>
    %c2256 = arith.constant 2256 : index
    %c0_94 = arith.constant 0 : index
    %265 = vector.load %arg2[%c2256, %c0_94] : memref<2384x128xf32, #tpu.memory_space<vmem>>, vector<1x32xf32>
    %266 = vector.broadcast %265 : vector<1x32xf32> to vector<32x32xf32>
    %267 = arith.addf %264, %266 : vector<32x32xf32>
    %cst_95 = arith.constant 0.000000e+00 : f32
    %268 = vector.broadcast %cst_95 : f32 to vector<32x32xf32>
    %269 = arith.maximumf %267, %268 : vector<32x32xf32>
    %c2264 = arith.constant 2264 : index
    %c0_96 = arith.constant 0 : index
    %270 = vector.load %arg2[%c2264, %c0_96] : memref<2384x128xf32, #tpu.memory_space<vmem>>, vector<32x128xf32>
    %cst_97 = arith.constant dense<0.000000e+00> : vector<32x128xf32>
    %271 = tpu.matmul %269, %270, %cst_97 {dimension_numbers = #tpu.dot_dimension_numbers<[1], [0], [0], [1], [0, 0, 1, 1], [], []>} : vector<32x32xf32>, vector<32x128xf32>, vector<32x128xf32> -> vector<32x128xf32>
    %272 = arith.addf %240, %271 : vector<32x128xf32>
    %c2296 = arith.constant 2296 : index
    %c0_98 = arith.constant 0 : index
    %273 = vector.load %arg2[%c2296, %c0_98] : memref<2384x128xf32, #tpu.memory_space<vmem>>, vector<1x128xf32>
    %274 = vector.broadcast %273 : vector<1x128xf32> to vector<32x128xf32>
    %275 = arith.addf %272, %274 : vector<32x128xf32>
    %cst_99 = arith.constant dense<0.000000e+00> : vector<128xf32>
    %276 = vector.multi_reduction <add>, %275, %cst_99 [0] : vector<32x128xf32> to vector<128xf32>
    %277 = vector.shape_cast %276 : vector<128xf32> to vector<1x128xf32>
    %cst_100 = arith.constant 3.200000e+01 : f32
    %278 = vector.broadcast %cst_100 : f32 to vector<1x128xf32>
    %279 = arith.divf %277, %278 : vector<1x128xf32>
    %c2304 = arith.constant 2304 : index
    %c0_101 = arith.constant 0 : index
    %280 = vector.load %arg2[%c2304, %c0_101] : memref<2384x128xf32, #tpu.memory_space<vmem>>, vector<32x128xf32>
    %c2336 = arith.constant 2336 : index
    %c0_102 = arith.constant 0 : index
    %281 = vector.load %arg2[%c2336, %c0_102] : memref<2384x128xf32, #tpu.memory_space<vmem>>, vector<1x32xf32>
    %cst_103 = arith.constant dense<0.000000e+00> : vector<1x32xf32>
    %282 = tpu.matmul %279, %280, %cst_103 {dimension_numbers = #tpu.dot_dimension_numbers<[1], [1], [0], [0], [0, 0, 1, 0], [], []>} : vector<1x128xf32>, vector<32x128xf32>, vector<1x32xf32> -> vector<1x32xf32>
    %283 = arith.addf %282, %281 : vector<1x32xf32>
    %cst_104 = arith.constant 0.000000e+00 : f32
    %284 = vector.broadcast %cst_104 : f32 to vector<1x32xf32>
    %285 = arith.maximumf %283, %284 : vector<1x32xf32>
    %c2344 = arith.constant 2344 : index
    %c0_105 = arith.constant 0 : index
    %286 = vector.load %arg2[%c2344, %c0_105] : memref<2384x128xf32, #tpu.memory_space<vmem>>, vector<16x32xf32>
    %c2360 = arith.constant 2360 : index
    %c0_106 = arith.constant 0 : index
    %287 = vector.load %arg2[%c2360, %c0_106] : memref<2384x128xf32, #tpu.memory_space<vmem>>, vector<1x16xf32>
    %cst_107 = arith.constant dense<0.000000e+00> : vector<1x16xf32>
    %288 = tpu.matmul %285, %286, %cst_107 {dimension_numbers = #tpu.dot_dimension_numbers<[1], [1], [0], [0], [0, 0, 1, 0], [], []>} : vector<1x32xf32>, vector<16x32xf32>, vector<1x16xf32> -> vector<1x16xf32>
    %289 = arith.addf %288, %287 : vector<1x16xf32>
    %cst_108 = arith.constant 0.000000e+00 : f32
    %290 = vector.broadcast %cst_108 : f32 to vector<1x16xf32>
    %291 = arith.maximumf %289, %290 : vector<1x16xf32>
    %c2368 = arith.constant 2368 : index
    %c0_109 = arith.constant 0 : index
    %292 = vector.load %arg2[%c2368, %c0_109] : memref<2384x128xf32, #tpu.memory_space<vmem>>, vector<2x16xf32>
    %c2376 = arith.constant 2376 : index
    %c0_110 = arith.constant 0 : index
    %293 = vector.load %arg2[%c2376, %c0_110] : memref<2384x128xf32, #tpu.memory_space<vmem>>, vector<1x2xf32>
    %cst_111 = arith.constant dense<0.000000e+00> : vector<1x2xf32>
    %294 = tpu.matmul %291, %292, %cst_111 {dimension_numbers = #tpu.dot_dimension_numbers<[1], [1], [0], [0], [0, 0, 1, 0], [], []>} : vector<1x16xf32>, vector<2x16xf32>, vector<1x2xf32> -> vector<1x2xf32>
    %295 = arith.addf %294, %293 : vector<1x2xf32>
    %c0_112 = arith.constant 0 : index
    %c0_113 = arith.constant 0 : index
    %c0_114 = arith.constant 0 : index
    %296 = vector.load %arg4[%c0_112, %c0_113, %c0_114] : memref<1x1x2xf32, #tpu.memory_space<vmem>>, vector<1x1x2xf32>
    %297 = vector.shape_cast %296 : vector<1x1x2xf32> to vector<1x2xf32>
    %298 = vector.shape_cast %295 : vector<1x2xf32> to vector<1x1x2xf32>
    tpu.vector_store %arg4[%c0_112, %c0_113, %c0_114], %298 {strides = array<i32>} : memref<1x1x2xf32, #tpu.memory_space<vmem>>, vector<1x1x2xf32>,
    return
  }
  func.func @transform_0(%arg0: i32) -> (i32, i32) {
    %c0_i32 = arith.constant 0 : i32
    %c0_i32_0 = arith.constant 0 : i32
    return %c0_i32, %arg0 : i32, i32
  }
  func.func @transform_1(%arg0: i32) -> (i32, i32) {
    %c0_i32 = arith.constant 0 : i32
    %c0_i32_0 = arith.constant 0 : i32
    %c0_i32_1 = arith.constant 0 : i32
    return %c0_i32, %c0_i32_0 : i32, i32
  }
  func.func @transform_2(%arg0: i32) -> (i32, i32) {
    %c0_i32 = arith.constant 0 : i32
    %c0_i32_0 = arith.constant 0 : i32
    %c0_i32_1 = arith.constant 0 : i32
    return %c0_i32, %c0_i32_0 : i32, i32
  }
  func.func @transform_3(%arg0: i32) -> (i32, i32, i32) {
    %c0_i32 = arith.constant 0 : i32
    %c0_i32_0 = arith.constant 0 : i32
    %c0_i32_1 = arith.constant 0 : i32
    return %arg0, %c0_i32, %c0_i32_0 : i32, i32, i32
  }
}

</mosaic_0001>

<bundles_post_ra>
// kernel: trans_model_forward.1
= control target key start
LH: loop header
LB: loop body
LE: loop exit
PB: predicated region body
PF: predicated region fallthrough
CT: control target
= control target key end

     0   :  { %8 = vsyncpa [#allocation3], 0  ;;  %s5932_s0 = inlined_call_operand.hbm [shape: f32[4,256], index: 0, kind: input, shape index: {}]   ;;  %s5933_s1 = inlined_call_operand.hbm [shape: f32[2384,128], index: 1, kind: input, shape index: {}]   ;;  %s5934_s2 = inlined_call_operand.hbm [shape: f32[128,256], index: 2, kind: input, shape index: {}]   ;;  %s5935_s3 = inlined_call_operand.hbm [shape: f32[2,1,2], index: 3, kind: output, shape index: {}]  }
   0x1   :  { %10 = vsyncpa [#allocation3 + $0x1], 0 }
   0x2   :  { %11 = vsyncpa [#allocation6], 0 }
   0x3   :  { %12 = vsyncpa [#allocation4], 0 }
   0x4   :  { %14 = vsyncpa [#allocation4 + $0x1], 0  ;;  %s5284_s12 = smov 0   ;;  %s5286_s13 = smov 0  }
   0x5   :  { %s5288_s14 = smov 0   ;;  %s5290_s15 = smov 0  }
   0x6 LB: > { %s5305_s16 = sadd.s32 4294967295, %s5247_s15   ;;  %s3699_s17 = sadd.s32 4294967294, %s5247_s15   ;;  %s5247_s15 = sphi %s5290_s15, %s5955_s15   ;;  %s5243_s14 = sphi %s5288_s14, %s5954_s14   ;;  %s5239_s13 = sphi %s5286_s13, %s5953_s13   ;;  %s5235_s12 = sphi %s5284_s12, %s5952_s12  }
   0x7   : > { %p40_p0 = scmp.ne.s32.totalorder %s5239_s13, %s5235_s12  ;;  %p5936_p1 = scmp.eq.s32.totalorder %s5305_s16, 0 }
   0x8   : > { %p112_p3 = scmp.eq.s32.totalorder %s3699_s17, 1  ;;  %p3700_p5 = scmp.ge.s32.totalorder %s5247_s15, 1 }
   0x9   : > { %p5314_p4 = por %p5936_p1, %p40_p0  ;;  %p119_p7 = scmp.lt.s32.totalorder %s5247_s15, 3 }
   0xa   : > { %p5319_p6 = por %p112_p3, %p40_p0  ;;  %s5249_s21 = smov [#allocation5]  }
   0xb   : > { %s5939_s18 = scalar_select %p5314_p4, 1, 0 }
   0xc   : > { %s5940_s19 = scalar_select %p5319_p6, 1, 0 }
   0xd   : > { %p5324_p8 = pnand %p3700_p5, %p119_p7  ;;  %s131_s22 = sshll.u32 %s5249_s21, 4  ;;  %s5328_s22 = int_to_ptr.vmem [resolvable:$true] %s131_s22 }
   0xe   : > { %s5250_s24 = smov [#allocation7]   ;;  %s5091_s28 = scalar_lea.hbm %s5933_s1, 38144 }
   0xf   : > { %p4929_p9 = pneg %p5324_p8  ;;  %s144_s25 = sshll.u32 %s5250_s24, 4  ;;  %s5339_s25 = int_to_ptr.vmem [resolvable:$true] %s144_s25 }
  0x10   : > { %p5092_p12 = scmp.ne.s32.totalorder %s5933_s1, %s5091_s28  ;;  %p5098_p5 = scmp.lt.u32.totalorder %s5091_s28, %s5933_s1 }
  0x11   : > { %p5335_p11 = pnand %p4929_p9, %p5936_p1 }
  0x13   : > { %p5093_p13 = pneg %p5335_p11 }
  0x15   : > { %p5094_p0 = pnand %p5093_p13, %p5092_p12 }
  0x17   : > { %p5095_p3 = pneg %p5094_p0 }
  0x19   : > { %p5100_p7 = pnand %p5098_p5, %p5095_p3 }
  0x1b   : > { %5103 = shalt.err (!%p5100_p7)
}
  0x1c   : > { %s5104_s6 = scalar_lea.vmem %s5328_s22, 38144  ;;  %p5112_p2 = scmp.lt.s32.totalorder %s5328_s22, %s5328_s22 }
  0x1d   : > { %p5105_p9 = scmp.ne.s32.totalorder %s5328_s22, %s5104_s6  ;;  %p5113_p12 = scmp.lt.s32.totalorder %s5104_s6, %s5104_s6 }
  0x1f   : > { %p5107_p10 = pnand %p5105_p9, %p5093_p13  ;;  %p5114_p0 = por %p5113_p12, %p5112_p2 }
  0x21   : > { %p5108_p1 = pneg %p5107_p10 }
  0x23   : > { %p5115_p6 = pnand %p5114_p0, %p5108_p1 }
  0x25   : > { %5118 = shalt.err (!%p5115_p6)
}
  0x26   : > { %s5251_s7 = smov 128   ;;  %s5252_s8 = smov 8  }
  0x27   : > { %4932 = dma.hbm_to_vmem [thread:$0]  (!%p5335_p11), %s5933_s1, 38144, %s5328_s22, [#allocation6], %s5251_s7, %s5251_s7, %s5252_s8  }
  0x28   : > { %s5119_s21 = scalar_lea.hbm %s5934_s2, 4096 }
  0x29   : > { %p5120_p2 = scmp.ne.s32.totalorder %s5934_s2, %s5119_s21  ;;  %p5126_p10 = scmp.lt.u32.totalorder %s5119_s21, %s5934_s2 }
  0x2b   : > { %p5122_p1 = pnand %p5120_p2, %p5093_p13 }
  0x2d   : > { %p5123_p6 = pneg %p5122_p1 }
  0x2f   : > { %p5128_p3 = pnand %p5126_p10, %p5123_p6 }
  0x31   : > { %5131 = shalt.err (!%p5128_p3)
}
  0x32   : > { %s5132_s22 = scalar_lea.vmem %s5339_s25, 4096  ;;  %p5140_p12 = scmp.lt.s32.totalorder %s5339_s25, %s5339_s25 }
  0x33   : > { %p5133_p5 = scmp.ne.s32.totalorder %s5339_s25, %s5132_s22  ;;  %p5141_p0 = scmp.lt.s32.totalorder %s5132_s22, %s5132_s22 }
  0x35   : > { %p5135_p7 = pnand %p5133_p5, %p5093_p13  ;;  %p5142_p2 = por %p5141_p0, %p5140_p12 }
  0x37   : > { %p5136_p9 = pneg %p5135_p7 }
  0x39   : > { %p5143_p1 = pnand %p5142_p2, %p5136_p9 }
  0x3b   : > { %5146 = shalt.err (!%p5143_p1)
}
  0x3c   : > { %s5253_s29 = smov 256   ;;  %s5254_s30 = smov 16  }
  0x3d   : > { %4935 = dma.hbm_to_vmem [thread:$0]  (!%p5335_p11), %s5934_s2, 4096, %s5339_s25, [#allocation6], %s5253_s29, %s5253_s29, %s5254_s30  }
  0x3e   : > { %s5394_s6 = sadd.s32 1, %s5247_s15   ;;  %s27_s8 = sadd.s32 1, %s5243_s14 }
  0x3f   : > { %s24_s7 = ssub.s32 %s5247_s15, %s5394_s6  ;;  %p34_p6 = scmp.ne.s32.totalorder %s5243_s14, %s5239_s13 }
  0x40   : > { %p25_p13 = scmp.eq.s32.totalorder %s24_s7, 0  ;;  %p35_p10 = scmp.eq.s32.totalorder %s5247_s15, 0 }
  0x41   : > { %p5943_p5 = scmp.eq.s32.totalorder %s5305_s16, 1  ;;  %p4946_p9 = scmp.lt.s32.totalorder %s5247_s15, 2 }
  0x42   : > { %s5403_s9 = scalar_select %p25_p13, %s5243_s14, %s27_s8  }
  0x43   : > { %p36_p3 = por %p35_p10, %p34_p6  ;;  %p5407_p7 = por %p5943_p5, %p34_p6 }
  0x44   : > { %s158_s23 = sand.u32 1, %s5243_s14   ;;  %s3705_s25 = sshll.u32 %s5247_s15, 6 }
  0x45   : > { %s5944_s10 = scalar_select %p5407_p7, 1, 0 }
  0x46   : > { %s3704_s11 = sshll.u32 %s158_s23, 2  ;;  %s5417_s24 = scalar_lea.hbm %s5932_s0, %s3705_s25 }
  0x47   : > { %s162_s26 = scalar_lea.vmem [#allocation2], %s3704_s11  ;;  %p5421_p11 = pnand %p4946_p9, %p36_p3 }
  0x48   : > { %s169_s27 = sshll.u32 %s162_s26, 4  ;;  %s159_s22 = scalar_lea.sflag [#allocation3], %s158_s23  ;;  %s5419_s27 = int_to_ptr.vmem [resolvable:$true] %s169_s27 }
  0x49   : > { %s5147_s29 = scalar_lea.hbm %s5417_s24, 64  ;;  %p5149_p0 = pneg %p5421_p11 }
  0x4a   : > { %p5148_p12 = scmp.ne.s32.totalorder %s5417_s24, %s5147_s29  ;;  %s5152_s5 = scalar_lea.hbm %s5932_s0, 128 }
  0x4b   : > { %p5153_p13 = scmp.lt.u32.totalorder %s5417_s24, %s5932_s0  ;;  %p5154_p6 = scmp.lt.u32.totalorder %s5152_s5, %s5147_s29 }
  0x4c   : > { %p5150_p2 = pnand %p5149_p0, %p5148_p12  ;;  %p5156_p3 = scmp.lt.u32.totalorder %s5147_s29, %s5417_s24 }
  0x4d   : > { %p5155_p10 = por %p5154_p6, %p5153_p13 }
  0x4e   : > { %p5151_p1 = pneg %p5150_p2 }
  0x4f   : > { %p5157_p5 = por %p5156_p3, %p5155_p10 }
  0x51   : > { %p5158_p9 = pnand %p5157_p5, %p5151_p1 }
  0x53   : > { %5161 = shalt.err (!%p5158_p9)
}
  0x54   : > { %s5162_s23 = scalar_lea.vmem %s5419_s27, 64  ;;  %s5255_s11 = smov [#allocation2]  }
  0x55   : > { %p5163_p12 = scmp.ne.s32.totalorder %s5419_s27, %s5162_s23  ;;  %s5167_s25 = sshll.u32 %s5255_s11, 4  ;;  %s5168_s25 = int_to_ptr.vmem [resolvable:$false] %s5167_s25 }
  0x56   : > { %s5169_s17 = scalar_lea.vmem %s5168_s25, 128  ;;  %p5170_p4 = scmp.lt.s32.totalorder %s5419_s27, %s5168_s25 }
  0x57   : > { %p5165_p2 = pnand %p5163_p12, %p5149_p0  ;;  %p5171_p13 = scmp.lt.s32.totalorder %s5169_s17, %s5162_s23 }
  0x59   : > { %p5166_p7 = pneg %p5165_p2  ;;  %p5172_p6 = por %p5171_p13, %p5170_p4 }
  0x5b   : > { %p5173_p10 = pnand %p5172_p6, %p5166_p7 }
  0x5d   : > { %5176 = shalt.err (!%p5173_p10)
}
  0x5e   : > { %4939 = dma.hbm_to_vmem [thread:$0]  (!%p5421_p11), %s5417_s24, 64, %s5419_s27, %s159_s22  }
  0x5f   : > { %178 = sbr.rel (%p5324_p8) target bundleno = 7489 (0x1d41), region = 32  ;;  %s5453_s21 = sand.u32 (!%p5324_p8), 1, %s5239_s13  }
  0x60   : > { %s3707_s26 = sshll.u32 (!%p5324_p8), %s5453_s21, 2  ;;  %s181_s29 = scalar_lea.sflag (!%p5324_p8), [#allocation3], %s5453_s21 }
  0x61   : > { %s184_s30 = scalar_lea.vmem (!%p5324_p8), [#allocation2], %s3707_s26  ;;  %p5946_p4 = scmp.ne.s32.totalorder (!%p5324_p8), %s5939_s18, 0 }
  0x66   : > { %5222 = dma.done.wait (%p5946_p4), %s181_s29, 64  }
  0x67   : > { %5224 = vsyncadd (%p5946_p4), %s181_s29, 4294967232  ;;  %p5947_p7 = scmp.eq.s32.totalorder %s5305_s16, 0 }
  0x69   : > { %5226 = dma.done.wait (%p5947_p7), [#allocation6], 42240   ;;  %p5948_p11 = pmov %p5947_p7 }
  0x6a   : > { %vm240_vm0 = vcmask 105472   ;;  %v223_v0 = vld [vmem:[%s184_s30] sm:$0xf]  ;;  %v224_v1 = vld [vmem:[#allocation7] sm:$0xff]  ;;  %s5256_s20 = smov 1   ;;  %s5257_s24 = smov 127   ;;  %v214_v2 = vlaneseq }
  0x6b   : > { %5228 = vsyncadd (%p5948_p11), [#allocation6], 4294925056  ;;  %228 = vrot.lane.b32.xlu0 %v223_v0, %s5256_s20  ;;  %4254 = vmatprep.mubr.msk.f32.mxu0 %vm240_vm0, %v224_v1  ;;  %v5258_v4 = vmov 0.0   ;;  %v235_v8 = vrot.slane %v223_v0, 4  ;;  %vm237_vm3 = vcmask 1043456   ;;  %vm253_vm4 = vcmask 1044480  }
  0x6c   : > { %v215_v3 = vand.u32 127, %v214_v2  ;;  %vm5259_vm5 = vmmov 1   ;;  %v225_v15 = vld [vmem:[#allocation7 + $0x10] sm:$0xff]  ;;  %v226_v16 = vld [vmem:[#allocation7 + $0x20] sm:$0xff]  ;;  %vm374_vm7 = vcmask 793600   ;;  %vm399_vm8 = vcmask 1040384  }
  0x6d   : > { %vm4490_vm6 = vmpackc.low %vm253_vm4, %vm5259_vm5  ;;  %v227_v17 = vld [vmem:[#allocation7 + $0x30] sm:$0xff]  ;;  %v342_v24 = vld [vmem:[#allocation7 + $0x40] sm:$0xff]  ;;  %v5260_v45 = vmov 1.0   ;;  %v5261_v53 = vmov 0.0|0.0   ;;  %vm564_vm9 = vcmask 531456   ;;  %vm1204_vm10 = vcmask 261120  }
  0x6e   : > { %vm217_vm1 = vcmp.ne.s32.totalorder %v215_v3, 0  ;;  %vm220_vm2 = vcmp.ne.s32.totalorder %v215_v3, 127  ;;  %4286 = vmatprep.mubr.msk.f32.mxu1 %vm374_vm7, %v342_v24  ;;  %v343_v46 = vld [vmem:[#allocation7 + $0x50] sm:$0xff]  ;;  %v344_v47 = vld [vmem:[#allocation7 + $0x60] sm:$0xff]  ;;  %v509_v2 = vld [vmem:[#allocation7 + $0xc8] sm:$0xff]  ;;  %vm5262_vm11 = vmmov 0  }
  0x6f   : > { %231 = vrot.lane.b32.xlu0 %v223_v0, %s5257_s24  ;;  %v5469_v5 = vsel %vm217_vm1, 1.0, %v5258_v4  ;;  %v5472_v7 = vsel %vm220_vm2, 1.0, %v5258_v4  ;;  %v345_v48 = vld [vmem:[#allocation7 + $0x70] sm:$0xff]  ;;  %v346_v49 = vld [vmem:[#allocation7 + $0x80] sm:$0xff]  ;;  %vm4915_vm12 = vmpackc.low %vm1204_vm10, %vm1204_vm10  ;;  %vm3522_vm13 = vcmask 130048   ;;  %s3786_s18 = sshll.u32 %s5305_s16, 4 }
  0x70   : > { %v347_v50 = vld [vmem:[#allocation7 + $0x90] sm:$0xff]  ;;  %v348_v51 = vld [vmem:[#allocation7 + $0xa0] sm:$0xff]  ;;  %s213_s27 = scalar_lea.vmem [#allocation8], %s5453_s21  ;;  %vm3599_vm14 = vcmask 8192   ;;  %s5888_s5 = scalar_lea.hbm %s5935_s3, %s3786_s18 }
  0x71   : > { %v349_v52 = vld [vmem:[#allocation7 + $0xb0] sm:$0xff]  ;;  %s3614_s28 = sshll.u32 %s213_s27, 4  ;;  %s3602_s7 = scalar_lea.sflag [#allocation4], %s5453_s21  ;;  %s5890_s28 = int_to_ptr.vmem [resolvable:$true] %s3614_s28 }
  0x72   : > { %s5177_s8 = scalar_lea.vmem %s5890_s28, 16  ;;  %p5949_p0 = scmp.ne.s32.totalorder %s5944_s10, 0 }
  0x73   : > { %p5178_p8 = scmp.ne.s32.totalorder %s5890_s28, %s5177_s8  ;;  %s5263_s16 = smov [#allocation8]  }
  0x74   : > { %s5181_s23 = sshll.u32 %s5263_s16, 4  ;;  %s5182_s23 = int_to_ptr.vmem [resolvable:$false] %s5181_s23 }
  0x75   : > { %p5179_p1 = pnand %p5178_p8, %p5949_p0  ;;  %s5183_s11 = scalar_lea.vmem %s5182_s23, 32 }
  0x76   : > { %p5184_p5 = scmp.lt.s32.totalorder %s5890_s28, %s5182_s23  ;;  %p5185_p9 = scmp.lt.s32.totalorder %s5183_s11, %s5177_s8 }
  0x77   : > { %p5180_p3 = pneg %p5179_p1 }
  0x78   : > { %p5186_p12 = por %p5185_p9, %p5184_p5 }
  0x7a   : > { %p5187_p2 = pnand %p5186_p12, %p5180_p3 }
  0xdd   : > { %v229_v6 = vpop.permute.xlu0 %228 }
  0xde   : > { %v230_v9 = vmul.f32 %v5469_v5, %v229_v6 }
  0xe0   : > { %v238_v12 = vsel %vm237_vm3, %v230_v9, %v235_v8 }
  0xe1   : > { %v232_v10 = vpop.permute.xlu0 %231 }
  0xe2   : > { %v233_v11 = vmul.f32 %v5472_v7, %v232_v10 }
  0xe4   : > { %v239_v13 = vsel %vm237_vm3, %v233_v11, 1.0 }
  0xe5   : > { %v4489_v14 = vpack.c.bf16 %v239_v13, %v238_v12 }
  0xe7   : > { %4491 = vmatprep.subr.msk.bf16.mxu0 %vm4490_vm6, %v4489_v14 }
  0xe8   : > { %4494 = vmatpush3.bf16.msk.msra.mxu0 %vm4490_vm6, %v4489_v14 }
  0xe9   : > { %4519 = vmatprep.subr.bf16.mxu0 %v5261_v53 }
  0xeb   : > { %4255 = vmatmul.mubr.msk.f32.vlgmr.msra.gmra.mrb[0].mxu0 %vm240_vm0, %v225_v15 }
  0xec   : > { %4257 = vmatprep.mubr.msk.f32.mxu0 %vm240_vm0, %v226_v16 }
  0xef   : > { %4258 = vmatmul.mubr.msk.f32.gmra.mrb[2].mxu0 %vm240_vm0, %v227_v17 }
  0xf0   : > { %3727 = vmatprep.mubr.msk.f32.mxu0 %vm564_vm9, %v509_v2  ;;  %v774_v2 = vld [vmem:[#allocation5 + $0x188] sm:$0xff] }
 0x1be   : > { %v4256_v18 = vpop.f32.mrb[0].mxu0 }
 0x1bf   : > { %352 = vrot.lane.b32.xlu1 %v4256_v18, %s5256_s20  ;;  %v323_v19 = vpop.f32.mrb[1].mxu0 }
 0x1c0   : > { %v4503_v20 = vpack.c.bf16 %v4256_v18, %v323_v19 }
 0x1c2   : > { %v4259_v21 = vpop.f32.mrb[2].mxu0 }
 0x1c3   : > { %350 = vrot.lane.b32.xlu1 %v323_v19, %s5256_s20  ;;  %v333_v22 = vpop.f32.mrb[3].mxu0 }
 0x1c4   : > { %v4507_v23 = vpack.c.bf16 %v4259_v21, %v333_v22  ;;  %354 = vrot.lane.b32.xlu0 %v333_v22, %s5256_s20 }
 0x1c7   : > { %356 = vrot.lane.b32.xlu1 %v4259_v21, %s5256_s20 }
 0x1c8   : > { %362 = vrot.lane.b32.xlu0 %v323_v19, %s5257_s24 }
 0x1cb   : > { %364 = vrot.lane.b32.xlu1 %v4256_v18, %s5257_s24 }
 0x1cc   : > { %366 = vrot.lane.b32.xlu0 %v333_v22, %s5257_s24 }
 0x1cf   : > { %368 = vrot.lane.b32.xlu1 %v4259_v21, %s5257_s24 }
 0x231   : > { %v353_v25 = vpop.permute.xlu1 %352 }
 0x232   : > { %v359_v27 = vmul.f32 %v5469_v5, %v353_v25 }
 0x235   : > { %v351_v26 = vpop.permute.xlu1 %350 }
 0x236   : > { %v358_v28 = vmul.f32 %v5469_v5, %v351_v26  ;;  %v355_v29 = vpop.permute.xlu0 %354 }
 0x237   : > { %v360_v30 = vmul.f32 %v5469_v5, %v355_v29 }
 0x238   : > { %v4495_v31 = vpack.c.bf16 %v359_v27, %v358_v28 }
 0x239   : > { %v357_v32 = vpop.permute.xlu1 %356 }
 0x23a   : > { %v361_v33 = vmul.f32 %v5469_v5, %v357_v32  ;;  %4496 = vmatprep.subr.bf16.mxu1 %v4495_v31  ;;  %v363_v36 = vpop.permute.xlu0 %362 }
 0x23b   : > { %4498 = vmatpush3.bf16.msra.mxu1 %v4495_v31  ;;  %v370_v39 = vmul.f32 %v5472_v7, %v363_v36 }
 0x23c   : > { %v4499_v34 = vpack.c.bf16 %v361_v33, %v360_v30 }
 0x23d   : > { %v365_v35 = vpop.permute.xlu1 %364 }
 0x23e   : > { %4500 = vmatprep.subr.bf16.mxu1 %v4499_v34  ;;  %v371_v37 = vmul.f32 %v5472_v7, %v365_v35  ;;  %v367_v40 = vpop.permute.xlu0 %366 }
 0x23f   : > { %4502 = vmatpush3.bf16.msra.mxu1 %v4499_v34  ;;  %v372_v43 = vmul.f32 %v5472_v7, %v367_v40 }
 0x240   : > { %4504 = vmatprep.subr.bf16.mxu1 %v4503_v20  ;;  %v4511_v41 = vpack.c.bf16 %v371_v37, %v370_v39 }
 0x241   : > { %v369_v38 = vpop.permute.xlu1 %368 }
 0x242   : > { %v373_v42 = vmul.f32 %v5472_v7, %v369_v38 }
 0x243   : > { %4506 = vmatpush3.bf16.msra.mxu1 %v4503_v20 }
 0x244   : > { %4508 = vmatprep.subr.bf16.mxu1 %v4507_v23  ;;  %v4515_v44 = vpack.c.bf16 %v373_v42, %v372_v43 }
 0x247   : > { %4510 = vmatpush3.bf16.msra.mxu1 %v4507_v23 }
 0x248   : > { %4512 = vmatprep.subr.bf16.mxu1 %v4511_v41 }
 0x24b   : > { %4514 = vmatpush3.bf16.msra.mxu1 %v4511_v41 }
 0x24c   : > { %4516 = vmatprep.subr.bf16.mxu1 %v4515_v44 }
 0x24f   : > { %4518 = vmatpush3.bf16.msra.mxu1 %v4515_v44 }
 0x250   : > { %4284 = vmatprep.subr.msk.mxu1 %vm399_vm8, %v5260_v45 }
 0x253   : > { %4285 = vmatpush3.msk.msra.mxu1 %vm399_vm8, %v5260_v45 }
 0x254   : > { %4287 = vmatmul.mubr.msk.f32.vlgmr.msra.gmra.mrb[0].mxu1 %vm374_vm7, %v343_v46  ;;  %v508_v46 = vld [vmem:[#allocation7 + $0xc0] sm:$0xff] }
 0x255   : > { %4289 = vmatprep.mubr.msk.f32.mxu1 %vm374_vm7, %v344_v47  ;;  %v511_v47 = vld [vmem:[#allocation7 + $0xd8] sm:$0xff] }
 0x258   : > { %4290 = vmatmul.mubr.msk.f32.gmra.mrb[2].mxu1 %vm374_vm7, %v345_v48  ;;  %v510_v48 = vld [vmem:[#allocation7 + $0xd0] sm:$0xff] }
 0x259   : > { %4292 = vmatprep.mubr.msk.f32.mxu1 %vm374_vm7, %v346_v49  ;;  %v513_v49 = vld [vmem:[#allocation7 + $0xe8] sm:$0xff] }
 0x25c   : > { %4293 = vmatmul.mubr.msk.f32.gmra.mrb[4].mxu1 %vm374_vm7, %v347_v50  ;;  %v515_v50 = vld [vmem:[#allocation7 + $0xf8] sm:$0xff] }
 0x25d   : > { %4295 = vmatprep.mubr.msk.f32.mxu1 %vm374_vm7, %v348_v51  ;;  %v514_v51 = vld [vmem:[#allocation7 + $0xf0] sm:$0xff] }
 0x260   : > { %4296 = vmatmul.mubr.msk.f32.gmra.mrb[6].mxu1 %vm374_vm7, %v349_v52 }
 0x327   : > { %v4288_v54 = vpop.f32.mrb[0].mxu1 }
 0x328   : > { %518 = vrot.lane.b32.xlu1 %v4288_v54, %s5256_s20  ;;  %v469_v55 = vpop.f32.mrb[1].mxu1 }
 0x329   : > { %v4532_v56 = vpack.c.bf16 %v4288_v54, %v469_v55  ;;  %516 = vrot.lane.b32.xlu0 %v469_v55, %s5256_s20 }
 0x32b   : > { %v4291_v57 = vpop.f32.mrb[2].mxu1 }
 0x32c   : > { %522 = vrot.lane.b32.xlu1 %v4291_v57, %s5256_s20  ;;  %v479_v58 = vpop.f32.mrb[3].mxu1 }
 0x32d   : > { %v4535_v59 = vpack.c.bf16 %v4291_v57, %v479_v58  ;;  %520 = vrot.lane.b32.xlu0 %v479_v58, %s5256_s20 }
 0x32f   : > { %v4294_v60 = vpop.f32.mrb[4].mxu1 }
 0x330   : > { %526 = vrot.lane.b32.xlu1 %v4294_v60, %s5256_s20  ;;  %v489_v61 = vpop.f32.mrb[5].mxu1 }
 0x331   : > { %v4538_v62 = vpack.c.bf16 %v4294_v60, %v489_v61  ;;  %524 = vrot.lane.b32.xlu0 %v489_v61, %s5256_s20 }
 0x333   : > { %v4297_v63 = vpop.f32.mrb[6].mxu1 }
 0x334   : > { %530 = vrot.lane.b32.xlu1 %v4297_v63, %s5256_s20  ;;  %v499_v0 = vpop.f32.mrb[7].mxu1 }
 0x335   : > { %v4541_v1 = vpack.c.bf16 %v4297_v63, %v499_v0  ;;  %528 = vrot.lane.b32.xlu0 %v499_v0, %s5256_s20 }
 0x338   : > { %542 = vrot.lane.b32.xlu1 %v4288_v54, %s5257_s24 }
 0x339   : > { %540 = vrot.lane.b32.xlu0 %v469_v55, %s5257_s24 }
 0x33c   : > { %546 = vrot.lane.b32.xlu1 %v4291_v57, %s5257_s24 }
 0x33d   : > { %544 = vrot.lane.b32.xlu0 %v479_v58, %s5257_s24 }
 0x340   : > { %550 = vrot.lane.b32.xlu1 %v4294_v60, %s5257_s24  ;;  %v741_v60 = vld [vmem:[#allocation5 + $0x80] sm:$0xff] }
 0x341   : > { %548 = vrot.lane.b32.xlu0 %v489_v61, %s5257_s24  ;;  %v742_v61 = vld [vmem:[#allocation5 + $0x88] sm:$0xff] }
 0x344   : > { %554 = vrot.lane.b32.xlu1 %v4297_v63, %s5257_s24  ;;  %v4555_v63 = vpack.c.bf16 %v742_v61, %v741_v60  ;;  %v751_v60 = vld [vmem:[#allocation5 + $0xd0] sm:$0xff]  ;;  %v752_v61 = vld [vmem:[#allocation5 + $0xd8] sm:$0xff] }
 0x345   : > { %552 = vrot.lane.b32.xlu0 %v499_v0, %s5257_s24  ;;  %v726_v0 = vld [vmem:[#allocation5 + $0x8] sm:$0xff] }
 0x346   : > { %4556 = vmatprep.subr.bf16.mxu1 %v4555_v63  ;;  %v784_v63 = vld [vmem:[#allocation5 + $0x1d8] sm:$0xff] }
 0x39a   : > { %v519_v3 = vpop.permute.xlu1 %518 }
 0x39b   : > { %v533_v6 = vmul.f32 %v5469_v5, %v519_v3  ;;  %v517_v8 = vpop.permute.xlu0 %516 }
 0x39c   : > { %v532_v9 = vmul.f32 %v5469_v5, %v517_v8  ;;  %v757_v8 = vld [vmem:[#allocation5 + $0x100] sm:$0xff] }
 0x39e   : > { %v4520_v10 = vpack.c.bf16 %v533_v6, %v532_v9  ;;  %v523_v11 = vpop.permute.xlu1 %522  ;;  %v758_v9 = vld [vmem:[#allocation5 + $0x108] sm:$0xff] }
 0x39f   : > { %v535_v12 = vmul.f32 %v5469_v5, %v523_v11  ;;  %v521_v13 = vpop.permute.xlu0 %520  ;;  %v4589_v11 = vpack.c.bf16 %v758_v9, %v757_v8  ;;  %v736_v8 = vld [vmem:[#allocation5 + $0x58] sm:$0xff]  ;;  %v767_v9 = vld [vmem:[#allocation5 + $0x150] sm:$0xff] }
 0x3a0   : > { %v534_v14 = vmul.f32 %v5469_v5, %v521_v13  ;;  %4521 = vmatpush1.bf16.msra.mxu0 %v4520_v10  ;;  %v743_v10 = vld [vmem:[#allocation5 + $0x90] sm:$0xff] }
 0x3a1   : > { %4522 = vmatprep.subr.bf16.mxu0 %v5261_v53 }
 0x3a2   : > { %v4523_v15 = vpack.c.bf16 %v535_v12, %v534_v14  ;;  %v527_v16 = vpop.permute.xlu1 %526  ;;  %v744_v12 = vld [vmem:[#allocation5 + $0x98] sm:$0xff]  ;;  %v775_v14 = vld [vmem:[#allocation5 + $0x190] sm:$0xff] }
 0x3a3   : > { %v537_v17 = vmul.f32 %v5469_v5, %v527_v16  ;;  %v525_v18 = vpop.permute.xlu0 %524  ;;  %v4559_v13 = vpack.c.bf16 %v744_v12, %v743_v10  ;;  %v727_v16 = vld [vmem:[#allocation5 + $0x10] sm:$0xff]  ;;  %v768_v10 = vld [vmem:[#allocation5 + $0x158] sm:$0xff] }
 0x3a4   : > { %v536_v19 = vmul.f32 %v5469_v5, %v525_v18  ;;  %4524 = vmatpush1.bf16.msra.mxu0 %v4523_v15  ;;  %v776_v15 = vld [vmem:[#allocation5 + $0x198] sm:$0xff]  ;;  %v4609_v12 = vpack.c.bf16 %v768_v10, %v767_v9  ;;  %v3731_v10 = vld [vmem:[#allocation5 + $0x410] ss:$0 sm:$0xff] }
 0x3a5   : > { %4525 = vmatprep.subr.bf16.mxu0 %v5261_v53  ;;  %v4591_v18 = vpack.c.bf16 %v776_v15, %v775_v14 }
 0x3a6   : > { %v4526_v20 = vpack.c.bf16 %v537_v17, %v536_v19  ;;  %v531_v21 = vpop.permute.xlu1 %530  ;;  %v728_v17 = vld [vmem:[#allocation5 + $0x18] sm:$0xff]  ;;  %v759_v19 = vld [vmem:[#allocation5 + $0x110] sm:$0xff] }
 0x3a7   : > { %v539_v22 = vmul.f32 %v5469_v5, %v531_v21  ;;  %v529_v23 = vpop.permute.xlu0 %528  ;;  %v745_v21 = vld [vmem:[#allocation5 + $0xa0] sm:$0xff] }
 0x3a8   : > { %v538_v24 = vmul.f32 %v5469_v5, %v529_v23  ;;  %4527 = vmatpush1.bf16.msra.mxu0 %v4526_v20  ;;  %v760_v20 = vld [vmem:[#allocation5 + $0x118] sm:$0xff]  ;;  %v777_v23 = vld [vmem:[#allocation5 + $0x1a0] sm:$0xff] }
 0x3a9   : > { %4528 = vmatprep.subr.bf16.mxu0 %v5261_v53 }
 0x3aa   : > { %v4529_v25 = vpack.c.bf16 %v539_v22, %v538_v24  ;;  %v543_v26 = vpop.permute.xlu1 %542  ;;  %v746_v22 = vld [vmem:[#allocation5 + $0xa8] sm:$0xff] }
 0x3ab   : > { %v541_v27 = vpop.permute.xlu0 %540  ;;  %v557_v5 = vmul.f32 %v5472_v7, %v543_v26  ;;  %v778_v24 = vld [vmem:[#allocation5 + $0x1a8] sm:$0xff]  ;;  %v4593_v26 = vpack.c.bf16 %v760_v20, %v759_v19 }
 0x3ac   : > { %4530 = vmatpush1.bf16.msra.mxu0 %v4529_v25  ;;  %v556_v30 = vmul.f32 %v5472_v7, %v541_v27  ;;  %v4561_v25 = vpack.c.bf16 %v728_v17, %v727_v16  ;;  %v4563_v27 = vpack.c.bf16 %v746_v22, %v745_v21 }
 0x3ad   : > { %4531 = vmatprep.subr.bf16.mxu0 %v5261_v53 }
 0x3ae   : > { %v547_v28 = vpop.permute.xlu1 %546  ;;  %v4544_v33 = vpack.c.bf16 %v557_v5, %v556_v30  ;;  %v730_v5 = vld [vmem:[#allocation5 + $0x28] sm:$0xff]  ;;  %v761_v30 = vld [vmem:[#allocation5 + $0x120] sm:$0xff] }
 0x3af   : > { %v545_v29 = vpop.permute.xlu0 %544  ;;  %v559_v34 = vmul.f32 %v5472_v7, %v547_v28  ;;  %v4595_v28 = vpack.c.bf16 %v778_v24, %v777_v23 }
 0x3b0   : > { %4533 = vmatpush1.bf16.msra.mxu0 %v4532_v56  ;;  %v558_v35 = vmul.f32 %v5472_v7, %v545_v29  ;;  %v729_v29 = vld [vmem:[#allocation5 + $0x20] sm:$0xff] }
 0x3b1   : > { %4534 = vmatprep.subr.bf16.mxu0 %v5261_v53 }
 0x3b2   : > { %v551_v31 = vpop.permute.xlu1 %550  ;;  %v4547_v36 = vpack.c.bf16 %v559_v34, %v558_v35  ;;  %v779_v34 = vld [vmem:[#allocation5 + $0x1b0] sm:$0xff]  ;;  %v780_v35 = vld [vmem:[#allocation5 + $0x1b8] sm:$0xff] }
 0x3b3   : > { %v549_v32 = vpop.permute.xlu0 %548  ;;  %v561_v37 = vmul.f32 %v5472_v7, %v551_v31  ;;  %v762_v31 = vld [vmem:[#allocation5 + $0x128] sm:$0xff] }
 0x3b4   : > { %4536 = vmatpush1.bf16.msra.mxu0 %v4535_v59  ;;  %v560_v38 = vmul.f32 %v5472_v7, %v549_v32  ;;  %v747_v32 = vld [vmem:[#allocation5 + $0xb0] sm:$0xff] }
 0x3b5   : > { %4537 = vmatprep.subr.bf16.mxu0 %v5261_v53 }
 0x3b6   : > { %v555_v39 = vpop.permute.xlu1 %554  ;;  %v4550_v41 = vpack.c.bf16 %v561_v37, %v560_v38  ;;  %v4597_v37 = vpack.c.bf16 %v762_v31, %v761_v30  ;;  %v737_v31 = vld [vmem:[#allocation5 + $0x60] sm:$0xff] }
 0x3b7   : > { %v553_v40 = vpop.permute.xlu0 %552  ;;  %v563_v42 = vmul.f32 %v5472_v7, %v555_v39  ;;  %v4599_v39 = vpack.c.bf16 %v780_v35, %v779_v34  ;;  %v786_v35 = vld [vmem:[#allocation5 + $0x1e8] sm:$0xff] }
 0x3b8   : > { %4539 = vmatpush1.bf16.msra.mxu0 %v4538_v62  ;;  %v562_v43 = vmul.f32 %v5472_v7, %v553_v40  ;;  %v512_v7 = vld [vmem:[#allocation7 + $0xe0] sm:$0xff]  ;;  %v725_v62 = vld [vmem:[#allocation5] sm:$0xff] }
 0x3b9   : > { %4540 = vmatprep.subr.bf16.mxu0 %v5261_v53  ;;  %v4557_v3 = vpack.c.bf16 %v726_v0, %v725_v62  ;;  %v731_v40 = vld [vmem:[#allocation5 + $0x30] sm:$0xff] }
 0x3ba   : > { %v4553_v44 = vpack.c.bf16 %v563_v42, %v562_v43  ;;  %v763_v42 = vld [vmem:[#allocation5 + $0x130] sm:$0xff]  ;;  %v764_v43 = vld [vmem:[#allocation5 + $0x138] sm:$0xff] }
 0x3bb   : > { %4558 = vmatpush3.bf16.xpose.msra.mxu1 %v4557_v3  ;;  %v783_v62 = vld [vmem:[#allocation5 + $0x1d0] sm:$0xff] }
 0x3bc   : > { %4542 = vmatpush1.bf16.msra.mxu0 %v4541_v1  ;;  %v773_v1 = vld [vmem:[#allocation5 + $0x180] sm:$0xff]  ;;  %4560 = vmatprep.subr.bf16.mxu1 %v4559_v13  ;;  %v4607_v3 = vpack.c.bf16 %v784_v63, %v783_v62 }
 0x3bd   : > { %4543 = vmatprep.subr.bf16.mxu0 %v5261_v53  ;;  %v4587_v6 = vpack.c.bf16 %v774_v2, %v773_v1  ;;  %v4575_v2 = vpack.c.bf16 %v752_v61, %v751_v60 }
 0x3c0   : > { %4545 = vmatpush1.bf16.msra.mxu0 %v4544_v33  ;;  %v748_v33 = vld [vmem:[#allocation5 + $0xb8] sm:$0xff] }
 0x3c1   : > { %4546 = vmatprep.subr.bf16.mxu0 %v5261_v53  ;;  %v4567_v38 = vpack.c.bf16 %v748_v33, %v747_v32  ;;  %v738_v32 = vld [vmem:[#allocation5 + $0x68] sm:$0xff]  ;;  %v785_v33 = vld [vmem:[#allocation5 + $0x1e0] sm:$0xff] }
 0x3c2   : > { %v4581_v34 = vpack.c.bf16 %v738_v32, %v737_v31  ;;  %v809_v32 = vld [vmem:[#allocation5 + $0x2a0] sm:$0xff] }
 0x3c3   : > { %4562 = vmatpush3.bf16.xpose.msra.mxu1 %v4561_v25 }
 0x3c4   : > { %4548 = vmatpush1.bf16.msra.mxu0 %v4547_v36  ;;  %4564 = vmatprep.subr.bf16.mxu1 %v4563_v27  ;;  %v4565_v36 = vpack.c.bf16 %v730_v5, %v729_v29  ;;  %v753_v29 = vld [vmem:[#allocation5 + $0xe0] sm:$0xff]  ;;  %v754_v5 = vld [vmem:[#allocation5 + $0xe8] sm:$0xff] }
 0x3c5   : > { %4549 = vmatprep.subr.bf16.mxu0 %v5261_v53  ;;  %v4579_v30 = vpack.c.bf16 %v754_v5, %v753_v29 }
 0x3c8   : > { %4551 = vmatpush1.bf16.msra.mxu0 %v4550_v41  ;;  %v732_v41 = vld [vmem:[#allocation5 + $0x38] sm:$0xff] }
 0x3c9   : > { %4552 = vmatprep.subr.bf16.mxu0 %v5261_v53 }
 0x3cb   : > { %4566 = vmatpush3.bf16.xpose.msra.mxu1 %v4565_v36  ;;  %v769_v36 = vld [vmem:[#allocation5 + $0x160] sm:$0xff] }
 0x3cc   : > { %4554 = vmatpush1.bf16.msra.mxu0 %v4553_v44  ;;  %4568 = vmatprep.subr.bf16.mxu1 %v4567_v38  ;;  %v749_v44 = vld [vmem:[#allocation5 + $0xc0] sm:$0xff]  ;;  %v4611_v38 = vpack.c.bf16 %v786_v35, %v785_v33  ;;  %v810_v33 = vld [vmem:[#allocation5 + $0x2a8] sm:$0xff] }
 0x3cd   : > { %625 = vmatprep.subr.mxu0 %v5258_v4 }
 0x3d0   : > { %3726 = vmatpush1.msk.msra.mxu0 %vm399_vm8, %v5260_v45 }
 0x3d1   : > { %642 = vmatmul.mubr.f32.vlgmr.msra.gmra.mrb[4].mxu0 %v508_v46  ;;  %4588 = vmatprep.subr.bf16.mxu0 %v4587_v6  ;;  %v750_v46 = vld [vmem:[#allocation5 + $0xc8] sm:$0xff]  ;;  %v735_v6 = vld [vmem:[#allocation5 + $0x50] sm:$0xff] }
 0x3d2   : > { %3728 = vmatprep.mubr.msk.f32.mxu0 %vm564_vm9, %v511_v47  ;;  %v781_v47 = vld [vmem:[#allocation5 + $0x1c0] sm:$0xff] }
 0x3d5   : > { %647 = vmatmul.mubr.f32.gmra.mrb[6].mxu0 %v510_v48  ;;  %v782_v48 = vld [vmem:[#allocation5 + $0x1c8] sm:$0xff] }
 0x3d6   : > { %3729 = vmatprep.mubr.msk.f32.mxu0 %vm564_vm9, %v513_v49  ;;  %v4569_v49 = vpack.c.bf16 %v732_v41, %v731_v40  ;;  %v755_v40 = vld [vmem:[#allocation5 + $0xf0] sm:$0xff]  ;;  %v756_v41 = vld [vmem:[#allocation5 + $0xf8] sm:$0xff] }
 0x3d7   : > { %4590 = vmatpush3.bf16.xpose.msra.mxu0 %v4589_v11  ;;  %v4577_v11 = vpack.c.bf16 %v736_v8, %v735_v6 }
 0x3d8   : > { %4592 = vmatprep.subr.bf16.mxu0 %v4591_v18  ;;  %4570 = vmatpush3.bf16.xpose.msra.mxu1 %v4569_v49  ;;  %v771_v49 = vld [vmem:[#allocation5 + $0x170] sm:$0xff] }
 0x3d9   : > { %652 = vmatmul.mubr.f32.gmra.mrb[8].mxu0 %v512_v7  ;;  %v4601_v7 = vpack.c.bf16 %v764_v43, %v763_v42  ;;  %v4583_v42 = vpack.c.bf16 %v756_v41, %v755_v40  ;;  %v739_v43 = vld [vmem:[#allocation5 + $0x70] sm:$0xff]  ;;  %v793_v40 = vld [vmem:[#allocation5 + $0x220] sm:$0xff]  ;;  %v794_v41 = vld [vmem:[#allocation5 + $0x228] sm:$0xff] }
 0x3da   : > { %3730 = vmatprep.mubr.msk.f32.mxu0 %vm564_vm9, %v515_v50  ;;  %v4571_v50 = vpack.c.bf16 %v750_v46, %v749_v44  ;;  %v740_v44 = vld [vmem:[#allocation5 + $0x78] sm:$0xff]  ;;  %v787_v46 = vld [vmem:[#allocation5 + $0x1f0] sm:$0xff] }
 0x3dc   : > { %4572 = vmatprep.subr.bf16.mxu1 %v4571_v50 }
 0x3dd   : > { %657 = vmatmul.mubr.f32.gmra.mrb[10].mxu0 %v514_v51  ;;  %v4603_v51 = vpack.c.bf16 %v782_v48, %v781_v47  ;;  %v4585_v47 = vpack.c.bf16 %v740_v44, %v739_v43  ;;  %v788_v48 = vld [vmem:[#allocation5 + $0x1f8] sm:$0xff]  ;;  %v4629_v43 = vpack.c.bf16 %v794_v41, %v793_v40 }
 0x3de   : > { %v4615_v50 = vpack.c.bf16 %v788_v48, %v787_v46  ;;  %v795_v46 = vld [vmem:[#allocation5 + $0x230] sm:$0xff]  ;;  %v813_v48 = vld [vmem:[#allocation5 + $0x2c0] sm:$0xff] }
 0x3df   : > { %4594 = vmatpush3.bf16.xpose.msra.mxu0 %v4593_v26 }
 0x3e0   : > { %4596 = vmatprep.subr.bf16.mxu0 %v4595_v28 }
 0x3e7   : > { %4598 = vmatpush3.bf16.xpose.msra.mxu0 %v4597_v37  ;;  %v770_v37 = vld [vmem:[#allocation5 + $0x168] sm:$0xff] }
 0x3e8   : > { %4600 = vmatprep.subr.bf16.mxu0 %v4599_v39  ;;  %v4613_v39 = vpack.c.bf16 %v770_v37, %v769_v36  ;;  %v4627_v37 = vpack.c.bf16 %v810_v33, %v809_v32 }
 0x3ef   : > { %4602 = vmatpush3.bf16.xpose.msra.mxu0 %v4601_v7  ;;  %v772_v7 = vld [vmem:[#allocation5 + $0x178] sm:$0xff] }
 0x3f0   : > { %4604 = vmatprep.subr.bf16.mxu0 %v4603_v51  ;;  %v4617_v51 = vpack.c.bf16 %v772_v7, %v771_v49  ;;  %v814_v49 = vld [vmem:[#allocation5 + $0x2c8] sm:$0xff] }
 0x4a4   : > { %v5558_v52 = vpop.f32.mrb[4].mxu0 }
 0x4a5   : > { %664 = vadd.xlane.f32.xlu0 %v5558_v52  ;;  %v645_v45 = vpop.f32.mrb[5].mxu0 }
 0x4a6   : > { %v733_v45 = vld [vmem:[#allocation5 + $0x40] sm:$0xff] }
 0x4a8   : > { %v5561_v54 = vpop.f32.mrb[6].mxu0 }
 0x4a9   : > { %666 = vadd.xlane.f32.xlu1 %v5561_v54  ;;  %v650_v55 = vpop.f32.mrb[7].mxu0 }
 0x4aa   : > { %v734_v55 = vld [vmem:[#allocation5 + $0x48] sm:$0xff] }
 0x4ab   : > { %v4573_v0 = vpack.c.bf16 %v734_v55, %v733_v45  ;;  %v805_v45 = vld [vmem:[#allocation5 + $0x280] sm:$0xff]  ;;  %v806_v55 = vld [vmem:[#allocation5 + $0x288] sm:$0xff] }
 0x4ac   : > { %v5564_v56 = vpop.f32.mrb[8].mxu0 }
 0x4ad   : > { %668 = vadd.xlane.f32.xlu0 %v5564_v56  ;;  %v655_v57 = vpop.f32.mrb[9].mxu0  ;;  %4574 = vmatpush3.bf16.xpose.msra.mxu1 %v4573_v0 }
 0x4ae   : > { %v765_v57 = vld [vmem:[#allocation5 + $0x140] sm:$0xff]  ;;  %4576 = vmatprep.subr.bf16.mxu1 %v4575_v2 }
 0x4b0   : > { %v5567_v58 = vpop.f32.mrb[10].mxu0 }
 0x4b1   : > { %670 = vadd.xlane.f32.xlu0 %v5567_v58  ;;  %v660_v59 = vpop.f32.mrb[11].mxu0 }
 0x4b2   : > { %v766_v59 = vld [vmem:[#allocation5 + $0x148] sm:$0xff] }
 0x4b3   : > { %v4605_v1 = vpack.c.bf16 %v766_v59, %v765_v57  ;;  %v4619_v57 = vpack.c.bf16 %v806_v55, %v805_v45  ;;  %v798_v45 = vld [vmem:[#allocation5 + $0x248] sm:$0xff]  ;;  %v815_v55 = vld [vmem:[#allocation5 + $0x2d0] sm:$0xff] }
 0x4b5   : > { %4606 = vmatpush3.bf16.xpose.msra.mxu0 %v4605_v1  ;;  %4578 = vmatpush3.bf16.xpose.msra.mxu1 %v4577_v11 }
 0x4b6   : > { %4608 = vmatprep.subr.bf16.mxu0 %v4607_v3  ;;  %4580 = vmatprep.subr.bf16.mxu1 %v4579_v30  ;;  %v791_v30 = vld [vmem:[#allocation5 + $0x210] sm:$0xff] }
 0x4bd   : > { %4610 = vmatpush3.bf16.xpose.msra.mxu0 %v4609_v12  ;;  %4582 = vmatpush3.bf16.xpose.msra.mxu1 %v4581_v34 }
 0x4be   : > { %4612 = vmatprep.subr.bf16.mxu0 %v4611_v38  ;;  %4584 = vmatprep.subr.bf16.mxu1 %v4583_v42  ;;  %v811_v42 = vld [vmem:[#allocation5 + $0x2b0] sm:$0xff] }
 0x4c5   : > { %4614 = vmatpush3.bf16.xpose.msra.mxu0 %v4613_v39  ;;  %4586 = vmatpush3.bf16.xpose.msra.mxu1 %v4585_v47  ;;  %v796_v47 = vld [vmem:[#allocation5 + $0x238] sm:$0xff] }
 0x4c6   : > { %4616 = vmatprep.subr.bf16.mxu0 %v4615_v50  ;;  %4620 = vmatprep.subr.bf16.mxu1 %v4619_v57  ;;  %v4633_v7 = vpack.c.bf16 %v796_v47, %v795_v46  ;;  %v4635_v50 = vpack.c.bf16 %v814_v49, %v813_v48  ;;  %v816_v57 = vld [vmem:[#allocation5 + $0x2d8] sm:$0xff] }
 0x4cd   : > { %4618 = vmatpush3.bf16.xpose.msra.mxu0 %v4617_v51  ;;  %v797_v51 = vld [vmem:[#allocation5 + $0x240] sm:$0xff] }
 0x532   : > { %v665_v13 = vpop.xlane.xlu0 %664 }
 0x533   : > { %v673_v14 = vmul.f32 0.0078125, %v665_v13  ;;  %v3732_v13 = vld [vmem:[#allocation5 + $0x418] ss:$0 sm:$0xff] }
 0x535   : > { %v5571_v15 = vsub.f32 %v5558_v52, %v673_v14  ;;  %v789_v14 = vld [vmem:[#allocation5 + $0x200] sm:$0xff] }
 0x536   : > { %v667_v16 = vpop.xlane.xlu1 %666 }
 0x537   : > { %v674_v17 = vmul.f32 0.0078125, %v667_v16  ;;  %v681_v18 = vmul.f32 %v5571_v15, %v5571_v15  ;;  %v790_v16 = vld [vmem:[#allocation5 + $0x208] sm:$0xff] }
 0x539   : > { %v5576_v19 = vsub.f32 %v5561_v54, %v674_v17  ;;  %685 = vadd.xlane.f32.xlu1 %v681_v18  ;;  %v807_v18 = vld [vmem:[#allocation5 + $0x290] sm:$0xff] }
 0x53a   : > { %v669_v20 = vpop.xlane.xlu0 %668 }
 0x53b   : > { %v675_v21 = vmul.f32 0.0078125, %v669_v20  ;;  %v682_v22 = vmul.f32 %v5576_v19, %v5576_v19  ;;  %v808_v20 = vld [vmem:[#allocation5 + $0x298] sm:$0xff] }
 0x53d   : > { %v5581_v23 = vsub.f32 %v5564_v56, %v675_v21  ;;  %687 = vadd.xlane.f32.xlu0 %v682_v22 }
 0x53e   : > { %v671_v24 = vpop.xlane.xlu0 %670 }
 0x53f   : > { %v676_v25 = vmul.f32 0.0078125, %v671_v24  ;;  %v683_v26 = vmul.f32 %v5581_v23, %v5581_v23 }
 0x541   : > { %v5586_v27 = vsub.f32 %v5567_v58, %v676_v25  ;;  %689 = vadd.xlane.f32.xlu1 %v683_v26  ;;  %v4621_v25 = vpack.c.bf16 %v790_v16, %v789_v14  ;;  %v4623_v26 = vpack.c.bf16 %v808_v20, %v807_v18  ;;  %v3733_v16 = vld [vmem:[#allocation5 + $0x300] ss:$0 sm:$0xff] }
 0x543   : > { %v684_v28 = vmul.f32 %v5586_v27, %v5586_v27 }
 0x545   : > { %691 = vadd.xlane.f32.xlu0 %v684_v28 }
 0x5c6   : > { %v686_v59 = vpop.xlane.xlu1 %685 }
 0x5c7   : > { %v693_v60 = vmul.f32 0.0078125, %v686_v59  ;;  %v4637_v59 = vpack.c.bf16 %v798_v45, %v797_v51  ;;  %v3735_v51 = vld [vmem:[#allocation5 + $0x304] ss:$0 sm:$0xff]  ;;  %v3742_v45 = vld [vmem:[#allocation5 + $0x305] ss:$0 sm:$0xff] }
 0x5c9   : > { %v697_v61 = vadd.f32 1e-05, %v693_v60  ;;  %v4639_v60 = vpack.c.bf16 %v816_v57, %v815_v55 }
 0x5ca   : > { %v688_v62 = vpop.xlane.xlu0 %687 }
 0x5cb   : > { %4995 = vrsqrt.f32 %v697_v61  ;;  %v694_v63 = vmul.f32 0.0078125, %v688_v62  ;;  %v799_v61 = vld [vmem:[#allocation5 + $0x250] sm:$0xff]  ;;  %v800_v62 = vld [vmem:[#allocation5 + $0x258] sm:$0xff] }
 0x5cd   : > { %v698_v0 = vadd.f32 1e-05, %v694_v63  ;;  %v817_v63 = vld [vmem:[#allocation5 + $0x2e0] sm:$0xff] }
 0x5ce   : > { %v690_v1 = vpop.xlane.xlu1 %689 }
 0x5cf   : > { %4997 = vrsqrt.f32 %v698_v0  ;;  %v695_v2 = vmul.f32 0.0078125, %v690_v1  ;;  %v818_v0 = vld [vmem:[#allocation5 + $0x2e8] sm:$0xff]  ;;  %v4641_v1 = vpack.c.bf16 %v800_v62, %v799_v61 }
 0x5d1   : > { %v699_v3 = vadd.f32 1e-05, %v695_v2  ;;  %v4643_v2 = vpack.c.bf16 %v818_v0, %v817_v63 }
 0x5d2   : > { %v692_v6 = vpop.xlane.xlu0 %691 }
 0x5d3   : > { %4999 = vrsqrt.f32 %v699_v3  ;;  %v696_v8 = vmul.f32 0.0078125, %v692_v6  ;;  %v801_v3 = vld [vmem:[#allocation5 + $0x260] sm:$0xff]  ;;  %v802_v6 = vld [vmem:[#allocation5 + $0x268] sm:$0xff] }
 0x5d5   : > { %v4996_v9 = vpop.eup %4995  ;;  %v700_v11 = vadd.f32 1e-05, %v696_v8  ;;  %v819_v8 = vld [vmem:[#allocation5 + $0x2f0] sm:$0xff] }
 0x5d6   : > { %v705_v12 = vmul.f32 %v4996_v9, %v5571_v15  ;;  %v820_v9 = vld [vmem:[#allocation5 + $0x2f8] sm:$0xff] }
 0x5d7   : > { %5001 = vrsqrt.f32 %v700_v11  ;;  %v4647_v11 = vpack.c.bf16 %v820_v9, %v819_v8 }
 0x5d8   : > { %v713_v17 = vmul.f32 %v3731_v10, %v705_v12  ;;  %v803_v12 = vld [vmem:[#allocation5 + $0x270] sm:$0xff] }
 0x5d9   : > { %v4998_v21 = vpop.eup %4997 }
 0x5da   : > { %v5591_v22 = vadd.f32 %v3732_v13, %v713_v17  ;;  %v706_v24 = vmul.f32 %v4998_v21, %v5576_v19  ;;  %v792_v19 = vld [vmem:[#allocation5 + $0x218] sm:$0xff] }
 0x5db   : > { %v4625_v36 = vpack.c.bf16 %v792_v19, %v791_v30 }
 0x5dc   : > { %v714_v28 = vmul.f32 %v3731_v10, %v706_v24  ;;  %3848 = vmatprep.mubr.f32.mxu1 %v5591_v22  ;;  %3888 = vmatprep.mubr.f32.mxu0 %v5591_v22 }
 0x5dd   : > { %v5000_v15 = vpop.eup %4999  ;;  %3849 = vmatmul.mubr.f32.vlgmr.msra.gmra.mrb[8].mxu1 %v5591_v22  ;;  %3889 = vmatmul.mubr.f32.vlgmr.msra.gmra.mrb[12].mxu0 %v5591_v22 }
 0x5de   : > { %v5598_v29 = vadd.f32 %v3732_v13, %v714_v28  ;;  %v707_v5 = vmul.f32 %v5000_v15, %v5581_v23  ;;  %4622 = vmatpush3.bf16.xpose.msra.mxu1 %v4621_v25  ;;  %v3734_v25 = vld [vmem:[#allocation5 + $0x302] ss:$0 sm:$0xff] }
 0x5df   : > { %4624 = vmatprep.subr.bf16.mxu1 %v4623_v26  ;;  %v3741_v26 = vld [vmem:[#allocation5 + $0x303] ss:$0 sm:$0xff] }
 0x5e0   : > { %v715_v31 = vmul.f32 %v3731_v10, %v707_v5  ;;  %3850 = vmatprep.mubr.f32.mxu1 %v5598_v29  ;;  %3890 = vmatprep.mubr.f32.mxu0 %v5598_v29 }
 0x5e1   : > { %v5002_v34 = vpop.eup %5001  ;;  %3851 = vmatmul.mubr.f32.gmra.mrb[10].mxu1 %v5598_v29  ;;  %3891 = vmatmul.mubr.f32.gmra.mrb[14].mxu0 %v5598_v29 }
 0x5e2   : > { %v5605_v35 = vadd.f32 %v3732_v13, %v715_v31  ;;  %v708_v23 = vmul.f32 %v5002_v34, %v5586_v27  ;;  %v812_v27 = vld [vmem:[#allocation5 + $0x2b8] sm:$0xff] }
 0x5e3   : > { %v4631_v44 = vpack.c.bf16 %v812_v27, %v811_v42 }
 0x5e4   : > { %v716_v38 = vmul.f32 %v3731_v10, %v708_v23  ;;  %3852 = vmatprep.mubr.f32.mxu1 %v5605_v35  ;;  %3892 = vmatprep.mubr.f32.mxu0 %v5605_v35  ;;  %v4645_v10 = vpack.c.bf16 %v802_v6, %v801_v3 }
 0x5e5   : > { %3853 = vmatmul.mubr.f32.gmra.mrb[12].mxu1 %v5605_v35  ;;  %3893 = vmatmul.mubr.f32.gmra.mrb[16].mxu0 %v5605_v35 }
 0x5e6   : > { %v724_v39 = vadd.f32 %v3732_v13, %v716_v38  ;;  %4626 = vmatpush3.bf16.xpose.msra.mxu1 %v4625_v36  ;;  %v804_v13 = vld [vmem:[#allocation5 + $0x278] sm:$0xff] }
 0x5e7   : > { %4628 = vmatprep.subr.bf16.mxu1 %v4627_v37  ;;  %v4649_v14 = vpack.c.bf16 %v804_v13, %v803_v12 }
 0x5e8   : > { %3854 = vmatprep.mubr.f32.mxu1 %v724_v39  ;;  %3894 = vmatprep.mubr.f32.mxu0 %v724_v39 }
 0x5e9   : > { %3855 = vmatmul.mubr.f32.gmra.mrb[14].mxu1 %v724_v39  ;;  %3895 = vmatmul.mubr.f32.gmra.mrb[18].mxu0 %v724_v39 }
 0x5ea   : > { %3928 = vmatprep.mubr.f32.mxu1 %v5591_v22 }
 0x5ee   : > { %4630 = vmatpush3.bf16.xpose.msra.mxu1 %v4629_v43 }
 0x5ef   : > { %4632 = vmatprep.subr.bf16.mxu1 %v4631_v44 }
 0x5f6   : > { %4634 = vmatpush3.bf16.xpose.msra.mxu1 %v4633_v7 }
 0x5f7   : > { %4636 = vmatprep.subr.bf16.mxu1 %v4635_v50 }
 0x5fe   : > { %4638 = vmatpush3.bf16.xpose.msra.mxu1 %v4637_v59 }
 0x5ff   : > { %4640 = vmatprep.subr.bf16.mxu1 %v4639_v60 }
 0x606   : > { %4642 = vmatpush3.bf16.xpose.msra.mxu1 %v4641_v1 }
 0x607   : > { %4644 = vmatprep.subr.bf16.mxu1 %v4643_v2 }
 0x60e   : > { %4646 = vmatpush3.bf16.xpose.msra.mxu1 %v4645_v10 }
 0x60f   : > { %4648 = vmatprep.subr.bf16.mxu1 %v4647_v11 }
 0x616   : > { %4650 = vmatpush3.bf16.xpose.msra.mxu1 %v4649_v14 }
 0x61d   : > { %3929 = vmatmul.mubr.f32.vlgmr.msra.gmra.mrb[16].mxu1 %v5591_v22 }
 0x61e   : > { %3930 = vmatprep.mubr.f32.mxu1 %v5598_v29 }
 0x621   : > { %3931 = vmatmul.mubr.f32.gmra.mrb[18].mxu1 %v5598_v29 }
 0x622   : > { %3932 = vmatprep.mubr.f32.mxu1 %v5605_v35 }
 0x625   : > { %3933 = vmatmul.mubr.f32.gmra.mrb[20].mxu1 %v5605_v35 }
 0x626   : > { %3934 = vmatprep.mubr.f32.mxu1 %v724_v39 }
 0x629   : > { %3935 = vmatmul.mubr.f32.gmra.mrb[22].mxu1 %v724_v39 }
 0x6b0   : > { %v887_v17 = vpop.f32.mrb[8].mxu1  ;;  %v976_v18 = vpop.f32.mrb[12].mxu0 }
 0x6b1   : > { %v1093_v20 = vadd.f32 %v3733_v16, %v887_v17  ;;  %v5618_v21 = vpop.f32.mrb[9].mxu1  ;;  %v978_v24 = vpop.f32.mrb[13].mxu0  ;;  %v1102_v15 = vadd.f32 %v3734_v25, %v976_v18 }
 0x6b2   : > { %v1360_v19 = vadd.f32 %v3741_v26, %v978_v24 }
 0x6b3   : > { %4306 = vmatprep.mubr.f32.mxu0 %v1093_v20 }
 0x6b4   : > { %v893_v22 = vpop.f32.mrb[10].mxu1  ;;  %v982_v28 = vpop.f32.mrb[14].mxu0 }
 0x6b5   : > { %v1103_v29 = vadd.f32 %v3734_v25, %v982_v28  ;;  %v5620_v5 = vpop.f32.mrb[11].mxu1  ;;  %v984_v30 = vpop.f32.mrb[15].mxu0  ;;  %v1094_v47 = vadd.f32 %v3733_v16, %v893_v22 }
 0x6b6   : > { %v1361_v31 = vadd.f32 %v3741_v26, %v984_v30 }
 0x6b7   : > { %v4651_v32 = vpack.c.bf16 %v1103_v29, %v1102_v15 }
 0x6b8   : > { %v5622_v33 = vpack.c.bf16 %v1361_v31, %v1360_v19  ;;  %v899_v34 = vpop.f32.mrb[12].mxu1  ;;  %v988_v35 = vpop.f32.mrb[16].mxu0 }
 0x6b9   : > { %v5624_v23 = vpop.f32.mrb[13].mxu1  ;;  %v990_v36 = vpop.f32.mrb[17].mxu0  ;;  %4652 = vmatprep.subr.bf16.mxu0 %v4651_v32  ;;  %v1104_v40 = vadd.f32 %v3734_v25, %v988_v35  ;;  %v1095_v48 = vadd.f32 %v3733_v16, %v899_v34 }
 0x6ba   : > { %v1362_v37 = vadd.f32 %v3741_v26, %v990_v36  ;;  %4654 = vmatpush3.bf16.xpose.msra.mxu0 %v4651_v32 }
 0x6bc   : > { %v905_v38 = vpop.f32.mrb[14].mxu1  ;;  %v994_v39 = vpop.f32.mrb[18].mxu0 }
 0x6bd   : > { %v1105_v41 = vadd.f32 %v3734_v25, %v994_v39  ;;  %v5626_v42 = vpop.f32.mrb[15].mxu1  ;;  %v996_v27 = vpop.f32.mrb[19].mxu0  ;;  %v1096_v49 = vadd.f32 %v3733_v16, %v905_v38 }
 0x6be   : > { %v1363_v43 = vadd.f32 %v3741_v26, %v996_v27 }
 0x6bf   : > { %v4655_v44 = vpack.c.bf16 %v1105_v41, %v1104_v40 }
 0x6c0   : > { %v5628_v46 = vpack.c.bf16 %v1363_v43, %v1362_v37 }
 0x6c1   : > { %4656 = vmatprep.subr.bf16.mxu0 %v4655_v44 }
 0x6c2   : > { %4658 = vmatpush3.bf16.xpose.msra.mxu0 %v4655_v44 }
 0x6c9   : > { %4307 = vmatmul.mubr.f32.vlgmr.msra.gmra.mrb[20].mxu0 %v1094_v47 }
 0x6ca   : > { %4309 = vmatprep.mubr.f32.mxu0 %v1095_v48 }
 0x6cd   : > { %4310 = vmatmul.mubr.f32.gmra.mrb[22].mxu0 %v1096_v49 }
 0x6f0   : > { %v1065_v7 = vpop.f32.mrb[16].mxu1 }
 0x6f1   : > { %v1067_v50 = vpop.f32.mrb[17].mxu1  ;;  %v1111_v57 = vadd.f32 %v3735_v51, %v1065_v7 }
 0x6f2   : > { %v1369_v61 = vadd.f32 %v3742_v45, %v1067_v50 }
 0x6f4   : > { %v1071_v55 = vpop.f32.mrb[18].mxu1 }
 0x6f5   : > { %v1112_v59 = vadd.f32 %v3735_v51, %v1071_v55  ;;  %v1073_v60 = vpop.f32.mrb[19].mxu1 }
 0x6f6   : > { %v1370_v62 = vadd.f32 %v3742_v45, %v1073_v60 }
 0x6f7   : > { %v4659_v63 = vpack.c.bf16 %v1112_v59, %v1111_v57 }
 0x6f8   : > { %v5630_v0 = vpack.c.bf16 %v1370_v62, %v1369_v61  ;;  %v1077_v1 = vpop.f32.mrb[20].mxu1 }
 0x6f9   : > { %v1079_v2 = vpop.f32.mrb[21].mxu1  ;;  %4660 = vmatprep.subr.bf16.mxu0 %v4659_v63  ;;  %v1113_v6 = vadd.f32 %v3735_v51, %v1077_v1 }
 0x6fa   : > { %4662 = vmatpush3.bf16.msra.mxu0 %v4659_v63  ;;  %v1371_v10 = vadd.f32 %v3742_v45, %v1079_v2  ;;  %v3740_v2 = vld [vmem:[#allocation5 + $0x301] ss:$0 sm:$0xff] }
 0x6fc   : > { %v1083_v3 = vpop.f32.mrb[22].mxu1 }
 0x6fd   : > { %v1114_v8 = vadd.f32 %v3735_v51, %v1083_v3  ;;  %v1085_v9 = vpop.f32.mrb[23].mxu1 }
 0x6fe   : > { %v1372_v11 = vadd.f32 %v3742_v45, %v1085_v9  ;;  %v1352_v9 = vadd.f32 %v3740_v2, %v5620_v5 }
 0x6ff   : > { %v4663_v12 = vpack.c.bf16 %v1114_v8, %v1113_v6  ;;  %v1351_v8 = vadd.f32 %v3740_v2, %v5618_v21 }
 0x700   : > { %v5632_v13 = vpack.c.bf16 %v1372_v11, %v1371_v10  ;;  %v1353_v10 = vadd.f32 %v3740_v2, %v5624_v23 }
 0x701   : > { %4664 = vmatprep.subr.bf16.mxu0 %v4663_v12 }
 0x702   : > { %4666 = vmatpush3.bf16.msra.mxu0 %v4663_v12 }
 0x703   : > { %4668 = vmatprep.subr.bf16.mxu0 %v5622_v33 }
 0x79c   : > { %v4308_v14 = vpop.f32.mrb[20].mxu0 }
 0x79d   : > { %v1201_v16 = vmul.f32 0.125, %v4308_v14  ;;  %v1181_v17 = vpop.f32.mrb[21].mxu0 }
 0x79e   : > { %v1200_v18 = vmul.f32 0.125, %v1181_v17 }
 0x79f   : > { %v1208_v20 = vsel %vm1204_vm10, %v1201_v16, -inf }
 0x7a0   : > { %1209 = vmax.xlane.f32.xlu0 %v1208_v20  ;;  %v4311_v24 = vpop.f32.mrb[22].mxu0  ;;  %v1205_v25 = vsel %vm1204_vm10, %v1200_v18, -inf }
 0x7a1   : > { %v1203_v26 = vmul.f32 0.125, %v4311_v24  ;;  %1206 = vmax.xlane.f32.xlu1 %v1205_v25  ;;  %v1191_v22 = vpop.f32.mrb[23].mxu0 }
 0x7a2   : > { %v1202_v28 = vmul.f32 0.125, %v1191_v22 }
 0x7a3   : > { %v1214_v15 = vsel %vm1204_vm10, %v1203_v26, -inf }
 0x7a4   : > { %1215 = vmax.xlane.f32.xlu0 %v1214_v15  ;;  %v1211_v29 = vsel %vm1204_vm10, %v1202_v28, -inf }
 0x7a5   : > { %1212 = vmax.xlane.f32.xlu1 %v1211_v29 }
 0x82d   : > { %v1210_v30 = vpop.xlane.xlu0 %1209 }
 0x82e   : > { %v1218_v19 = vsub.f32 %v1201_v16, %v1210_v30  ;;  %v1207_v31 = vpop.xlane.xlu1 %1206 }
 0x82f   : > { %v1217_v32 = vsub.f32 %v1200_v18, %v1207_v31 }
 0x830   : > { %v1223_v34 = vmul.f32 1.442695, %v1218_v19 }
 0x831   : > { %v1221_v35 = vmul.f32 1.442695, %v1217_v32  ;;  %v1216_v36 = vpop.xlane.xlu0 %1215 }
 0x832   : > { %5003 = vpow2.f32 %v1223_v34  ;;  %v1220_v37 = vsub.f32 %v1203_v26, %v1216_v36  ;;  %v1213_v38 = vpop.xlane.xlu1 %1212 }
 0x833   : > { %5005 = vpow2.f32 %v1221_v35  ;;  %v1219_v39 = vsub.f32 %v1202_v28, %v1213_v38 }
 0x834   : > { %v1227_v40 = vmul.f32 1.442695, %v1220_v37 }
 0x835   : > { %v1225_v41 = vmul.f32 1.442695, %v1219_v39 }
 0x836   : > { %5007 = vpow2.f32 %v1227_v40 }
 0x837   : > { %5009 = vpow2.f32 %v1225_v41 }
 0x83c   : > { %v5004_v27 = vpop.eup %5003 }
 0x83d   : > { %v5006_v43 = vpop.eup %5005  ;;  %v1232_v44 = vsel %vm1204_vm10, %v5004_v27, 0.0 }
 0x83e   : > { %1233 = vadd.xlane.f32.xlu0 %v1232_v44  ;;  %v1229_v47 = vsel %vm1204_vm10, %v5006_v43, 0.0 }
 0x83f   : > { %1230 = vadd.xlane.f32.xlu1 %v1229_v47  ;;  %v1619_v47 = vld [vmem:[#allocation5 + $0x388] sm:$0xff] }
 0x840   : > { %v5008_v48 = vpop.eup %5007 }
 0x841   : > { %v5010_v49 = vpop.eup %5009  ;;  %v1238_v7 = vsel %vm1204_vm10, %v5008_v48, 0.0 }
 0x842   : > { %1239 = vadd.xlane.f32.xlu0 %v1238_v7  ;;  %v1235_v50 = vsel %vm1204_vm10, %v5010_v49, 0.0 }
 0x843   : > { %1236 = vadd.xlane.f32.xlu1 %v1235_v50  ;;  %v1604_v50 = vld [vmem:[#allocation5 + $0x310] sm:$0xff] }
 0x8cb   : > { %v1234_v51 = vpop.xlane.xlu0 %1233 }
 0x8cc   : > { %5011 = vrcp.f32 %v1234_v51  ;;  %v1231_v45 = vpop.xlane.xlu1 %1230  ;;  %v1621_v51 = vld [vmem:[#allocation5 + $0x398] sm:$0xff] }
 0x8cd   : > { %5013 = vrcp.f32 %v1231_v45  ;;  %v1622_v45 = vld [vmem:[#allocation5 + $0x3a0] sm:$0xff] }
 0x8cf   : > { %v1240_v55 = vpop.xlane.xlu0 %1239 }
 0x8d0   : > { %5015 = vrcp.f32 %v1240_v55  ;;  %v1237_v57 = vpop.xlane.xlu1 %1236 }
 0x8d1   : > { %5017 = vrcp.f32 %v1237_v57  ;;  %v4687_v57 = vpack.c.bf16 %v1622_v45, %v1621_v51 }
 0x8d6   : > { %v5012_v59 = vpop.eup %5011 }
 0x8d7   : > { %v5014_v60 = vpop.eup %5013  ;;  %v1246_v62 = vmul.f32 %v5012_v59, %v5004_v27  ;;  %v1605_v59 = vld [vmem:[#allocation5 + $0x318] sm:$0xff] }
 0x8d8   : > { %v1245_v61 = vmul.f32 %v5014_v60, %v5006_v43  ;;  %v1606_v60 = vld [vmem:[#allocation5 + $0x320] sm:$0xff] }
 0x8da   : > { %v5016_v63 = vpop.eup %5015  ;;  %4320 = vmatprep.mubr.msk.f32.mxu0 %vm1204_vm10, %v1245_v61  ;;  %v1623_v61 = vld [vmem:[#allocation5 + $0x3a8] sm:$0xff] }
 0x8db   : > { %v5018_v1 = vpop.eup %5017  ;;  %4321 = vmatmul.mubr.msk.f32.vlgmr.msra.gmra.mrb[24].mxu0 %vm1204_vm10, %v1246_v62  ;;  %v1248_v6 = vmul.f32 %v5016_v63, %v5008_v48  ;;  %v1620_v48 = vld [vmem:[#allocation5 + $0x390] sm:$0xff]  ;;  %v4689_v63 = vpack.c.bf16 %v1606_v60, %v1605_v59 }
 0x8dc   : > { %4670 = vmatpush3.bf16.xpose.msra.mxu0 %v5622_v33  ;;  %v1247_v3 = vmul.f32 %v5018_v1, %v5010_v49  ;;  %v1354_v33 = vadd.f32 %v3740_v2, %v5626_v42  ;;  %v1603_v49 = vld [vmem:[#allocation5 + $0x308] sm:$0xff]  ;;  %v4683_v7 = vpack.c.bf16 %v1620_v48, %v1619_v47  ;;  %v1624_v62 = vld [vmem:[#allocation5 + $0x3b0] sm:$0xff] }
 0x8dd   : > { %4672 = vmatprep.subr.bf16.mxu0 %v5628_v46  ;;  %v4685_v55 = vpack.c.bf16 %v1604_v50, %v1603_v49  ;;  %v4691_v1 = vpack.c.bf16 %v1624_v62, %v1623_v61  ;;  %v1607_v2 = vld [vmem:[#allocation5 + $0x328] sm:$0xff] }
 0x8de   : > { %4323 = vmatprep.mubr.msk.f32.mxu0 %vm1204_vm10, %v1247_v3  ;;  %4684 = vmatprep.subr.bf16.mxu1 %v4683_v7  ;;  %v1608_v3 = vld [vmem:[#allocation5 + $0x330] sm:$0xff] }
 0x8df   : > { %4324 = vmatmul.mubr.msk.f32.gmra.mrb[26].mxu0 %vm1204_vm10, %v1248_v6  ;;  %4686 = vmatpush3.bf16.msra.mxu1 %v4685_v55  ;;  %v1625_v6 = vld [vmem:[#allocation5 + $0x3b8] sm:$0xff] }
 0x8e0   : > { %4334 = vmatprep.mubr.f32.mxu0 %v1351_v8  ;;  %4688 = vmatprep.subr.bf16.mxu1 %v4687_v57  ;;  %v1626_v8 = vld [vmem:[#allocation5 + $0x3c0] sm:$0xff]  ;;  %v1617_v55 = vld [vmem:[#allocation5 + $0x378] sm:$0xff] }
 0x8e1   : > { %v1618_v57 = vld [vmem:[#allocation5 + $0x380] sm:$0xff] }
 0x8e2   : > { %v4713_v59 = vpack.c.bf16 %v1618_v57, %v1617_v55 }
 0x8e3   : > { %4690 = vmatpush3.bf16.msra.mxu1 %v4689_v63  ;;  %v3747_v63 = vld [vmem:[#allocation5 + $0x408] ss:$0 sm:$0xff] }
 0x8e4   : > { %4674 = vmatpush3.bf16.xpose.msra.mxu0 %v5628_v46  ;;  %4692 = vmatprep.subr.bf16.mxu1 %v4691_v1 }
 0x8e5   : > { %4676 = vmatprep.subr.bf16.mxu0 %v5630_v0 }
 0x8eb   : > { %4335 = vmatmul.mubr.f32.vlgmr.msra.gmra.mrb[28].mxu0 %v1352_v9  ;;  %v4693_v9 = vpack.c.bf16 %v1608_v3, %v1607_v2 }
 0x8ec   : > { %4337 = vmatprep.mubr.f32.mxu0 %v1353_v10  ;;  %4678 = vmatpush3.bf16.msra.mxu0 %v5630_v0  ;;  %v4695_v10 = vpack.c.bf16 %v1626_v8, %v1625_v6 }
 0x8ed   : > { %4680 = vmatprep.subr.bf16.mxu0 %v5632_v13  ;;  %4694 = vmatpush3.bf16.msra.mxu1 %v4693_v9 }
 0x8ee   : > { %4696 = vmatprep.subr.bf16.mxu1 %v4695_v10 }
 0x8ef   : > { %4338 = vmatmul.mubr.f32.gmra.mrb[30].mxu0 %v1354_v33  ;;  %v1609_v33 = vld [vmem:[#allocation5 + $0x338] sm:$0xff] }
 0x8f0   : > { %4682 = vmatpush3.bf16.msra.mxu0 %v5632_v13 }
 0x9ae   : > { %v5658_v21 = vpop.f32.mrb[24].mxu0 }
 0x9af   : > { %v5660_v46 = vpop.f32.mrb[25].mxu0 }
 0x9b2   : > { %v5662_v11 = vpop.f32.mrb[26].mxu0 }
 0x9b3   : > { %v5664_v5 = vpop.f32.mrb[27].mxu0 }
 0x9be   : > { %v4336_v23 = vpop.f32.mrb[28].mxu0 }
 0x9bf   : > { %v1459_v12 = vmul.f32 0.125, %v4336_v23  ;;  %v1439_v14 = vpop.f32.mrb[29].mxu0  ;;  %v1610_v23 = vld [vmem:[#allocation5 + $0x340] sm:$0xff] }
 0x9c0   : > { %v1458_v16 = vmul.f32 0.125, %v1439_v14  ;;  %v1628_v14 = vld [vmem:[#allocation5 + $0x3d0] sm:$0xff] }
 0x9c1   : > { %v1465_v0 = vsel %vm1204_vm10, %v1459_v12, -inf }
 0x9c2   : > { %1466 = vmax.xlane.f32.xlu0 %v1465_v0  ;;  %v4339_v42 = vpop.f32.mrb[30].mxu0  ;;  %v1462_v17 = vsel %vm1204_vm10, %v1458_v16, -inf }
 0x9c3   : > { %v1461_v18 = vmul.f32 0.125, %v4339_v42  ;;  %1463 = vmax.xlane.f32.xlu1 %v1462_v17  ;;  %v1449_v13 = vpop.f32.mrb[31].mxu0  ;;  %v1611_v42 = vld [vmem:[#allocation5 + $0x348] sm:$0xff]  ;;  %v1612_v17 = vld [vmem:[#allocation5 + $0x350] sm:$0xff] }
 0x9c4   : > { %v1460_v20 = vmul.f32 0.125, %v1449_v13  ;;  %v1630_v13 = vld [vmem:[#allocation5 + $0x3e0] sm:$0xff] }
 0x9c5   : > { %v1471_v24 = vsel %vm1204_vm10, %v1461_v18, -inf }
 0x9c6   : > { %1472 = vmax.xlane.f32.xlu0 %v1471_v24  ;;  %v1468_v25 = vsel %vm1204_vm10, %v1460_v20, -inf }
 0x9c7   : > { %1469 = vmax.xlane.f32.xlu1 %v1468_v25  ;;  %v1613_v25 = vld [vmem:[#allocation5 + $0x358] sm:$0xff] }
 0xa4f   : > { %v1467_v26 = vpop.xlane.xlu0 %1466 }
 0xa50   : > { %v1475_v22 = vsub.f32 %v1459_v12, %v1467_v26  ;;  %v1464_v28 = vpop.xlane.xlu1 %1463  ;;  %v1627_v12 = vld [vmem:[#allocation5 + $0x3c8] sm:$0xff]  ;;  %v1614_v26 = vld [vmem:[#allocation5 + $0x360] sm:$0xff] }
 0xa51   : > { %v1474_v15 = vsub.f32 %v1458_v16, %v1464_v28  ;;  %v4697_v16 = vpack.c.bf16 %v1610_v23, %v1609_v33  ;;  %v4699_v0 = vpack.c.bf16 %v1628_v14, %v1627_v12  ;;  %v1632_v28 = vld [vmem:[#allocation5 + $0x3f0] sm:$0xff] }
 0xa52   : > { %v1480_v29 = vmul.f32 1.442695, %v1475_v22  ;;  %v1631_v22 = vld [vmem:[#allocation5 + $0x3e8] sm:$0xff] }
 0xa53   : > { %v1478_v30 = vmul.f32 1.442695, %v1474_v15  ;;  %v1473_v19 = vpop.xlane.xlu0 %1472  ;;  %4698 = vmatpush3.bf16.msra.mxu1 %v4697_v16  ;;  %v4705_v15 = vpack.c.bf16 %v1614_v26, %v1613_v25 }
 0xa54   : > { %5019 = vpow2.f32 %v1480_v29  ;;  %v1477_v31 = vsub.f32 %v1461_v18, %v1473_v19  ;;  %v1470_v32 = vpop.xlane.xlu1 %1469  ;;  %v1629_v18 = vld [vmem:[#allocation5 + $0x3d8] sm:$0xff]  ;;  %4700 = vmatprep.subr.bf16.mxu1 %v4699_v0  ;;  %v4707_v29 = vpack.c.bf16 %v1632_v28, %v1631_v22  ;;  %v1616_v19 = vld [vmem:[#allocation5 + $0x370] sm:$0xff] }
 0xa55   : > { %5021 = vpow2.f32 %v1478_v30  ;;  %v1476_v34 = vsub.f32 %v1460_v20, %v1470_v32  ;;  %v4701_v20 = vpack.c.bf16 %v1612_v17, %v1611_v42  ;;  %v4703_v24 = vpack.c.bf16 %v1630_v13, %v1629_v18  ;;  %v1615_v30 = vld [vmem:[#allocation5 + $0x368] sm:$0xff]  ;;  %v1634_v32 = vld [vmem:[#allocation5 + $0x400] sm:$0xff] }
 0xa56   : > { %v1484_v35 = vmul.f32 1.442695, %v1477_v31  ;;  %v1633_v31 = vld [vmem:[#allocation5 + $0x3f8] sm:$0xff] }
 0xa57   : > { %v1482_v36 = vmul.f32 1.442695, %v1476_v34  ;;  %4702 = vmatpush3.bf16.msra.mxu1 %v4701_v20  ;;  %v4709_v34 = vpack.c.bf16 %v1616_v19, %v1615_v30  ;;  %v1795_v30 = vld [vmem:[#allocation5 + $0x430] sm:$0xff]  ;;  %v1796_v19 = vld [vmem:[#allocation5 + $0x438] sm:$0xff] }
 0xa58   : > { %5023 = vpow2.f32 %v1484_v35  ;;  %4704 = vmatprep.subr.bf16.mxu1 %v4703_v24  ;;  %v4711_v35 = vpack.c.bf16 %v1634_v32, %v1633_v31  ;;  %v4715_v31 = vpack.c.bf16 %v1796_v19, %v1795_v30  ;;  %v1797_v32 = vld [vmem:[#allocation5 + $0x440] sm:$0xff] }
 0xa59   : > { %5025 = vpow2.f32 %v1482_v36 }
 0xa5a   : > { %4716 = vmatprep.subr.bf16.mxu0 %v4715_v31 }
 0xa5b   : > { %4706 = vmatpush3.bf16.msra.mxu1 %v4705_v15 }
 0xa5c   : > { %4708 = vmatprep.subr.bf16.mxu1 %v4707_v29 }
 0xa5e   : > { %v5670_v37 = vpop.eup %5019 }
 0xa5f   : > { %v5672_v38 = vpop.eup %5021  ;;  %v1489_v39 = vsel %vm1204_vm10, %v5670_v37, 0.0  ;;  %4710 = vmatpush3.bf16.msra.mxu1 %v4709_v34  ;;  %v1798_v34 = vld [vmem:[#allocation5 + $0x448] sm:$0xff] }
 0xa60   : > { %1490 = vadd.xlane.f32.xlu0 %v1489_v39  ;;  %v1486_v40 = vsel %vm1204_vm10, %v5672_v38, 0.0  ;;  %4712 = vmatprep.subr.bf16.mxu1 %v4711_v35  ;;  %v4719_v35 = vpack.c.bf16 %v1798_v34, %v1797_v32 }
 0xa61   : > { %1487 = vadd.xlane.f32.xlu1 %v1486_v40 }
 0xa62   : > { %v5678_v41 = vpop.eup %5023 }
 0xa63   : > { %v5680_v27 = vpop.eup %5025  ;;  %v1495_v43 = vsel %vm1204_vm10, %v5678_v41, 0.0  ;;  %4714 = vmatpush3.bf16.msra.mxu1 %v4713_v59 }
 0xa64   : > { %1496 = vadd.xlane.f32.xlu0 %v1495_v43  ;;  %v1492_v44 = vsel %vm1204_vm10, %v5680_v27, 0.0 }
 0xa65   : > { %1493 = vadd.xlane.f32.xlu1 %v1492_v44 }
 0xaed   : > { %v1491_v36 = vpop.xlane.xlu0 %1490 }
 0xaee   : > { %5027 = vrcp.f32 %v1491_v36  ;;  %v1488_v39 = vpop.xlane.xlu1 %1487  ;;  %v1893_v36 = vld [vmem:[#allocation5 + $0x458] sm:$0xff] }
 0xaef   : > { %5029 = vrcp.f32 %v1488_v39  ;;  %v1894_v39 = vld [vmem:[#allocation5 + $0x460] sm:$0xff] }
 0xaf1   : > { %v1497_v40 = vpop.xlane.xlu0 %1496 }
 0xaf2   : > { %5031 = vrcp.f32 %v1497_v40  ;;  %v1494_v43 = vpop.xlane.xlu1 %1493  ;;  %v4723_v40 = vpack.c.bf16 %v1894_v39, %v1893_v36 }
 0xaf3   : > { %5033 = vrcp.f32 %v1494_v43 }
 0xaf8   : > { %v5028_v44 = vpop.eup %5027 }
 0xaf9   : > { %v5030_v47 = vpop.eup %5029  ;;  %v1503_v49 = vmul.f32 %v5028_v44, %v5670_v37 }
 0xafa   : > { %v1502_v48 = vmul.f32 %v5030_v47, %v5672_v38 }
 0xafc   : > { %v5032_v7 = vpop.eup %5031  ;;  %4348 = vmatprep.mubr.msk.f32.mxu0 %vm1204_vm10, %v1502_v48 }
 0xafd   : > { %v5034_v50 = vpop.eup %5033  ;;  %4349 = vmatmul.mubr.msk.f32.vlgmr.msra.gmra.mrb[32].mxu0 %vm1204_vm10, %v1503_v49  ;;  %v1505_v45 = vmul.f32 %v5032_v7, %v5678_v41 }
 0xafe   : > { %v1504_v51 = vmul.f32 %v5034_v50, %v5680_v27  ;;  %4718 = vmatpush3.bf16.xpose.msra.mxu0 %v4715_v31 }
 0xaff   : > { %4720 = vmatprep.subr.bf16.mxu0 %v4719_v35 }
 0xb00   : > { %4351 = vmatprep.mubr.msk.f32.mxu0 %vm1204_vm10, %v1504_v51 }
 0xb01   : > { %4352 = vmatmul.mubr.msk.f32.gmra.mrb[34].mxu0 %vm1204_vm10, %v1505_v45 }
 0xb06   : > { %4722 = vmatpush3.bf16.xpose.msra.mxu0 %v4719_v35 }
 0xb07   : > { %4724 = vmatprep.subr.bf16.mxu0 %v4723_v40 }
 0xbd0   : > { %v4350_v38 = vpop.f32.mrb[32].mxu0 }
 0xbd1   : > { %v1584_v37 = vpop.f32.mrb[33].mxu0 }
 0xbd2   : > { %1699 = vmatprep.mubr.f32.mxu1 %v1584_v37  ;;  %v3748_v37 = vld [vmem:[#allocation5 + $0x420] ss:$0 sm:$0xff] }
 0xbd3   : > { %1700 = vmatmul.mubr.f32.vlgmr.msra.gmra.mrb[24].mxu1 %v5660_v46 }
 0xbd4   : > { %v4353_v60 = vpop.f32.mrb[34].mxu0  ;;  %1704 = vmatprep.mubr.f32.mxu1 %v4350_v38 }
 0xbd5   : > { %v1594_v61 = vpop.f32.mrb[35].mxu0 }
 0xbd7   : > { %1705 = vmatmul.mubr.f32.gmra.mrb[26].mxu1 %v5658_v21 }
 0xbd8   : > { %1709 = vmatprep.mubr.f32.mxu1 %v1594_v61  ;;  %v3749_v61 = vld [vmem:[#allocation5 + $0x428] ss:$0 sm:$0xff] }
 0xbdb   : > { %1710 = vmatmul.mubr.f32.gmra.mrb[28].mxu1 %v5664_v5 }
 0xbdc   : > { %1714 = vmatprep.mubr.f32.mxu1 %v4353_v60 }
 0xbdf   : > { %1715 = vmatmul.mubr.f32.gmra.mrb[30].mxu1 %v5662_v11 }
 0xca6   : > { %v4000_v41 = vpop.f32.mrb[24].mxu1 }
 0xca7   : > { %v4001_v27 = vpop.f32.mrb[25].mxu1 }
 0xca8   : > { %v4002_v62 = vadd.f32 %v4001_v27, %v4000_v41 }
 0xcaa   : > { %v1720_v1 = vadd.f32 %v4002_v62, %v5558_v52  ;;  %v4003_v2 = vpop.f32.mrb[26].mxu1 }
 0xcab   : > { %v4004_v3 = vpop.f32.mrb[27].mxu1 }
 0xcac   : > { %v4005_v46 = vadd.f32 %v4004_v3, %v4003_v2  ;;  %v5699_v6 = vadd.f32 %v3747_v63, %v1720_v1 }
 0xcae   : > { %v1721_v8 = vadd.f32 %v4005_v46, %v5561_v54  ;;  %1735 = vadd.xlane.f32.xlu1 %v5699_v6  ;;  %v4006_v21 = vpop.f32.mrb[28].mxu1 }
 0xcaf   : > { %v4007_v5 = vpop.f32.mrb[29].mxu1 }
 0xcb0   : > { %v4008_v9 = vadd.f32 %v4007_v5, %v4006_v21  ;;  %v5703_v10 = vadd.f32 %v3747_v63, %v1721_v8 }
 0xcb2   : > { %v1722_v11 = vadd.f32 %v4008_v9, %v5564_v56  ;;  %1737 = vadd.xlane.f32.xlu0 %v5703_v10  ;;  %v4009_v33 = vpop.f32.mrb[30].mxu1 }
 0xcb3   : > { %v4010_v52 = vpop.f32.mrb[31].mxu1 }
 0xcb4   : > { %v4011_v23 = vadd.f32 %v4010_v52, %v4009_v33  ;;  %v5707_v12 = vadd.f32 %v3747_v63, %v1722_v11  ;;  %v1895_v52 = vld [vmem:[#allocation5 + $0x468] sm:$0xff] }
 0xcb6   : > { %v1723_v14 = vadd.f32 %v4011_v23, %v5567_v58  ;;  %1739 = vadd.xlane.f32.xlu1 %v5707_v12  ;;  %v1896_v23 = vld [vmem:[#allocation5 + $0x470] sm:$0xff] }
 0xcb8   : > { %v5711_v54 = vadd.f32 %v3747_v63, %v1723_v14  ;;  %v4727_v14 = vpack.c.bf16 %v1896_v23, %v1895_v52  ;;  %v2106_v52 = vld [vmem:[#allocation5 + $0x5a8] sm:$0xff]  ;;  %v2091_v23 = vld [vmem:[#allocation5 + $0x530] sm:$0xff] }
 0xcba   : > { %1741 = vadd.xlane.f32.xlu0 %v5711_v54 }
 0xd3b   : > { %v1736_v16 = vpop.xlane.xlu1 %1735 }
 0xd3c   : > { %v1743_v0 = vmul.f32 0.0078125, %v1736_v16  ;;  %v3750_v16 = vld [vmem:[#allocation5 + $0x450] ss:$0 sm:$0xff] }
 0xd3e   : > { %v1747_v42 = vsub.f32 %v5699_v6, %v1743_v0 }
 0xd3f   : > { %v1738_v56 = vpop.xlane.xlu0 %1737 }
 0xd40   : > { %v1744_v17 = vmul.f32 0.0078125, %v1738_v56  ;;  %v1751_v18 = vmul.f32 %v1747_v42, %v1747_v42 }
 0xd42   : > { %v1748_v13 = vsub.f32 %v5703_v10, %v1744_v17  ;;  %1755 = vadd.xlane.f32.xlu1 %v1751_v18 }
 0xd43   : > { %v1740_v20 = vpop.xlane.xlu1 %1739 }
 0xd44   : > { %v1745_v24 = vmul.f32 0.0078125, %v1740_v20  ;;  %v1752_v25 = vmul.f32 %v1748_v13, %v1748_v13 }
 0xd46   : > { %v1749_v58 = vsub.f32 %v5707_v12, %v1745_v24  ;;  %1757 = vadd.xlane.f32.xlu0 %v1752_v25 }
 0xd47   : > { %v1742_v26 = vpop.xlane.xlu0 %1741 }
 0xd48   : > { %v1746_v22 = vmul.f32 0.0078125, %v1742_v26  ;;  %v1753_v28 = vmul.f32 %v1749_v58, %v1749_v58 }
 0xd4a   : > { %v1750_v15 = vsub.f32 %v5711_v54, %v1746_v22  ;;  %1759 = vadd.xlane.f32.xlu1 %v1753_v28 }
 0xd4c   : > { %v1754_v29 = vmul.f32 %v1750_v15, %v1750_v15 }
 0xd4e   : > { %1761 = vadd.xlane.f32.xlu0 %v1754_v29 }
 0xdcf   : > { %v1756_v43 = vpop.xlane.xlu1 %1755 }
 0xdd0   : > { %v1763_v44 = vmul.f32 0.0078125, %v1756_v43  ;;  %v2086_v43 = vld [vmem:[#allocation5 + $0x508] sm:$0xff] }
 0xdd2   : > { %v1767_v47 = vadd.f32 1e-05, %v1763_v44  ;;  %v2069_v44 = vld [vmem:[#allocation5 + $0x480] sm:$0xff] }
 0xdd3   : > { %v1758_v48 = vpop.xlane.xlu0 %1757 }
 0xdd4   : > { %5035 = vrsqrt.f32 %v1767_v47  ;;  %v1764_v49 = vmul.f32 0.0078125, %v1758_v48  ;;  %v2070_v48 = vld [vmem:[#allocation5 + $0x488] sm:$0xff] }
 0xdd6   : > { %v1768_v7 = vadd.f32 1e-05, %v1764_v49  ;;  %v2117_v49 = vld [vmem:[#allocation5 + $0x600] sm:$0xff] }
 0xdd7   : > { %v1760_v50 = vpop.xlane.xlu1 %1759 }
 0xdd8   : > { %5037 = vrsqrt.f32 %v1768_v7  ;;  %v1765_v51 = vmul.f32 0.0078125, %v1760_v50  ;;  %v2118_v7 = vld [vmem:[#allocation5 + $0x608] sm:$0xff]  ;;  %v4733_v50 = vpack.c.bf16 %v2070_v48, %v2069_v44  ;;  %v2127_v44 = vld [vmem:[#allocation5 + $0x650] sm:$0xff] }
 0xdda   : > { %v1769_v45 = vadd.f32 1e-05, %v1765_v51  ;;  %v2101_v51 = vld [vmem:[#allocation5 + $0x580] sm:$0xff] }
 0xddb   : > { %v1762_v55 = vpop.xlane.xlu0 %1761 }
 0xddc   : > { %5039 = vrsqrt.f32 %v1769_v45  ;;  %v1766_v57 = vmul.f32 0.0078125, %v1762_v55  ;;  %v2102_v45 = vld [vmem:[#allocation5 + $0x588] sm:$0xff] }
 0xddd   : > { %v4765_v55 = vpack.c.bf16 %v2102_v45, %v2101_v51  ;;  %v2080_v51 = vld [vmem:[#allocation5 + $0x4d8] sm:$0xff] }
 0xdde   : > { %v5036_v59 = vpop.eup %5035  ;;  %v1770_v38 = vadd.f32 1e-05, %v1766_v57  ;;  %v2088_v57 = vld [vmem:[#allocation5 + $0x518] sm:$0xff] }
 0xddf   : > { %v1775_v60 = vmul.f32 %v5036_v59, %v1747_v42 }
 0xde0   : > { %5041 = vrsqrt.f32 %v1770_v38  ;;  %v2119_v38 = vld [vmem:[#allocation5 + $0x610] sm:$0xff] }
 0xde1   : > { %v1783_v41 = vmul.f32 %v3748_v37, %v1775_v60  ;;  %v2071_v60 = vld [vmem:[#allocation5 + $0x490] sm:$0xff] }
 0xde2   : > { %v5038_v27 = vpop.eup %5037 }
 0xde3   : > { %v1776_v62 = vmul.f32 %v5038_v27, %v1748_v13  ;;  %v1791_v63 = vadd.f32 %v3749_v61, %v1783_v41  ;;  %v2103_v27 = vld [vmem:[#allocation5 + $0x590] sm:$0xff] }
 0xde5   : > { %4362 = vmatprep.mubr.f32.mxu0 %v1791_v63  ;;  %v1784_v1 = vmul.f32 %v3748_v37, %v1776_v62  ;;  %v2104_v62 = vld [vmem:[#allocation5 + $0x598] sm:$0xff]  ;;  %v2089_v63 = vld [vmem:[#allocation5 + $0x520] sm:$0xff] }
 0xde6   : > { %v5040_v2 = vpop.eup %5039 }
 0xde7   : > { %v1792_v3 = vadd.f32 %v3749_v61, %v1784_v1  ;;  %v1777_v46 = vmul.f32 %v5040_v2, %v1749_v58  ;;  %v2090_v1 = vld [vmem:[#allocation5 + $0x528] sm:$0xff]  ;;  %v2121_v2 = vld [vmem:[#allocation5 + $0x620] sm:$0xff] }
 0xde9   : > { %4363 = vmatmul.mubr.f32.vlgmr.msra.gmra.mrb[36].mxu0 %v1792_v3  ;;  %v1785_v8 = vmul.f32 %v3748_v37, %v1777_v46  ;;  %v2122_v3 = vld [vmem:[#allocation5 + $0x628] sm:$0xff] }
 0xdea   : > { %v5042_v21 = vpop.eup %5041  ;;  %4726 = vmatpush3.bf16.msra.mxu0 %v4723_v40 }
 0xdeb   : > { %v1793_v5 = vadd.f32 %v3749_v61, %v1785_v8  ;;  %v1778_v9 = vmul.f32 %v5042_v21, %v1750_v15  ;;  %4728 = vmatprep.subr.bf16.mxu0 %v4727_v14  ;;  %v3755_v15 = vld [vmem:[#allocation5 + $0x478] ss:$0 sm:$0xff]  ;;  %v4769_v8 = vpack.c.bf16 %v2104_v62, %v2103_v27  ;;  %v4739_v21 = vpack.c.bf16 %v2090_v1, %v2089_v63 }
 0xded   : > { %4365 = vmatprep.mubr.f32.mxu0 %v1793_v5  ;;  %v1786_v11 = vmul.f32 %v3748_v37, %v1778_v9  ;;  %v2120_v37 = vld [vmem:[#allocation5 + $0x618] sm:$0xff]  ;;  %v4771_v5 = vpack.c.bf16 %v2122_v3, %v2121_v2  ;;  %v2073_v9 = vld [vmem:[#allocation5 + $0x4a0] sm:$0xff] }
 0xdee   : > { %4730 = vmatpush3.bf16.msra.mxu0 %v4727_v14  ;;  %v4767_v41 = vpack.c.bf16 %v2120_v37, %v2119_v38  ;;  %v2092_v14 = vld [vmem:[#allocation5 + $0x538] sm:$0xff] }
 0xdef   : > { %v1794_v33 = vadd.f32 %v3749_v61, %v1786_v11  ;;  %v2072_v61 = vld [vmem:[#allocation5 + $0x498] sm:$0xff]  ;;  %v2074_v11 = vld [vmem:[#allocation5 + $0x4a8] sm:$0xff] }
 0xdf0   : > { %v4737_v46 = vpack.c.bf16 %v2072_v61, %v2071_v60 }
 0xdf1   : > { %4366 = vmatmul.mubr.f32.gmra.mrb[38].mxu0 %v1794_v33  ;;  %v2105_v33 = vld [vmem:[#allocation5 + $0x5a0] sm:$0xff] }
 0xebc   : > { %v4364_v0 = vpop.f32.mrb[36].mxu0 }
 0xebd   : > { %v1876_v42 = vadd.f32 %v4364_v0, %v3750_v16  ;;  %v1870_v56 = vpop.f32.mrb[37].mxu0  ;;  %v2124_v0 = vld [vmem:[#allocation5 + $0x638] sm:$0xff] }
 0xebe   : > { %v1871_v17 = vadd.f32 %v3750_v16, %v1870_v56  ;;  %v4773_v56 = vpack.c.bf16 %v2106_v52, %v2105_v33  ;;  %v2081_v52 = vld [vmem:[#allocation5 + $0x4e0] sm:$0xff] }
 0xebf   : > { %v1890_v13 = vmax.f32 %v1876_v42, 0.0  ;;  %v4741_v42 = vpack.c.bf16 %v2074_v11, %v2073_v9  ;;  %v2097_v9 = vld [vmem:[#allocation5 + $0x560] sm:$0xff]  ;;  %v2098_v11 = vld [vmem:[#allocation5 + $0x568] sm:$0xff] }
 0xec0   : > { %v1889_v18 = vmax.f32 %v1871_v17, 0.0  ;;  %v4743_v17 = vpack.c.bf16 %v2092_v14, %v2091_v23  ;;  %v4755_v33 = vpack.c.bf16 %v2098_v11, %v2097_v9  ;;  %v2082_v23 = vld [vmem:[#allocation5 + $0x4e8] sm:$0xff]  ;;  %v2129_v14 = vld [vmem:[#allocation5 + $0x660] sm:$0xff] }
 0xec2   : > { %4376 = vmatprep.mubr.msk.f32.mxu0 %vm1204_vm10, %v1889_v18 }
 0xec3   : > { %4377 = vmatmul.mubr.msk.f32.vlgmr.msra.gmra.mrb[40].mxu0 %vm1204_vm10, %v1890_v13  ;;  %v2075_v13 = vld [vmem:[#allocation5 + $0x4b0] sm:$0xff] }
 0xec4   : > { %v4367_v20 = vpop.f32.mrb[38].mxu0 }
 0xec5   : > { %v1886_v24 = vadd.f32 %v4367_v20, %v3750_v16  ;;  %v1880_v25 = vpop.f32.mrb[39].mxu0  ;;  %v2076_v20 = vld [vmem:[#allocation5 + $0x4b8] sm:$0xff] }
 0xec6   : > { %v1881_v58 = vadd.f32 %v3750_v16, %v1880_v25  ;;  %v2123_v16 = vld [vmem:[#allocation5 + $0x630] sm:$0xff]  ;;  %v2108_v25 = vld [vmem:[#allocation5 + $0x5b8] sm:$0xff] }
 0xec7   : > { %v1892_v22 = vmax.f32 %v1886_v24, 0.0  ;;  %v4775_v18 = vpack.c.bf16 %v2124_v0, %v2123_v16  ;;  %v2107_v24 = vld [vmem:[#allocation5 + $0x5b0] sm:$0xff]  ;;  %v4757_v16 = vpack.c.bf16 %v2082_v23, %v2081_v52  ;;  %v2130_v0 = vld [vmem:[#allocation5 + $0x668] sm:$0xff]  ;;  %v2136_v23 = vld [vmem:[#allocation5 + $0x698] sm:$0xff] }
 0xec8   : > { %v1891_v26 = vmax.f32 %v1881_v58, 0.0  ;;  %v2093_v58 = vld [vmem:[#allocation5 + $0x540] sm:$0xff]  ;;  %v2135_v52 = vld [vmem:[#allocation5 + $0x690] sm:$0xff] }
 0xeca   : > { %4379 = vmatprep.mubr.msk.f32.mxu0 %vm1204_vm10, %v1891_v26  ;;  %v2094_v26 = vld [vmem:[#allocation5 + $0x548] sm:$0xff] }
 0xecb   : > { %4380 = vmatmul.mubr.msk.f32.gmra.mrb[42].mxu0 %vm1204_vm10, %v1892_v22  ;;  %v2125_v22 = vld [vmem:[#allocation5 + $0x640] sm:$0xff] }
 0xf96   : > { %v4378_v28 = vpop.f32.mrb[40].mxu0 }
 0xf97   : > { %v1995_v29 = vadd.f32 %v4378_v28, %v5703_v10  ;;  %v1975_v30 = vpop.f32.mrb[41].mxu0  ;;  %v2126_v28 = vld [vmem:[#allocation5 + $0x648] sm:$0xff] }
 0xf98   : > { %v1994_v19 = vadd.f32 %v1975_v30, %v5699_v6  ;;  %v2085_v6 = vld [vmem:[#allocation5 + $0x500] sm:$0xff]  ;;  %v4747_v30 = vpack.c.bf16 %v2094_v26, %v2093_v58  ;;  %v2084_v58 = vld [vmem:[#allocation5 + $0x4f8] sm:$0xff]  ;;  %v2131_v26 = vld [vmem:[#allocation5 + $0x670] sm:$0xff] }
 0xf99   : > { %v5724_v31 = vadd.f32 %v3755_v15, %v1995_v29  ;;  %v4731_v47 = vpack.c.bf16 %v2086_v43, %v2085_v6  ;;  %v4777_v29 = vpack.c.bf16 %v2108_v25, %v2107_v24  ;;  %v2095_v6 = vld [vmem:[#allocation5 + $0x550] sm:$0xff]  ;;  %v2096_v43 = vld [vmem:[#allocation5 + $0x558] sm:$0xff] }
 0xf9a   : > { %v5726_v32 = vadd.f32 %v3755_v15, %v1994_v19  ;;  %v4779_v19 = vpack.c.bf16 %v2126_v28, %v2125_v22  ;;  %v2083_v25 = vld [vmem:[#allocation5 + $0x4f0] sm:$0xff]  ;;  %v2132_v28 = vld [vmem:[#allocation5 + $0x678] sm:$0xff] }
 0xf9b   : > { %2011 = vadd.xlane.f32.xlu0 %v5724_v31  ;;  %4732 = vmatprep.subr.bf16.mxu1 %v4731_v47  ;;  %v2128_v47 = vld [vmem:[#allocation5 + $0x658] sm:$0xff]  ;;  %v4761_v22 = vpack.c.bf16 %v2084_v58, %v2083_v25 }
 0xf9c   : > { %2009 = vadd.xlane.f32.xlu1 %v5726_v32  ;;  %4734 = vmatpush3.bf16.xpose.msra.mxu1 %v4733_v50  ;;  %v4783_v50 = vpack.c.bf16 %v2128_v47, %v2127_v44 }
 0xf9e   : > { %v4381_v34 = vpop.f32.mrb[42].mxu0 }
 0xf9f   : > { %v1997_v35 = vadd.f32 %v4381_v34, %v5711_v54  ;;  %v1985_v36 = vpop.f32.mrb[43].mxu0  ;;  %v4763_v54 = vpack.c.bf16 %v2118_v7, %v2117_v49  ;;  %v2077_v34 = vld [vmem:[#allocation5 + $0x4c0] sm:$0xff]  ;;  %v4751_v7 = vpack.c.bf16 %v2096_v43, %v2095_v6 }
 0xfa0   : > { %v1996_v39 = vadd.f32 %v1985_v36, %v5707_v12  ;;  %v2087_v12 = vld [vmem:[#allocation5 + $0x510] sm:$0xff]  ;;  %v2109_v36 = vld [vmem:[#allocation5 + $0x5c0] sm:$0xff] }
 0xfa1   : > { %v5732_v40 = vadd.f32 %v3755_v15, %v1997_v35  ;;  %4764 = vmatprep.subr.bf16.mxu0 %v4763_v54  ;;  %v4735_v59 = vpack.c.bf16 %v2088_v57, %v2087_v12  ;;  %v2078_v35 = vld [vmem:[#allocation5 + $0x4c8] sm:$0xff]  ;;  %v2079_v54 = vld [vmem:[#allocation5 + $0x4d0] sm:$0xff] }
 0xfa2   : > { %v5734_v10 = vadd.f32 %v3755_v15, %v1996_v39  ;;  %4766 = vmatpush3.bf16.xpose.msra.mxu0 %v4765_v55  ;;  %v4745_v15 = vpack.c.bf16 %v2076_v20, %v2075_v13  ;;  %v2110_v39 = vld [vmem:[#allocation5 + $0x5c8] sm:$0xff]  ;;  %v4749_v48 = vpack.c.bf16 %v2078_v35, %v2077_v34  ;;  %v4753_v45 = vpack.c.bf16 %v2080_v51, %v2079_v54  ;;  %v2099_v13 = vld [vmem:[#allocation5 + $0x570] sm:$0xff]  ;;  %v2100_v20 = vld [vmem:[#allocation5 + $0x578] sm:$0xff] }
 0xfa3   : > { %2015 = vadd.xlane.f32.xlu0 %v5732_v40  ;;  %4736 = vmatprep.subr.bf16.mxu1 %v4735_v59  ;;  %v4781_v49 = vpack.c.bf16 %v2110_v39, %v2109_v36  ;;  %v4759_v24 = vpack.c.bf16 %v2100_v20, %v2099_v13  ;;  %v2149_v34 = vld [vmem:[#allocation5 + $0x700] sm:$0xff]  ;;  %v2150_v35 = vld [vmem:[#allocation5 + $0x708] sm:$0xff]  ;;  %v2155_v20 = vld [vmem:[#allocation5 + $0x730] sm:$0xff] }
 0xfa4   : > { %2013 = vadd.xlane.f32.xlu1 %v5734_v10  ;;  %4768 = vmatprep.subr.bf16.mxu0 %v4767_v41  ;;  %v4795_v36 = vpack.c.bf16 %v2150_v35, %v2149_v34  ;;  %v2138_v13 = vld [vmem:[#allocation5 + $0x6a8] sm:$0xff]  ;;  %v2159_v35 = vld [vmem:[#allocation5 + $0x750] sm:$0xff] }
 0xfa5   : > { %4738 = vmatpush3.bf16.xpose.msra.mxu1 %v4737_v46  ;;  %v2142_v34 = vld [vmem:[#allocation5 + $0x6c8] sm:$0xff] }
 0xfa6   : > { %4740 = vmatprep.subr.bf16.mxu1 %v4739_v21  ;;  %v2112_v21 = vld [vmem:[#allocation5 + $0x5d8] sm:$0xff] }
 0xfaa   : > { %4770 = vmatpush3.bf16.xpose.msra.mxu0 %v4769_v8  ;;  %v2111_v8 = vld [vmem:[#allocation5 + $0x5d0] sm:$0xff] }
 0xfab   : > { %4772 = vmatprep.subr.bf16.mxu0 %v4771_v5  ;;  %v4785_v5 = vpack.c.bf16 %v2112_v21, %v2111_v8 }
 0xfad   : > { %4742 = vmatpush3.bf16.xpose.msra.mxu1 %v4741_v42  ;;  %v2113_v42 = vld [vmem:[#allocation5 + $0x5e0] sm:$0xff] }
 0xfae   : > { %4744 = vmatprep.subr.bf16.mxu1 %v4743_v17  ;;  %v4787_v17 = vpack.c.bf16 %v2130_v0, %v2129_v14  ;;  %v2153_v0 = vld [vmem:[#allocation5 + $0x720] sm:$0xff] }
 0xfb2   : > { %4774 = vmatpush3.bf16.xpose.msra.mxu0 %v4773_v56  ;;  %v2114_v56 = vld [vmem:[#allocation5 + $0x5e8] sm:$0xff] }
 0xfb3   : > { %4776 = vmatprep.subr.bf16.mxu0 %v4775_v18  ;;  %v4789_v18 = vpack.c.bf16 %v2114_v56, %v2113_v42  ;;  %v2154_v42 = vld [vmem:[#allocation5 + $0x728] sm:$0xff]  ;;  %v4801_v56 = vpack.c.bf16 %v2136_v23, %v2135_v52 }
 0xfb5   : > { %4746 = vmatpush3.bf16.xpose.msra.mxu1 %v4745_v15  ;;  %v2115_v15 = vld [vmem:[#allocation5 + $0x5f0] sm:$0xff] }
 0xfb6   : > { %4748 = vmatprep.subr.bf16.mxu1 %v4747_v30  ;;  %v4791_v30 = vpack.c.bf16 %v2132_v28, %v2131_v26  ;;  %v2139_v26 = vld [vmem:[#allocation5 + $0x6b0] sm:$0xff]  ;;  %v2157_v28 = vld [vmem:[#allocation5 + $0x740] sm:$0xff] }
 0xfba   : > { %4778 = vmatpush3.bf16.xpose.msra.mxu0 %v4777_v29  ;;  %v2116_v29 = vld [vmem:[#allocation5 + $0x5f8] sm:$0xff] }
 0xfbb   : > { %4780 = vmatprep.subr.bf16.mxu0 %v4779_v19  ;;  %v4793_v19 = vpack.c.bf16 %v2116_v29, %v2115_v15  ;;  %v2158_v15 = vld [vmem:[#allocation5 + $0x748] sm:$0xff] }
 0xfbd   : > { %4750 = vmatpush3.bf16.xpose.msra.mxu1 %v4749_v48 }
 0xfbe   : > { %4752 = vmatprep.subr.bf16.mxu1 %v4751_v7 }
 0xfc2   : > { %4782 = vmatpush3.bf16.xpose.msra.mxu0 %v4781_v49 }
 0xfc3   : > { %4784 = vmatprep.subr.bf16.mxu0 %v4783_v50 }
 0xfc5   : > { %4754 = vmatpush3.bf16.xpose.msra.mxu1 %v4753_v45 }
 0xfc6   : > { %4756 = vmatprep.subr.bf16.mxu1 %v4755_v33 }
 0xfca   : > { %4786 = vmatpush3.bf16.xpose.msra.mxu0 %v4785_v5 }
 0xfcb   : > { %4788 = vmatprep.subr.bf16.mxu0 %v4787_v17  ;;  %v4803_v17 = vpack.c.bf16 %v2154_v42, %v2153_v0 }
 0xfcd   : > { %4758 = vmatpush3.bf16.xpose.msra.mxu1 %v4757_v16 }
 0xfce   : > { %4760 = vmatprep.subr.bf16.mxu1 %v4759_v24  ;;  %v2156_v24 = vld [vmem:[#allocation5 + $0x738] sm:$0xff] }
 0xfcf   : > { %v4807_v58 = vpack.c.bf16 %v2156_v24, %v2155_v20 }
 0xfd2   : > { %4790 = vmatpush3.bf16.xpose.msra.mxu0 %v4789_v18  ;;  %v2137_v18 = vld [vmem:[#allocation5 + $0x6a0] sm:$0xff] }
 0xfd3   : > { %4792 = vmatprep.subr.bf16.mxu0 %v4791_v30  ;;  %v4805_v25 = vpack.c.bf16 %v2138_v13, %v2137_v18  ;;  %v4811_v30 = vpack.c.bf16 %v2158_v15, %v2157_v28 }
 0xfd5   : > { %4762 = vmatpush3.bf16.xpose.msra.mxu1 %v4761_v22  ;;  %v2140_v22 = vld [vmem:[#allocation5 + $0x6b8] sm:$0xff] }
 0xfd6   : > { %4796 = vmatprep.subr.bf16.mxu1 %v4795_v36  ;;  %v4809_v29 = vpack.c.bf16 %v2140_v22, %v2139_v26  ;;  %v2160_v36 = vld [vmem:[#allocation5 + $0x758] sm:$0xff] }
 0xfda   : > { %4794 = vmatpush3.bf16.xpose.msra.mxu0 %v4793_v19  ;;  %v2141_v19 = vld [vmem:[#allocation5 + $0x6c0] sm:$0xff] }
0x1028   : > { %v2012_v12 = vpop.xlane.xlu0 %2011 }
0x1029   : > { %v2018_v55 = vmul.f32 0.0078125, %v2012_v12  ;;  %v2010_v57 = vpop.xlane.xlu1 %2009 }
0x102a   : > { %v2017_v59 = vmul.f32 0.0078125, %v2010_v57  ;;  %v3756_v57 = vld [vmem:[#allocation5 + $0x890] ss:$0 sm:$0xff] }
0x102b   : > { %v5739_v38 = vsub.f32 %v5724_v31, %v2018_v55 }
0x102c   : > { %v5742_v37 = vsub.f32 %v5726_v32, %v2017_v59 }
0x102d   : > { %v2026_v60 = vmul.f32 %v5739_v38, %v5739_v38 }
0x102e   : > { %v2025_v61 = vmul.f32 %v5742_v37, %v5742_v37 }
0x102f   : > { %2031 = vadd.xlane.f32.xlu0 %v2026_v60 }
0x1030   : > { %v2016_v41 = vpop.xlane.xlu0 %2015  ;;  %2029 = vadd.xlane.f32.xlu1 %v2025_v61  ;;  %v3757_v61 = vld [vmem:[#allocation5 + $0x898] ss:$0 sm:$0xff] }
0x1031   : > { %v2020_v27 = vmul.f32 0.0078125, %v2016_v41  ;;  %v2014_v62 = vpop.xlane.xlu1 %2013  ;;  %v2133_v41 = vld [vmem:[#allocation5 + $0x680] sm:$0xff] }
0x1032   : > { %v2019_v63 = vmul.f32 0.0078125, %v2014_v62 }
0x1033   : > { %v5749_v1 = vsub.f32 %v5732_v40, %v2020_v27  ;;  %v2134_v27 = vld [vmem:[#allocation5 + $0x688] sm:$0xff] }
0x1034   : > { %v5752_v2 = vsub.f32 %v5734_v10, %v2019_v63  ;;  %v4797_v21 = vpack.c.bf16 %v2134_v27, %v2133_v41 }
0x1035   : > { %v2028_v3 = vmul.f32 %v5749_v1, %v5749_v1 }
0x1036   : > { %v2027_v46 = vmul.f32 %v5752_v2, %v5752_v2 }
0x1037   : > { %2035 = vadd.xlane.f32.xlu0 %v2028_v3  ;;  %v2151_v3 = vld [vmem:[#allocation5 + $0x710] sm:$0xff] }
0x1038   : > { %2033 = vadd.xlane.f32.xlu1 %v2027_v46  ;;  %v2152_v46 = vld [vmem:[#allocation5 + $0x718] sm:$0xff] }
0x1039   : > { %v4799_v5 = vpack.c.bf16 %v2152_v46, %v2151_v3  ;;  %v3759_v46 = vld [vmem:[#allocation5 + $0x782] ss:$0 sm:$0xff] }
0x10bc   : > { %v2032_v39 = vpop.xlane.xlu0 %2031 }
0x10bd   : > { %v2038_v6 = vmul.f32 0.0078125, %v2032_v39  ;;  %v2030_v43 = vpop.xlane.xlu1 %2029  ;;  %v4813_v39 = vpack.c.bf16 %v2142_v34, %v2141_v19  ;;  %v3760_v19 = vld [vmem:[#allocation5 + $0x784] ss:$0 sm:$0xff]  ;;  %v3767_v34 = vld [vmem:[#allocation5 + $0x785] ss:$0 sm:$0xff] }
0x10be   : > { %v2037_v44 = vmul.f32 0.0078125, %v2030_v43  ;;  %v2143_v43 = vld [vmem:[#allocation5 + $0x6d0] sm:$0xff] }
0x10bf   : > { %v2042_v47 = vadd.f32 1e-05, %v2038_v6  ;;  %v4815_v6 = vpack.c.bf16 %v2160_v36, %v2159_v35 }
0x10c0   : > { %v2041_v48 = vadd.f32 1e-05, %v2037_v44  ;;  %v2144_v44 = vld [vmem:[#allocation5 + $0x6d8] sm:$0xff] }
0x10c1   : > { %5043 = vrsqrt.f32 %v2042_v47  ;;  %v2161_v47 = vld [vmem:[#allocation5 + $0x760] sm:$0xff] }
0x10c2   : > { %5045 = vrsqrt.f32 %v2041_v48  ;;  %v2162_v48 = vld [vmem:[#allocation5 + $0x768] sm:$0xff] }
0x10c4   : > { %v2036_v49 = vpop.xlane.xlu0 %2035 }
0x10c5   : > { %v2040_v7 = vmul.f32 0.0078125, %v2036_v49  ;;  %v2034_v50 = vpop.xlane.xlu1 %2033  ;;  %v4817_v49 = vpack.c.bf16 %v2144_v44, %v2143_v43 }
0x10c6   : > { %v2039_v54 = vmul.f32 0.0078125, %v2034_v50  ;;  %v2145_v50 = vld [vmem:[#allocation5 + $0x6e0] sm:$0xff] }
0x10c7   : > { %v2044_v51 = vadd.f32 1e-05, %v2040_v7  ;;  %v4819_v7 = vpack.c.bf16 %v2162_v48, %v2161_v47 }
0x10c8   : > { %v2043_v45 = vadd.f32 1e-05, %v2039_v54  ;;  %v2146_v54 = vld [vmem:[#allocation5 + $0x6e8] sm:$0xff] }
0x10c9   : > { %5047 = vrsqrt.f32 %v2044_v51  ;;  %v2163_v51 = vld [vmem:[#allocation5 + $0x770] sm:$0xff] }
0x10ca   : > { %5049 = vrsqrt.f32 %v2043_v45  ;;  %v2164_v45 = vld [vmem:[#allocation5 + $0x778] sm:$0xff] }
0x10cb   : > { %v5044_v12 = vpop.eup %5043 }
0x10cc   : > { %v5046_v55 = vpop.eup %5045  ;;  %v2050_v59 = vmul.f32 %v5044_v12, %v5739_v38  ;;  %v4821_v12 = vpack.c.bf16 %v2146_v54, %v2145_v50 }
0x10cd   : > { %v2049_v60 = vmul.f32 %v5046_v55, %v5742_v37  ;;  %v4823_v55 = vpack.c.bf16 %v2164_v45, %v2163_v51 }
0x10ce   : > { %v2058_v62 = vmul.f32 %v3756_v57, %v2050_v59  ;;  %v2148_v59 = vld [vmem:[#allocation5 + $0x6f8] sm:$0xff] }
0x10cf   : > { %v2057_v63 = vmul.f32 %v3756_v57, %v2049_v60 }
0x10d0   : > { %v5762_v11 = vadd.f32 %v3757_v61, %v2058_v62 }
0x10d1   : > { %v5760_v8 = vadd.f32 %v3757_v61, %v2057_v63 }
0x10d3   : > { %v5048_v9 = vpop.eup %5047  ;;  %4060 = vmatprep.mubr.f32.mxu1 %v5760_v8  ;;  %4100 = vmatprep.mubr.f32.mxu0 %v5760_v8 }
0x10d4   : > { %v5050_v38 = vpop.eup %5049  ;;  %v2052_v37 = vmul.f32 %v5048_v9, %v5749_v1  ;;  %4061 = vmatmul.mubr.f32.vlgmr.msra.gmra.mrb[32].mxu1 %v5760_v8  ;;  %4101 = vmatmul.mubr.f32.vlgmr.msra.gmra.mrb[44].mxu0 %v5760_v8 }
0x10d5   : > { %v2051_v33 = vmul.f32 %v5050_v38, %v5752_v2  ;;  %4798 = vmatpush3.bf16.xpose.msra.mxu1 %v4797_v21  ;;  %4062 = vmatprep.mubr.f32.mxu1 %v5762_v11  ;;  %v3766_v21 = vld [vmem:[#allocation5 + $0x783] ss:$0 sm:$0xff] }
0x10d6   : > { %4102 = vmatprep.mubr.f32.mxu0 %v5762_v11  ;;  %4800 = vmatprep.subr.bf16.mxu1 %v4799_v5  ;;  %v2060_v14 = vmul.f32 %v3756_v57, %v2052_v37 }
0x10d7   : > { %v2059_v16 = vmul.f32 %v3756_v57, %v2051_v33  ;;  %v2147_v57 = vld [vmem:[#allocation5 + $0x6f0] sm:$0xff] }
0x10d8   : > { %4063 = vmatmul.mubr.f32.gmra.mrb[34].mxu1 %v5762_v11  ;;  %4103 = vmatmul.mubr.f32.gmra.mrb[46].mxu0 %v5762_v11  ;;  %v2068_v2 = vadd.f32 %v3757_v61, %v2060_v14  ;;  %v4825_v60 = vpack.c.bf16 %v2148_v59, %v2147_v57 }
0x10d9   : > { %v2067_v1 = vadd.f32 %v3757_v61, %v2059_v16  ;;  %v3758_v61 = vld [vmem:[#allocation5 + $0x780] ss:$0 sm:$0xff] }
0x10db   : > { %4064 = vmatprep.mubr.f32.mxu1 %v2067_v1  ;;  %4104 = vmatprep.mubr.f32.mxu0 %v2067_v1 }
0x10dc   : > { %4065 = vmatmul.mubr.f32.gmra.mrb[36].mxu1 %v2067_v1  ;;  %4105 = vmatmul.mubr.f32.gmra.mrb[48].mxu0 %v2067_v1 }
0x10dd   : > { %4802 = vmatpush3.bf16.xpose.msra.mxu1 %v4801_v56  ;;  %4066 = vmatprep.mubr.f32.mxu1 %v2068_v2 }
0x10de   : > { %4106 = vmatprep.mubr.f32.mxu0 %v2068_v2  ;;  %4804 = vmatprep.subr.bf16.mxu1 %v4803_v17 }
0x10e0   : > { %4067 = vmatmul.mubr.f32.gmra.mrb[38].mxu1 %v2068_v2  ;;  %4107 = vmatmul.mubr.f32.gmra.mrb[50].mxu0 %v2068_v2 }
0x10e1   : > { %4140 = vmatprep.mubr.f32.mxu1 %v5760_v8 }
0x10e5   : > { %4806 = vmatpush3.bf16.xpose.msra.mxu1 %v4805_v25 }
0x10e6   : > { %4808 = vmatprep.subr.bf16.mxu1 %v4807_v58 }
0x10ed   : > { %4810 = vmatpush3.bf16.xpose.msra.mxu1 %v4809_v29 }
0x10ee   : > { %4812 = vmatprep.subr.bf16.mxu1 %v4811_v30 }
0x10f5   : > { %4814 = vmatpush3.bf16.xpose.msra.mxu1 %v4813_v39 }
0x10f6   : > { %4816 = vmatprep.subr.bf16.mxu1 %v4815_v6 }
0x10fd   : > { %4818 = vmatpush3.bf16.xpose.msra.mxu1 %v4817_v49 }
0x10fe   : > { %4820 = vmatprep.subr.bf16.mxu1 %v4819_v7 }
0x1105   : > { %4822 = vmatpush3.bf16.xpose.msra.mxu1 %v4821_v12 }
0x1106   : > { %4824 = vmatprep.subr.bf16.mxu1 %v4823_v55 }
0x110d   : > { %4826 = vmatpush3.bf16.xpose.msra.mxu1 %v4825_v60 }
0x1114   : > { %4141 = vmatmul.mubr.f32.vlgmr.msra.gmra.mrb[40].mxu1 %v5760_v8 }
0x1115   : > { %4142 = vmatprep.mubr.f32.mxu1 %v5762_v11 }
0x1118   : > { %4143 = vmatmul.mubr.f32.gmra.mrb[42].mxu1 %v5762_v11 }
0x1119   : > { %4144 = vmatprep.mubr.f32.mxu1 %v2067_v1 }
0x111c   : > { %4145 = vmatmul.mubr.f32.gmra.mrb[44].mxu1 %v2067_v1 }
0x111d   : > { %4146 = vmatprep.mubr.f32.mxu1 %v2068_v2 }
0x1120   : > { %4147 = vmatmul.mubr.f32.gmra.mrb[46].mxu1 %v2068_v2 }
0x11a7   : > { %v2231_v41 = vpop.f32.mrb[32].mxu1  ;;  %v2320_v27 = vpop.f32.mrb[44].mxu0 }
0x11a8   : > { %v2437_v62 = vadd.f32 %v3758_v61, %v2231_v41  ;;  %v5778_v63 = vpop.f32.mrb[33].mxu1  ;;  %v2322_v3 = vpop.f32.mrb[45].mxu0  ;;  %v2446_v9 = vadd.f32 %v3759_v46, %v2320_v27 }
0x11a9   : > { %v2703_v33 = vadd.f32 %v3766_v21, %v2322_v3 }
0x11aa   : > { %4390 = vmatprep.mubr.f32.mxu0 %v2437_v62 }
0x11ab   : > { %v2237_v5 = vpop.f32.mrb[34].mxu1  ;;  %v2326_v8 = vpop.f32.mrb[46].mxu0 }
0x11ac   : > { %v2447_v38 = vadd.f32 %v3759_v46, %v2326_v8  ;;  %v5780_v37 = vpop.f32.mrb[35].mxu1  ;;  %v2328_v11 = vpop.f32.mrb[47].mxu0  ;;  %v2438_v22 = vadd.f32 %v3758_v61, %v2237_v5 }
0x11ad   : > { %v2704_v52 = vadd.f32 %v3766_v21, %v2328_v11 }
0x11ae   : > { %v4827_v23 = vpack.c.bf16 %v2447_v38, %v2446_v9 }
0x11af   : > { %v5782_v14 = vpack.c.bf16 %v2704_v52, %v2703_v33  ;;  %v2243_v16 = vpop.f32.mrb[36].mxu1  ;;  %v2332_v0 = vpop.f32.mrb[48].mxu0 }
0x11b0   : > { %v5784_v42 = vpop.f32.mrb[37].mxu1  ;;  %v2334_v1 = vpop.f32.mrb[49].mxu0  ;;  %4828 = vmatprep.subr.bf16.mxu0 %v4827_v23  ;;  %v2448_v18 = vadd.f32 %v3759_v46, %v2332_v0  ;;  %v2439_v28 = vadd.f32 %v3758_v61, %v2243_v16 }
0x11b1   : > { %v2705_v56 = vadd.f32 %v3766_v21, %v2334_v1  ;;  %4830 = vmatpush3.bf16.xpose.msra.mxu0 %v4827_v23 }
0x11b3   : > { %v2249_v17 = vpop.f32.mrb[38].mxu1  ;;  %v2338_v2 = vpop.f32.mrb[50].mxu0 }
0x11b4   : > { %v2449_v13 = vadd.f32 %v3759_v46, %v2338_v2  ;;  %v5786_v20 = vpop.f32.mrb[39].mxu1  ;;  %v2340_v24 = vpop.f32.mrb[51].mxu0  ;;  %v2440_v15 = vadd.f32 %v3758_v61, %v2249_v17 }
0x11b5   : > { %v2706_v25 = vadd.f32 %v3766_v21, %v2340_v24 }
0x11b6   : > { %v4831_v58 = vpack.c.bf16 %v2449_v13, %v2448_v18 }
0x11b7   : > { %v5788_v26 = vpack.c.bf16 %v2706_v25, %v2705_v56 }
0x11b8   : > { %4832 = vmatprep.subr.bf16.mxu0 %v4831_v58 }
0x11b9   : > { %4834 = vmatpush3.bf16.xpose.msra.mxu0 %v4831_v58 }
0x11c0   : > { %4391 = vmatmul.mubr.f32.vlgmr.msra.gmra.mrb[52].mxu0 %v2438_v22 }
0x11c1   : > { %4393 = vmatprep.mubr.f32.mxu0 %v2439_v28 }
0x11c4   : > { %4394 = vmatmul.mubr.f32.gmra.mrb[54].mxu0 %v2440_v15 }
0x11e7   : > { %v2409_v29 = vpop.f32.mrb[40].mxu1 }
0x11e8   : > { %v2411_v30 = vpop.f32.mrb[41].mxu1  ;;  %v2455_v36 = vadd.f32 %v3760_v19, %v2409_v29 }
0x11e9   : > { %v2712_v43 = vadd.f32 %v3767_v34, %v2411_v30 }
0x11eb   : > { %v2415_v35 = vpop.f32.mrb[42].mxu1 }
0x11ec   : > { %v2456_v39 = vadd.f32 %v3760_v19, %v2415_v35  ;;  %v2417_v6 = vpop.f32.mrb[43].mxu1 }
0x11ed   : > { %v2713_v44 = vadd.f32 %v3767_v34, %v2417_v6 }
0x11ee   : > { %v4835_v47 = vpack.c.bf16 %v2456_v39, %v2455_v36 }
0x11ef   : > { %v5790_v48 = vpack.c.bf16 %v2713_v44, %v2712_v43  ;;  %v2421_v49 = vpop.f32.mrb[44].mxu1 }
0x11f0   : > { %v2423_v7 = vpop.f32.mrb[45].mxu1  ;;  %4836 = vmatprep.subr.bf16.mxu0 %v4835_v47  ;;  %v2457_v54 = vadd.f32 %v3760_v19, %v2421_v49 }
0x11f1   : > { %4838 = vmatpush3.bf16.msra.mxu0 %v4835_v47  ;;  %v2714_v12 = vadd.f32 %v3767_v34, %v2423_v7  ;;  %v3765_v7 = vld [vmem:[#allocation5 + $0x781] ss:$0 sm:$0xff] }
0x11f3   : > { %v2427_v50 = vpop.f32.mrb[46].mxu1 }
0x11f4   : > { %v2458_v51 = vadd.f32 %v3760_v19, %v2427_v50  ;;  %v2429_v45 = vpop.f32.mrb[47].mxu1 }
0x11f5   : > { %v2715_v55 = vadd.f32 %v3767_v34, %v2429_v45  ;;  %v2695_v45 = vadd.f32 %v3765_v7, %v5780_v37 }
0x11f6   : > { %v4839_v57 = vpack.c.bf16 %v2458_v51, %v2457_v54  ;;  %v2694_v51 = vadd.f32 %v3765_v7, %v5778_v63 }
0x11f7   : > { %v5792_v59 = vpack.c.bf16 %v2715_v55, %v2714_v12  ;;  %v2696_v12 = vadd.f32 %v3765_v7, %v5784_v42 }
0x11f8   : > { %4840 = vmatprep.subr.bf16.mxu0 %v4839_v57 }
0x11f9   : > { %4842 = vmatpush3.bf16.msra.mxu0 %v4839_v57 }
0x11fa   : > { %4844 = vmatprep.subr.bf16.mxu0 %v5782_v14 }
0x1293   : > { %v4392_v60 = vpop.f32.mrb[52].mxu0 }
0x1294   : > { %v2545_v61 = vmul.f32 0.125, %v4392_v60  ;;  %v2525_v41 = vpop.f32.mrb[53].mxu0 }
0x1295   : > { %v2544_v27 = vmul.f32 0.125, %v2525_v41 }
0x1296   : > { %v2551_v62 = vsel %vm1204_vm10, %v2545_v61, -inf }
0x1297   : > { %2552 = vmax.xlane.f32.xlu0 %v2551_v62  ;;  %v4395_v3 = vpop.f32.mrb[54].mxu0  ;;  %v2548_v46 = vsel %vm1204_vm10, %v2544_v27, -inf }
0x1298   : > { %v2547_v21 = vmul.f32 0.125, %v4395_v3  ;;  %2549 = vmax.xlane.f32.xlu1 %v2548_v46  ;;  %v2535_v5 = vpop.f32.mrb[55].mxu0 }
0x1299   : > { %v2546_v8 = vmul.f32 0.125, %v2535_v5 }
0x129a   : > { %v2557_v9 = vsel %vm1204_vm10, %v2547_v21, -inf }
0x129b   : > { %2558 = vmax.xlane.f32.xlu0 %v2557_v9  ;;  %v2554_v38 = vsel %vm1204_vm10, %v2546_v8, -inf }
0x129c   : > { %2555 = vmax.xlane.f32.xlu1 %v2554_v38 }
0x1324   : > { %v2553_v11 = vpop.xlane.xlu0 %2552 }
0x1325   : > { %v2561_v33 = vsub.f32 %v2545_v61, %v2553_v11  ;;  %v2550_v52 = vpop.xlane.xlu1 %2549 }
0x1326   : > { %v2560_v23 = vsub.f32 %v2544_v27, %v2550_v52 }
0x1327   : > { %v2566_v16 = vmul.f32 1.442695, %v2561_v33 }
0x1328   : > { %v2564_v0 = vmul.f32 1.442695, %v2560_v23  ;;  %v2559_v1 = vpop.xlane.xlu0 %2558 }
0x1329   : > { %5051 = vpow2.f32 %v2566_v16  ;;  %v2563_v56 = vsub.f32 %v2547_v21, %v2559_v1  ;;  %v2556_v17 = vpop.xlane.xlu1 %2555 }
0x132a   : > { %5053 = vpow2.f32 %v2564_v0  ;;  %v2562_v2 = vsub.f32 %v2546_v8, %v2556_v17 }
0x132b   : > { %v2570_v18 = vmul.f32 1.442695, %v2563_v56 }
0x132c   : > { %v2568_v13 = vmul.f32 1.442695, %v2562_v2 }
0x132d   : > { %5055 = vpow2.f32 %v2570_v18 }
0x132e   : > { %5057 = vpow2.f32 %v2568_v13 }
0x1333   : > { %v5052_v24 = vpop.eup %5051 }
0x1334   : > { %v5054_v25 = vpop.eup %5053  ;;  %v2575_v58 = vsel %vm1204_vm10, %v5052_v24, 0.0 }
0x1335   : > { %2576 = vadd.xlane.f32.xlu0 %v2575_v58  ;;  %v2572_v22 = vsel %vm1204_vm10, %v5054_v25, 0.0 }
0x1336   : > { %2573 = vadd.xlane.f32.xlu1 %v2572_v22  ;;  %v2962_v22 = vld [vmem:[#allocation5 + $0x808] sm:$0xff] }
0x1337   : > { %v5056_v28 = vpop.eup %5055 }
0x1338   : > { %v5058_v15 = vpop.eup %5057  ;;  %v2581_v29 = vsel %vm1204_vm10, %v5056_v28, 0.0 }
0x1339   : > { %2582 = vadd.xlane.f32.xlu0 %v2581_v29  ;;  %v2578_v30 = vsel %vm1204_vm10, %v5058_v15, 0.0 }
0x133a   : > { %2579 = vadd.xlane.f32.xlu1 %v2578_v30 }
0x13c2   : > { %v2577_v19 = vpop.xlane.xlu0 %2576 }
0x13c3   : > { %5059 = vrcp.f32 %v2577_v19  ;;  %v2574_v34 = vpop.xlane.xlu1 %2573 }
0x13c4   : > { %5061 = vrcp.f32 %v2574_v34 }
0x13c6   : > { %v2583_v35 = vpop.xlane.xlu0 %2582 }
0x13c7   : > { %5063 = vrcp.f32 %v2583_v35  ;;  %v2580_v36 = vpop.xlane.xlu1 %2579  ;;  %v2946_v35 = vld [vmem:[#allocation5 + $0x788] sm:$0xff] }
0x13c8   : > { %5065 = vrcp.f32 %v2580_v36  ;;  %v2947_v36 = vld [vmem:[#allocation5 + $0x790] sm:$0xff] }
0x13cd   : > { %v5060_v39 = vpop.eup %5059 }
0x13ce   : > { %v5062_v6 = vpop.eup %5061  ;;  %v2589_v44 = vmul.f32 %v5060_v39, %v5052_v24 }
0x13cf   : > { %v2588_v43 = vmul.f32 %v5062_v6, %v5054_v25  ;;  %v2964_v6 = vld [vmem:[#allocation5 + $0x818] sm:$0xff] }
0x13d1   : > { %v5064_v47 = vpop.eup %5063  ;;  %4404 = vmatprep.mubr.msk.f32.mxu0 %vm1204_vm10, %v2588_v43  ;;  %v2965_v43 = vld [vmem:[#allocation5 + $0x820] sm:$0xff] }
0x13d2   : > { %v5066_v49 = vpop.eup %5065  ;;  %4405 = vmatmul.mubr.msk.f32.vlgmr.msra.gmra.mrb[56].mxu0 %vm1204_vm10, %v2589_v44  ;;  %v2591_v54 = vmul.f32 %v5064_v47, %v5056_v28  ;;  %v2963_v28 = vld [vmem:[#allocation5 + $0x810] sm:$0xff] }
0x13d3   : > { %4846 = vmatpush3.bf16.xpose.msra.mxu0 %v5782_v14  ;;  %v2590_v50 = vmul.f32 %v5066_v49, %v5058_v15  ;;  %v2697_v14 = vadd.f32 %v3765_v7, %v5786_v20  ;;  %v4859_v15 = vpack.c.bf16 %v2963_v28, %v2962_v22  ;;  %v4861_v49 = vpack.c.bf16 %v2947_v36, %v2946_v35  ;;  %v2977_v22 = vld [vmem:[#allocation5 + $0x880] sm:$0xff] }
0x13d4   : > { %4848 = vmatprep.subr.bf16.mxu0 %v5788_v26 }
0x13d5   : > { %4407 = vmatprep.mubr.msk.f32.mxu0 %vm1204_vm10, %v2590_v50  ;;  %v4863_v50 = vpack.c.bf16 %v2965_v43, %v2964_v6 }
0x13d6   : > { %4408 = vmatmul.mubr.msk.f32.gmra.mrb[58].mxu0 %vm1204_vm10, %v2591_v54  ;;  %v2948_v54 = vld [vmem:[#allocation5 + $0x798] sm:$0xff] }
0x13d7   : > { %4418 = vmatprep.mubr.f32.mxu0 %v2694_v51  ;;  %v2949_v51 = vld [vmem:[#allocation5 + $0x7a0] sm:$0xff] }
0x13db   : > { %4850 = vmatpush3.bf16.xpose.msra.mxu0 %v5788_v26 }
0x13dc   : > { %4852 = vmatprep.subr.bf16.mxu0 %v5790_v48 }
0x13e2   : > { %4419 = vmatmul.mubr.f32.vlgmr.msra.gmra.mrb[60].mxu0 %v2695_v45 }
0x13e3   : > { %4421 = vmatprep.mubr.f32.mxu0 %v2696_v12  ;;  %4854 = vmatpush3.bf16.msra.mxu0 %v5790_v48  ;;  %v2966_v12 = vld [vmem:[#allocation5 + $0x828] sm:$0xff] }
0x13e4   : > { %4856 = vmatprep.subr.bf16.mxu0 %v5792_v59 }
0x13e6   : > { %4422 = vmatmul.mubr.f32.gmra.mrb[62].mxu0 %v2697_v14  ;;  %v2967_v14 = vld [vmem:[#allocation5 + $0x830] sm:$0xff] }
0x13e7   : > { %4858 = vmatpush3.bf16.msra.mxu0 %v5792_v59 }
0x13e8   : > { %4860 = vmatprep.subr.bf16.mxu0 %v4859_v15 }
0x14a5   : > { %v5818_v63 = vpop.f32.mrb[56].mxu0 }
0x14a6   : > { %v5820_v26 = vpop.f32.mrb[57].mxu0 }
0x14a9   : > { %v5822_v55 = vpop.f32.mrb[58].mxu0 }
0x14aa   : > { %v5824_v37 = vpop.f32.mrb[59].mxu0 }
0x14b5   : > { %v4420_v42 = vpop.f32.mrb[60].mxu0 }
0x14b6   : > { %v2802_v57 = vmul.f32 0.125, %v4420_v42  ;;  %v2782_v60 = vpop.f32.mrb[61].mxu0 }
0x14b7   : > { %v2801_v61 = vmul.f32 0.125, %v2782_v60  ;;  %v4865_v60 = vpack.c.bf16 %v2949_v51, %v2948_v54 }
0x14b8   : > { %v2808_v48 = vsel %vm1204_vm10, %v2802_v57, -inf }
0x14b9   : > { %2809 = vmax.xlane.f32.xlu0 %v2808_v48  ;;  %v4423_v20 = vpop.f32.mrb[62].mxu0  ;;  %v2805_v41 = vsel %vm1204_vm10, %v2801_v61, -inf  ;;  %v4867_v48 = vpack.c.bf16 %v2967_v14, %v2966_v12 }
0x14ba   : > { %v2804_v27 = vmul.f32 0.125, %v4423_v20  ;;  %2806 = vmax.xlane.f32.xlu1 %v2805_v41  ;;  %v2792_v59 = vpop.f32.mrb[63].mxu0  ;;  %v2950_v20 = vld [vmem:[#allocation5 + $0x7a8] sm:$0xff]  ;;  %v2951_v41 = vld [vmem:[#allocation5 + $0x7b0] sm:$0xff] }
0x14bb   : > { %v2803_v62 = vmul.f32 0.125, %v2792_v59  ;;  %v2969_v59 = vld [vmem:[#allocation5 + $0x840] sm:$0xff] }
0x14bc   : > { %v2814_v3 = vsel %vm1204_vm10, %v2804_v27, -inf }
0x14bd   : > { %2815 = vmax.xlane.f32.xlu0 %v2814_v3  ;;  %v2811_v46 = vsel %vm1204_vm10, %v2803_v62, -inf }
0x14be   : > { %2812 = vmax.xlane.f32.xlu1 %v2811_v46  ;;  %v2952_v46 = vld [vmem:[#allocation5 + $0x7b8] sm:$0xff] }
0x1546   : > { %v2810_v21 = vpop.xlane.xlu0 %2809 }
0x1547   : > { %v2818_v5 = vsub.f32 %v2802_v57, %v2810_v21  ;;  %v2807_v8 = vpop.xlane.xlu1 %2806  ;;  %v2953_v21 = vld [vmem:[#allocation5 + $0x7c0] sm:$0xff] }
0x1548   : > { %v2817_v9 = vsub.f32 %v2801_v61, %v2807_v8  ;;  %v2971_v8 = vld [vmem:[#allocation5 + $0x850] sm:$0xff] }
0x1549   : > { %v2823_v38 = vmul.f32 1.442695, %v2818_v5  ;;  %v2970_v5 = vld [vmem:[#allocation5 + $0x848] sm:$0xff] }
0x154a   : > { %v2821_v11 = vmul.f32 1.442695, %v2817_v9  ;;  %v2816_v33 = vpop.xlane.xlu0 %2815  ;;  %v4873_v9 = vpack.c.bf16 %v2953_v21, %v2952_v46 }
0x154b   : > { %5067 = vpow2.f32 %v2823_v38  ;;  %v2820_v52 = vsub.f32 %v2804_v27, %v2816_v33  ;;  %v2813_v23 = vpop.xlane.xlu1 %2812  ;;  %v2968_v27 = vld [vmem:[#allocation5 + $0x838] sm:$0xff]  ;;  %v4875_v38 = vpack.c.bf16 %v2971_v8, %v2970_v5  ;;  %v2955_v33 = vld [vmem:[#allocation5 + $0x7d0] sm:$0xff] }
0x154c   : > { %5069 = vpow2.f32 %v2821_v11  ;;  %v2819_v16 = vsub.f32 %v2803_v62, %v2813_v23  ;;  %v4869_v62 = vpack.c.bf16 %v2951_v41, %v2950_v20  ;;  %v4871_v3 = vpack.c.bf16 %v2969_v59, %v2968_v27  ;;  %v2954_v11 = vld [vmem:[#allocation5 + $0x7c8] sm:$0xff]  ;;  %v2973_v23 = vld [vmem:[#allocation5 + $0x860] sm:$0xff] }
0x154d   : > { %v2827_v0 = vmul.f32 1.442695, %v2820_v52  ;;  %v2972_v52 = vld [vmem:[#allocation5 + $0x858] sm:$0xff] }
0x154e   : > { %v2825_v1 = vmul.f32 1.442695, %v2819_v16  ;;  %v4877_v16 = vpack.c.bf16 %v2955_v33, %v2954_v11  ;;  %v3138_v11 = vld [vmem:[#allocation5 + $0x8b0] sm:$0xff]  ;;  %v3139_v33 = vld [vmem:[#allocation5 + $0x8b8] sm:$0xff] }
0x154f   : > { %5071 = vpow2.f32 %v2827_v0  ;;  %v4879_v0 = vpack.c.bf16 %v2973_v23, %v2972_v52  ;;  %v4891_v52 = vpack.c.bf16 %v3139_v33, %v3138_v11  ;;  %v3140_v23 = vld [vmem:[#allocation5 + $0x8c0] sm:$0xff]  ;;  %v3363_v11 = vld [vmem:[#allocation5 + $0x910] sm:$0xff]  ;;  %v3364_v33 = vld [vmem:[#allocation5 + $0x918] sm:$0xff] }
0x1550   : > { %5073 = vpow2.f32 %v2825_v1  ;;  %v2956_v1 = vld [vmem:[#allocation5 + $0x7d8] sm:$0xff] }
0x1551   : > { %4892 = vmatprep.subr.bf16.mxu1 %v4891_v52 }
0x1552   : > { %4894 = vmatpush3.bf16.xpose.msra.mxu1 %v4891_v52  ;;  %v4911_v52 = vpack.c.bf16 %v3364_v33, %v3363_v11 }
0x1555   : > { %v5068_v56 = vpop.eup %5067 }
0x1556   : > { %v5070_v17 = vpop.eup %5069  ;;  %v2832_v2 = vsel %vm1204_vm10, %v5068_v56, 0.0 }
0x1557   : > { %2833 = vadd.xlane.f32.xlu0 %v2832_v2  ;;  %v2829_v18 = vsel %vm1204_vm10, %v5070_v17, 0.0  ;;  %v2975_v2 = vld [vmem:[#allocation5 + $0x870] sm:$0xff] }
0x1558   : > { %2830 = vadd.xlane.f32.xlu1 %v2829_v18 }
0x1559   : > { %v5072_v13 = vpop.eup %5071 }
0x155a   : > { %v5074_v24 = vpop.eup %5073  ;;  %v2838_v25 = vsel %vm1204_vm10, %v5072_v13, 0.0 }
0x155b   : > { %2839 = vadd.xlane.f32.xlu0 %v2838_v25  ;;  %v2835_v58 = vsel %vm1204_vm10, %v5074_v24, 0.0  ;;  %v2959_v25 = vld [vmem:[#allocation5 + $0x7f0] sm:$0xff] }
0x155c   : > { %2836 = vadd.xlane.f32.xlu1 %v2835_v58  ;;  %v2976_v58 = vld [vmem:[#allocation5 + $0x878] sm:$0xff] }
0x155d   : > { %v4887_v15 = vpack.c.bf16 %v2977_v22, %v2976_v58 }
0x15e4   : > { %v2834_v29 = vpop.xlane.xlu0 %2833 }
0x15e5   : > { %5075 = vrcp.f32 %v2834_v29  ;;  %v2831_v30 = vpop.xlane.xlu1 %2830  ;;  %v2960_v29 = vld [vmem:[#allocation5 + $0x7f8] sm:$0xff] }
0x15e6   : > { %5077 = vrcp.f32 %v2831_v30  ;;  %v2961_v30 = vld [vmem:[#allocation5 + $0x800] sm:$0xff] }
0x15e8   : > { %v2840_v19 = vpop.xlane.xlu0 %2839 }
0x15e9   : > { %5079 = vrcp.f32 %v2840_v19  ;;  %v2837_v34 = vpop.xlane.xlu1 %2836  ;;  %v4889_v19 = vpack.c.bf16 %v2961_v30, %v2960_v29 }
0x15ea   : > { %5081 = vrcp.f32 %v2837_v34 }
0x15ef   : > { %v5076_v39 = vpop.eup %5075 }
0x15f0   : > { %v5078_v44 = vpop.eup %5077  ;;  %v2846_v7 = vmul.f32 %v5076_v39, %v5068_v56  ;;  %v2957_v56 = vld [vmem:[#allocation5 + $0x7e0] sm:$0xff] }
0x15f1   : > { %v2845_v47 = vmul.f32 %v5078_v44, %v5070_v17  ;;  %v2974_v17 = vld [vmem:[#allocation5 + $0x868] sm:$0xff]  ;;  %v4881_v18 = vpack.c.bf16 %v2957_v56, %v2956_v1  ;;  %v3236_v1 = vld [vmem:[#allocation5 + $0x8d8] sm:$0xff]  ;;  %v3237_v56 = vld [vmem:[#allocation5 + $0x8e0] sm:$0xff] }
0x15f3   : > { %v5080_v45 = vpop.eup %5079  ;;  %4432 = vmatprep.mubr.msk.f32.mxu0 %vm1204_vm10, %v2845_v47  ;;  %v3772_v47 = vld [vmem:[#allocation5 + $0x888] ss:$0 sm:$0xff] }
0x15f4   : > { %v5082_v42 = vpop.eup %5081  ;;  %4433 = vmatmul.mubr.msk.f32.vlgmr.msra.gmra.mrb[64].mxu0 %vm1204_vm10, %v2846_v7  ;;  %v2848_v61 = vmul.f32 %v5080_v45, %v5072_v13  ;;  %v4883_v13 = vpack.c.bf16 %v2975_v2, %v2974_v17  ;;  %v4899_v17 = vpack.c.bf16 %v3237_v56, %v3236_v1  ;;  %v3780_v1 = vld [vmem:[#allocation5 + $0x8f8] ss:$0 sm:$0xff] }
0x15f5   : > { %v2847_v57 = vmul.f32 %v5082_v42, %v5074_v24  ;;  %4862 = vmatpush3.bf16.msra.mxu0 %v4861_v49  ;;  %v2958_v24 = vld [vmem:[#allocation5 + $0x7e8] sm:$0xff] }
0x15f6   : > { %4864 = vmatprep.subr.bf16.mxu0 %v4863_v50  ;;  %v4885_v28 = vpack.c.bf16 %v2959_v25, %v2958_v24 }
0x15f7   : > { %4435 = vmatprep.mubr.msk.f32.mxu0 %vm1204_vm10, %v2847_v57 }
0x15f8   : > { %4436 = vmatmul.mubr.msk.f32.gmra.mrb[66].mxu0 %vm1204_vm10, %v2848_v61 }
0x15f9   : > { %4866 = vmatpush3.bf16.msra.mxu0 %v4865_v60 }
0x15fa   : > { %4868 = vmatprep.subr.bf16.mxu0 %v4867_v48 }
0x15fd   : > { %4870 = vmatpush3.bf16.msra.mxu0 %v4869_v62 }
0x15fe   : > { %4872 = vmatprep.subr.bf16.mxu0 %v4871_v3 }
0x1601   : > { %4874 = vmatpush3.bf16.msra.mxu0 %v4873_v9 }
0x1602   : > { %4876 = vmatprep.subr.bf16.mxu0 %v4875_v38 }
0x1605   : > { %4878 = vmatpush3.bf16.msra.mxu0 %v4877_v16  ;;  %v3141_v16 = vld [vmem:[#allocation5 + $0x8c8] sm:$0xff] }
0x1606   : > { %4880 = vmatprep.subr.bf16.mxu0 %v4879_v0  ;;  %v4895_v0 = vpack.c.bf16 %v3141_v16, %v3140_v23  ;;  %v3437_v23 = vld [vmem:[#allocation5 + $0x928] sm:$0xff]  ;;  %v3438_v16 = vld [vmem:[#allocation5 + $0x930] sm:$0xff] }
0x1608   : > { %4896 = vmatprep.subr.bf16.mxu1 %v4895_v0 }
0x1609   : > { %4882 = vmatpush3.bf16.msra.mxu0 %v4881_v18  ;;  %4898 = vmatpush3.bf16.xpose.msra.mxu1 %v4895_v0  ;;  %v4914_v0 = vpack.c.bf16 %v3438_v16, %v3437_v23 }
0x160a   : > { %4884 = vmatprep.subr.bf16.mxu0 %v4883_v13  ;;  %4900 = vmatprep.subr.bf16.mxu1 %v4899_v17 }
0x160d   : > { %4886 = vmatpush3.bf16.msra.mxu0 %v4885_v28 }
0x160e   : > { %4888 = vmatprep.subr.bf16.mxu0 %v4887_v15 }
0x1611   : > { %4890 = vmatpush3.bf16.msra.mxu0 %v4889_v19 }
0x1612   : > { %4907 = vmatprep.subr.bf16.mxu0 %v5261_v53 }
0x16c7   : > { %v4434_v34 = vpop.f32.mrb[64].mxu0 }
0x16c8   : > { %v2927_v35 = vpop.f32.mrb[65].mxu0 }
0x16c9   : > { %3042 = vmatprep.mubr.f32.mxu0 %v2927_v35  ;;  %v3773_v35 = vld [vmem:[#allocation5 + $0x8a0] ss:$0 sm:$0xff] }
0x16ca   : > { %3043 = vmatmul.mubr.f32.vlgmr.msra.gmra.mrb[68].mxu0 %v5820_v26 }
0x16cb   : > { %v4437_v36 = vpop.f32.mrb[66].mxu0  ;;  %3047 = vmatprep.mubr.f32.mxu0 %v4434_v34 }
0x16cc   : > { %v2937_v39 = vpop.f32.mrb[67].mxu0 }
0x16ce   : > { %3048 = vmatmul.mubr.f32.gmra.mrb[70].mxu0 %v5818_v63 }
0x16cf   : > { %3052 = vmatprep.mubr.f32.mxu0 %v2937_v39  ;;  %v3774_v39 = vld [vmem:[#allocation5 + $0x8a8] ss:$0 sm:$0xff] }
0x16d2   : > { %3053 = vmatmul.mubr.f32.gmra.mrb[72].mxu0 %v5824_v37 }
0x16d3   : > { %3057 = vmatprep.mubr.f32.mxu0 %v4437_v36 }
0x16d6   : > { %3058 = vmatmul.mubr.f32.gmra.mrb[74].mxu0 %v5822_v55 }
0x16d7   : > { %4474 = vmatprep.mubr.msk.f32.mxu0 %vm5262_vm11, %v5258_v4 }
0x179d   : > { %v4212_v6 = vpop.f32.mrb[68].mxu0 }
0x179e   : > { %v4213_v43 = vpop.f32.mrb[69].mxu0 }
0x179f   : > { %v4214_v44 = vadd.f32 %v4213_v43, %v4212_v6 }
0x17a1   : > { %v3063_v49 = vadd.f32 %v4214_v44, %v5726_v32  ;;  %v4215_v7 = vpop.f32.mrb[70].mxu0 }
0x17a2   : > { %v4216_v50 = vpop.f32.mrb[71].mxu0 }
0x17a3   : > { %v4217_v26 = vadd.f32 %v4216_v50, %v4215_v7  ;;  %v5844_v54 = vadd.f32 %v3772_v47, %v3063_v49 }
0x17a5   : > { %v3064_v51 = vadd.f32 %v4217_v26, %v5724_v31  ;;  %v4218_v63 = vpop.f32.mrb[72].mxu0  ;;  %3078 = vadd.xlane.f32.xlu1 %v5844_v54 }
0x17a6   : > { %v4219_v37 = vpop.f32.mrb[73].mxu0 }
0x17a7   : > { %v4220_v45 = vadd.f32 %v4219_v37, %v4218_v63  ;;  %v5848_v12 = vadd.f32 %v3772_v47, %v3064_v51 }
0x17a9   : > { %v3065_v55 = vadd.f32 %v4220_v45, %v5734_v10  ;;  %v4221_v14 = vpop.f32.mrb[74].mxu0  ;;  %3080 = vadd.xlane.f32.xlu0 %v5848_v12 }
0x17aa   : > { %v4222_v32 = vpop.f32.mrb[75].mxu0 }
0x17ab   : > { %v4223_v42 = vadd.f32 %v4222_v32, %v4221_v14  ;;  %v5852_v57 = vadd.f32 %v3772_v47, %v3065_v55  ;;  %v3238_v32 = vld [vmem:[#allocation5 + $0x8e8] sm:$0xff] }
0x17ad   : > { %v3066_v60 = vadd.f32 %v4223_v42, %v5732_v40  ;;  %3082 = vadd.xlane.f32.xlu1 %v5852_v57  ;;  %v3239_v42 = vld [vmem:[#allocation5 + $0x8f0] sm:$0xff] }
0x17af   : > { %v5856_v31 = vadd.f32 %v3772_v47, %v3066_v60  ;;  %v4903_v60 = vpack.c.bf16 %v3239_v42, %v3238_v32 }
0x17b1   : > { %3084 = vadd.xlane.f32.xlu0 %v5856_v31 }
0x1832   : > { %v3079_v61 = vpop.xlane.xlu1 %3078 }
0x1833   : > { %v3086_v48 = vmul.f32 0.0078125, %v3079_v61  ;;  %v3775_v61 = vld [vmem:[#allocation5 + $0x8d0] ss:$0 sm:$0xff] }
0x1835   : > { %v3090_v20 = vsub.f32 %v5844_v54, %v3086_v48 }
0x1836   : > { %v3081_v10 = vpop.xlane.xlu0 %3080 }
0x1837   : > { %v3087_v41 = vmul.f32 0.0078125, %v3081_v10  ;;  %v3094_v27 = vmul.f32 %v3090_v20, %v3090_v20 }
0x1839   : > { %v3091_v59 = vsub.f32 %v5848_v12, %v3087_v41  ;;  %3098 = vadd.xlane.f32.xlu1 %v3094_v27 }
0x183a   : > { %v3083_v62 = vpop.xlane.xlu1 %3082 }
0x183b   : > { %v3088_v3 = vmul.f32 0.0078125, %v3083_v62  ;;  %v3095_v46 = vmul.f32 %v3091_v59, %v3091_v59 }
0x183d   : > { %v3092_v40 = vsub.f32 %v5852_v57, %v3088_v3  ;;  %3100 = vadd.xlane.f32.xlu0 %v3095_v46 }
0x183e   : > { %v3085_v21 = vpop.xlane.xlu0 %3084 }
0x183f   : > { %v3089_v5 = vmul.f32 0.0078125, %v3085_v21  ;;  %v3096_v8 = vmul.f32 %v3092_v40, %v3092_v40 }
0x1841   : > { %v3093_v9 = vsub.f32 %v5856_v31, %v3089_v5  ;;  %3102 = vadd.xlane.f32.xlu1 %v3096_v8  ;;  %v3361_v8 = vld [vmem:[#allocation5 + $0x900] sm:$0xff] }
0x1843   : > { %v3097_v38 = vmul.f32 %v3093_v9, %v3093_v9 }
0x1845   : > { %3104 = vadd.xlane.f32.xlu0 %v3097_v38 }
0x18c6   : > { %v3099_v2 = vpop.xlane.xlu1 %3098 }
0x18c7   : > { %v3106_v18 = vmul.f32 0.0078125, %v3099_v2 }
0x18c9   : > { %v3110_v13 = vadd.f32 1e-05, %v3106_v18 }
0x18ca   : > { %v3101_v24 = vpop.xlane.xlu0 %3100 }
0x18cb   : > { %5083 = vrsqrt.f32 %v3110_v13  ;;  %v3107_v25 = vmul.f32 0.0078125, %v3101_v24 }
0x18cd   : > { %v3111_v58 = vadd.f32 1e-05, %v3107_v25 }
0x18ce   : > { %v3103_v22 = vpop.xlane.xlu1 %3102 }
0x18cf   : > { %5085 = vrsqrt.f32 %v3111_v58  ;;  %v3108_v28 = vmul.f32 0.0078125, %v3103_v22 }
0x18d1   : > { %v3112_v15 = vadd.f32 1e-05, %v3108_v28 }
0x18d2   : > { %v3105_v29 = vpop.xlane.xlu0 %3104 }
0x18d3   : > { %5087 = vrsqrt.f32 %v3112_v15  ;;  %v3109_v30 = vmul.f32 0.0078125, %v3105_v29 }
0x18d5   : > { %v5084_v19 = vpop.eup %5083  ;;  %v3113_v34 = vadd.f32 1e-05, %v3109_v30 }
0x18d6   : > { %v3118_v36 = vmul.f32 %v5084_v19, %v3090_v20 }
0x18d7   : > { %5089 = vrsqrt.f32 %v3113_v34 }
0x18d8   : > { %v3126_v6 = vmul.f32 %v3773_v35, %v3118_v36 }
0x18d9   : > { %v5086_v43 = vpop.eup %5085 }
0x18da   : > { %v3119_v44 = vmul.f32 %v5086_v43, %v3091_v59  ;;  %v3134_v47 = vadd.f32 %v3774_v39, %v3126_v6  ;;  %v3365_v43 = vld [vmem:[#allocation5 + $0x920] sm:$0x1] }
0x18dc   : > { %4446 = vmatprep.mubr.f32.mxu1 %v3134_v47  ;;  %v3127_v49 = vmul.f32 %v3773_v35, %v3119_v44 }
0x18dd   : > { %v5088_v7 = vpop.eup %5087 }
0x18de   : > { %v3135_v50 = vadd.f32 %v3774_v39, %v3127_v49  ;;  %v3120_v26 = vmul.f32 %v5088_v7, %v3092_v40  ;;  %v3439_v7 = vld [vmem:[#allocation5 + $0x938] sm:$0x1] }
0x18e0   : > { %4447 = vmatmul.mubr.f32.vlgmr.msra.gmra.mrb[48].mxu1 %v3135_v50  ;;  %v3128_v51 = vmul.f32 %v3773_v35, %v3120_v26 }
0x18e1   : > { %v5090_v63 = vpop.eup %5089  ;;  %4902 = vmatpush3.bf16.msra.mxu1 %v4899_v17 }
0x18e2   : > { %v3136_v37 = vadd.f32 %v3774_v39, %v3128_v51  ;;  %v3121_v45 = vmul.f32 %v5090_v63, %v3093_v9  ;;  %4904 = vmatprep.subr.bf16.mxu1 %v4903_v60  ;;  %v3362_v9 = vld [vmem:[#allocation5 + $0x908] sm:$0xff] }
0x18e3   : > { %v4908_v38 = vpack.c.bf16 %v3362_v9, %v3361_v8 }
0x18e4   : > { %4449 = vmatprep.mubr.f32.mxu1 %v3136_v37  ;;  %v3129_v55 = vmul.f32 %v3773_v35, %v3121_v45  ;;  %v3521_v37 = vld [vmem:[#allocation5 + $0x948] sm:$0x1] }
0x18e5   : > { %4906 = vmatpush3.bf16.msra.mxu1 %v4903_v60  ;;  %4909 = vmatpush3.bf16.xpose.msra.mxu0 %v4908_v38 }
0x18e6   : > { %v3137_v14 = vadd.f32 %v3774_v39, %v3129_v55  ;;  %4913 = vmatprep.subr.bf16.mxu1 %v5261_v53  ;;  %4910 = vmatprep.subr.bf16.mxu0 %v5261_v53 }
0x18e8   : > { %4450 = vmatmul.mubr.f32.gmra.mrb[50].mxu1 %v3137_v14 }
0x18ed   : > { %4912 = vmatpush3.bf16.xpose.msra.mxu0 %v4911_v52 }
0x19b3   : > { %v4448_v48 = vpop.f32.mrb[48].mxu1 }
0x19b4   : > { %v3219_v20 = vadd.f32 %v4448_v48, %v3775_v61  ;;  %v3213_v10 = vpop.f32.mrb[49].mxu1 }
0x19b5   : > { %v3214_v41 = vadd.f32 %v3775_v61, %v3213_v10 }
0x19b6   : > { %v3233_v59 = vmax.f32 %v3219_v20, 0.0 }
0x19b7   : > { %v3232_v27 = vmax.f32 %v3214_v41, 0.0 }
0x19b9   : > { %4460 = vmatprep.mubr.msk.f32.mxu1 %vm1204_vm10, %v3232_v27 }
0x19ba   : > { %4461 = vmatmul.mubr.msk.f32.vlgmr.msra.gmra.mrb[52].mxu1 %vm1204_vm10, %v3233_v59 }
0x19bb   : > { %v4451_v62 = vpop.f32.mrb[50].mxu1  ;;  %4916 = vmatpush3.bf16.xpose.msk.msra.mxu1 %vm4915_vm12, %v4914_v0 }
0x19bc   : > { %v3229_v3 = vadd.f32 %v4451_v62, %v3775_v61  ;;  %v3223_v46 = vpop.f32.mrb[51].mxu1  ;;  %4484 = vmatprep.subr.mxu1 %v5258_v4 }
0x19bd   : > { %v3224_v40 = vadd.f32 %v3775_v61, %v3223_v46 }
0x19be   : > { %v3235_v5 = vmax.f32 %v3229_v3, 0.0 }
0x19bf   : > { %v3234_v21 = vmax.f32 %v3224_v40, 0.0 }
0x19c1   : > { %4463 = vmatprep.mubr.msk.f32.mxu1 %vm1204_vm10, %v3234_v21 }
0x19c2   : > { %4464 = vmatmul.mubr.msk.f32.gmra.mrb[54].mxu1 %vm1204_vm10, %v3235_v5 }
0x19c3   : > { %4481 = vmatprep.mubr.msk.f32.mxu1 %vm5262_vm11, %v5258_v4 }
0x1a8d   : > { %v4462_v53 = vpop.f32.mrb[52].mxu1 }
0x1a8e   : > { %v3338_v56 = vadd.f32 %v4462_v53, %v5848_v12  ;;  %v3318_v17 = vpop.f32.mrb[53].mxu1 }
0x1a8f   : > { %v3337_v2 = vadd.f32 %v3318_v17, %v5844_v54 }
0x1a90   : > { %v3347_v18 = vadd.f32 %v3780_v1, %v3338_v56 }
0x1a91   : > { %v3346_v13 = vadd.f32 %v3780_v1, %v3337_v2 }
0x1a93   : > { %v3350_v24 = vadd.f32 %v3347_v18, %v3346_v13 }
0x1a95   : > { %v4465_v25 = vpop.f32.mrb[54].mxu1 }
0x1a96   : > { %v3328_v58 = vpop.f32.mrb[55].mxu1  ;;  %v3340_v22 = vadd.f32 %v4465_v25, %v5856_v31 }
0x1a97   : > { %v3339_v28 = vadd.f32 %v3328_v58, %v5852_v57  ;;  %v3520_v57 = vld [vmem:[#allocation5 + $0x940] sm:$0x3] }
0x1a98   : > { %v3349_v29 = vadd.f32 %v3780_v1, %v3340_v22 }
0x1a99   : > { %v3348_v15 = vadd.f32 %v3780_v1, %v3339_v28 }
0x1a9b   : > { %v3351_v30 = vadd.f32 %v3350_v24, %v3348_v15 }
0x1a9d   : > { %v3352_v19 = vadd.f32 %v3351_v30, %v3349_v29 }
0x1a9f   : > { %v3353_v34 = vrot.slane %v3352_v19, 4 }
0x1aa1   : > { %v3354_v35 = vadd.f32 %v3353_v34, %v3352_v19 }
0x1aa3   : > { %v3355_v36 = vrot.slane %v3354_v35, 2 }
0x1aa5   : > { %v3356_v12 = vadd.f32 %v3355_v36, %v3354_v35 }
0x1aa7   : > { %v3357_v39 = vrot.slane %v3356_v12, 1 }
0x1aa9   : > { %v3358_v6 = vadd.f32 %v3357_v39, %v3356_v12 }
0x1aab   : > { %v3360_v54 = vmul.f32 0.03125, %v3358_v6 }
0x1aad   : > { %4475 = vmatmul.mubr.f32.vlgmr.msra.gmra.mrb[76].mxu0 %v3360_v54 }
0x1b80   : > { %v3432_v44 = vpop.f32.mrb[76].mxu0 }
0x1b81   : > { %v3433_v47 = vadd.f32 %v3432_v44, %v3365_v43  ;;  %v4476_v31 = vpop.f32.mrb[77].mxu0 }
0x1b83   : > { %v3436_v49 = vmax.f32 %v3433_v47, 0.0 }
0x1b85   : > { %4482 = vmatmul.mubr.msk.f32.vlgmr.msra.gmra.mrb[56].mxu1 %vm1204_vm10, %v3436_v49 }
0x1b86   : > { %4486 = vmatprep.mubr.msk.f32.mxu1 %vm5262_vm11, %v5258_v4  ;;  %4485 = vmatpush3.xpose.msk.msra.mxu1 %vm3522_vm13, %v3520_v57 }
0x1c58   : > { %v3515_v50 = vpop.f32.mrb[56].mxu1 }
0x1c59   : > { %v3516_v26 = vadd.f32 %v3515_v50, %v3439_v7  ;;  %v4483_v51 = vpop.f32.mrb[57].mxu1 }
0x1c5b   : > { %v3519_v63 = vmax.f32 %v3516_v26, 0.0 }
0x1c5d   : > { %4487 = vmatmul.mubr.msk.f32.vlgmr.msra.gmra.mrb[58].mxu1 %vm3522_vm13, %v3519_v63 }
0x1d30   : > { %v3595_v45 = vpop.f32.mrb[58].mxu1 }
0x1d31   : > { %v3596_v55 = vadd.f32 %v3595_v45, %v3521_v37  ;;  %v4488_v14 = vpop.f32.mrb[59].mxu1 }
0x1d33   : > { %3600 = vst.msk [vmem:[%s213_s27] sm:$0x1] %vm3599_vm14, %v3596_v55 }
0x1d34   : > { %5190 = shalt.err (!%p5187_p2)
}
0x1d35   : > { %s5191_s25 = scalar_lea.hbm %s5888_s5, 16  ;;  %s5195_s26 = scalar_lea.hbm %s5935_s3, 32 }
0x1d36   : > { %p5192_p13 = scmp.ne.s32.totalorder %s5888_s5, %s5191_s25  ;;  %p5196_p4 = scmp.lt.u32.totalorder %s5888_s5, %s5935_s3 }
0x1d37   : > { %p5197_p7 = scmp.lt.u32.totalorder %s5195_s26, %s5191_s25  ;;  %p5199_p8 = scmp.lt.u32.totalorder %s5191_s25, %s5888_s5 }
0x1d38   : > { %p5193_p6 = pnand %p5192_p13, %p5949_p0 }
0x1d39   : > { %p5198_p11 = por %p5197_p7, %p5196_p4 }
0x1d3a   : > { %p5194_p10 = pneg %p5193_p6 }
0x1d3b   : > { %p5200_p1 = por %p5199_p8, %p5198_p11 }
0x1d3d   : > { %p5201_p3 = pnand %p5200_p1, %p5194_p10 }
0x1d3f   : > { %5204 = shalt.err (!%p5201_p3)
}
0x1d40   : > { %4927 = dma.vmem_to_hbm [thread:$0]  (%p5949_p0), %s5890_s28, 16, %s5888_s5, %s3602_s7  }
0x1d41 PF: > { %s3626_s20 = sand.u32 1, %s5235_s12   ;;  %p5950_p5 = scmp.ne.s32.totalorder %s5940_s19, 0 }
0x1d42   : > { %p5951_p9 = scmp.ge.s32.totalorder %s5247_s15, 2  ;;  %s3627_s24 = scalar_lea.sflag [#allocation4], %s3626_s20 }
0x1d44   : > { %p4941_p12 = pnand %p5951_p9, %p5950_p5 }
0x1d46   : > { %5230 = dma.done.wait (!%p4941_p12), %s3627_s24, 16  }
0x1d47   : > { %5232 = vsyncadd (!%p4941_p12), %s3627_s24, 4294967280  ;;  %p17_p2 = scmp.ge.s32.totalorder %s5394_s6, 4   ;;  %s5952_s12 = smov %s5239_s13 }
0x1d48   : > { %s5953_s13 = smov %s5243_s14  ;;  %s5954_s14 = smov %s5403_s9 }
0x1d49   : > { %s5955_s15 = smov %s5394_s6  ;;  %19 = sbr.rel (!%p17_p2) target bundleno = 6 (0x6), region = 85 }
0x1d50   :  { %3631 = vsyncpa [#allocation3], 1 }
0x1d51   :  { %3633 = vsyncpa [#allocation3 + $0x1], 1 }
0x1d52   :  { %3634 = vsyncpa [#allocation6], 1 }
0x1d53   :  { %3635 = vsyncpa [#allocation4], 1 }
0x1d54   :  { %3637 = vsyncpa [#allocation4 + $0x1], 1 }

</bundles_post_ra>
